<compile_context>
chip_gen: v7x
topology: tpu7x:2x2x1
jax: 0.10.0
libtpu: 0.0.40
codegen_flags: <defaults>
</compile_context>

<pallas_src>
import functools

import jax
import jax.numpy as jnp
from jax.experimental import pallas as pl
from jax.experimental.pallas import tpu as pltpu

C = 128            # network width: Linear(4608, x) => x = 4608 // 36 = 128
NUM_CLASSES = 2

SHIFTS3 = (0, 1, 8, 9)                       # 2x2 taps on an 8-pitch canvas
SHIFTS45 = (0, 1, 2, 8, 9, 10, 16, 17, 18)   # 3x3 taps on an 8-pitch canvas


def _tap_gemm(canvas_ref, w_ref, shifts, R, k256):
    """acc[p] = sum_t canvas[p + shifts[t]] @ W[t], for p in [0, R)."""
    f32 = jnp.float32
    acc = None
    if k256:
        # Pairs of taps packed along K (lane concat -> (R, 256)); odd tap padded with a
        # zero weight block host-side, so the duplicated window contributes nothing.
        for p in range(w_ref.shape[0]):
            s0 = shifts[2 * p]
            s1 = shifts[2 * p + 1] if (2 * p + 1) < len(shifts) else s0
            lhs = jnp.concatenate(
                [canvas_ref[s0:s0 + R, :], canvas_ref[s1:s1 + R, :]], axis=1)
            d = jnp.dot(lhs, w_ref[p], preferred_element_type=f32)
            acc = d if acc is None else acc + d
    else:
        for t, s in enumerate(shifts):
            d = jnp.dot(canvas_ref[s:s + R, :], w_ref[t], preferred_element_type=f32)
            acc = d if acc is None else acc + d
    return acc


# ----------------------------------------------------------------------------
# Fused forward kernel (one batch tile of NB images per grid step)
# ----------------------------------------------------------------------------
def _alexnet_kernel(NB, k256,
                    x1_ref, w1_ref, w2_ref, w3_ref, w4_ref, w5_ref,
                    wf1_ref, wf2_ref, wf3_ref, b_ref,
                    out_ref,
                    stage_ref, c3_ref, c4_ref, c5_ref, z_ref):
    f32, bf16 = jnp.float32, jnp.bfloat16
    R = NB * 64 - 18                          # rows computed per implicit-GEMM conv
    z1 = jnp.zeros((1, C), bf16)
    z8 = jnp.zeros((8, C), bf16)
    z9 = jnp.zeros((9, C), bf16)
    z16 = jnp.zeros((16, C), bf16)

    def brow(k):
        return b_ref[k:k + 1, :]              # (1, C) f32

    # ---- conv1 7x7/s4/p2 (MaxPool(k=1,s=2) folded -> eff. stride 8) + conv2 1x1 --------
    a1 = jnp.maximum(
        jnp.dot(x1_ref[...], w1_ref[...], preferred_element_type=f32) + brow(0), 0.0)
    a2 = jnp.maximum(
        jnp.dot(a1.astype(bf16), w2_ref[...], preferred_element_type=f32) + brow(1), 0.0)
    stage_ref[...] = a2.astype(bf16)           # conv2 interior, 8x8 map per image (bf16)

    rb = jnp.maximum(brow(1), 0.0).astype(bf16)   # conv2 value on its 2-wide zero-pad ring

    # ---- MaxPool 3x3/s2 : (12x12 incl. pad ring of rb) -> 5x5 ---------------------------
    # Computed per (image, output row) from 8-row windows of stage_ref; the pad-ring value
    # rb is folded in analytically, and each output row is stored as ONE aligned 8-row
    # block (zero pad columns included) into conv3's 8-pitch canvas.
    POOL1_ROWS = ((0, 0), (0, 2), (2, 4), (4, 6), (6, 7))   # data rows per pool output row
    for n in range(NB):
        base = n * 64
        c3_ref[base:base + 8, :] = z8                  # canvas row 0  (zero pad)
        c3_ref[base + 48:base + 64, :] = z16           # canvas rows 6,7 (pad / unused)
        for oh in range(5):
            lo, hi = POOL1_ROWS[oh]
            vm = stage_ref[base + lo * 8: base + lo * 8 + 8, :]
            for r in range(lo + 1, hi + 1):
                vm = jnp.maximum(vm, stage_ref[base + r * 8: base + r * 8 + 8, :])
            if oh in (0, 4):                           # window spans padded rows
                vm = jnp.maximum(vm, rb)
            p0 = jnp.maximum(vm[0:1, :], rb)
            p1 = jnp.maximum(jnp.maximum(vm[0:1, :], vm[1:2, :]), vm[2:3, :])
            p2 = jnp.maximum(jnp.maximum(vm[2:3, :], vm[3:4, :]), vm[4:5, :])
            p3 = jnp.maximum(jnp.maximum(vm[4:5, :], vm[5:6, :]), vm[6:7, :])
            p4 = jnp.maximum(jnp.maximum(vm[6:7, :], vm[7:8, :]), rb)
            blk = jnp.concatenate([z1, p0, p1, p2, p3, p4, z1, z1], axis=0)   # (8, C)
            c3_ref[base + (oh + 1) * 8: base + (oh + 1) * 8 + 8, :] = blk

    # validity mask for 6x6 conv outputs computed on 8-pitch canvases
    rid = jax.lax.broadcasted_iota(jnp.int32, (R, 1), 0)
    valid = jnp.logical_and(rid % 8 < 6, rid % 64 < 48)

    def conv_to_canvas(src_ref, w_ref, shifts, bias_k, dst_ref):
        acc = _tap_gemm(src_ref, w_ref, shifts, R, k256)
        y = jnp.maximum(acc + brow(bias_k), 0.0)
        y = jnp.where(valid, y, 0.0).astype(bf16)
        # 6x6 output pixel (oh, ow) lands at canvas row (oh+1)*8 + (ow+1): a uniform shift
        # of 9 flat rows; masked garbage rows write exactly the zero pad ring.
        dst_ref[0:9, :] = z9
        dst_ref[9:9 + R, :] = y
        dst_ref[NB * 64 - 9:NB * 64, :] = z9

    conv_to_canvas(c3_ref, w3_ref, SHIFTS3, 2, c4_ref)     # conv3 2x2/p1 : 5x5 -> 6x6
    conv_to_canvas(c4_ref, w4_ref, SHIFTS45, 3, c5_ref)    # conv4 3x3/p1 : 6x6 -> 6x6

    # conv5 3x3/p1 : 6x6 -> 6x6 ; stage its ReLU output (bf16) for the final pool
    acc = _tap_gemm(c5_ref, w5_ref, SHIFTS45, R, k256)
    y5 = jnp.maximum(acc + brow(4), 0.0).astype(bf16)
    stage_ref[0:R, :] = y5

    # ---- MaxPool 3x3/s2 : 6x6 -> 2x2, gathered straight into the fc1 feature row --------
    for n in range(NB):
        base = n * 64
        zs = []
        for a in (0, 1):
            vf = stage_ref[base + 2 * a * 8: base + 2 * a * 8 + 8, :]
            vf = jnp.maximum(
                vf, stage_ref[base + (2 * a + 1) * 8: base + (2 * a + 1) * 8 + 8, :])
            vf = jnp.maximum(
                vf, stage_ref[base + (2 * a + 2) * 8: base + (2 * a + 2) * 8 + 8, :])
            zs.append(jnp.maximum(jnp.maximum(vf[0:1, :], vf[1:2, :]), vf[2:3, :]))
            zs.append(jnp.maximum(jnp.maximum(vf[2:3, :], vf[3:4, :]), vf[4:5, :]))
        z_ref[n:n + 1, :] = jnp.concatenate(zs, axis=1)     # (1, 4*C) bf16

    # ---- classifier (AdaptiveAvgPool(6,6)-on-2x2 + NCHW flatten folded into wf1) --------
    # TODO(synk): nn.Dropout is an eval-mode identity here (no RNG masking).
    h = jnp.maximum(
        jnp.dot(z_ref[...], wf1_ref[...], preferred_element_type=f32) + brow(5), 0.0)
    h = jnp.maximum(
        jnp.dot(h.astype(bf16), wf2_ref[...], preferred_element_type=f32) + brow(6), 0.0)
    out_ref[...] = jnp.dot(h.astype(bf16), wf3_ref[...],
                           preferred_element_type=f32) + brow(7)   # (NB, 128); cols>=2 zero


# ----------------------------------------------------------------------------
# Host-side glue (one-time weight repack / per-call im2col only)
# ----------------------------------------------------------------------------
def _conv1_im2col(x_nchw):
    """NCHW (N,1,64,64) -> conv1 im2col at effective stride 8: (N*64, 128) bf16."""
    N = x_nchw.shape[0]
    xp = jnp.pad(x_nchw[:, 0, :, :], ((0, 0), (2, 2), (2, 2)))        # (N, 68, 68)
    taps = []
    for i in range(7):
        for j in range(7):
            taps.append(jax.lax.slice(xp, (0, i, j), (N, i + 57, j + 57), (1, 8, 8)))
    cols = jnp.stack(taps, axis=-1).reshape(N * 64, 49)               # rows = (n, oh, ow)
    cols = jnp.pad(cols, ((0, 0), (0, C - 49)))                       # lane-pad K 49 -> 128
    return cols.astype(jnp.bfloat16)


def _fold_fc1_weight(w_fc1):
    """Fold AdaptiveAvgPool(6,6)-on-2x2 (1x1 bins == 3x3 replication) + NCHW flatten into fc1."""
    w = w_fc1.reshape(C, 2, 3, 2, 3, C).sum(axis=(2, 4))              # (c, a, b, k)
    return jnp.transpose(w, (1, 2, 0, 3)).reshape(4 * C, C)           # rows = (a, b, c)


def _pack_tap_pairs(w):
    """(T, C, C) tap weights -> (ceil(T/2), 2C, C) K-packed pairs (zero-padded odd tap)."""
    if w.shape[0] % 2:
        w = jnp.concatenate([w, jnp.zeros((1,) + w.shape[1:], w.dtype)], axis=0)
    return w.reshape(w.shape[0] // 2, 2 * C, C)


def _default_k256():
    """K=256 tap packing only where the MXU is 256 deep (not v5 and older)."""
    try:
        kind = jax.devices()[0].device_kind.lower()
    except Exception:
        return True
    return not any(t in kind for t in ("v2", "v3", "v4", "v5"))


def pack_params(p, k256=None):
    """One-time repack: bf16 MXU weights, folded fc1, K-packed conv taps, padded fc3."""
    if k256 is None:
        k256 = _default_k256()
    bf16 = jnp.bfloat16
    w1 = jnp.pad(p["conv1_w"].reshape(49, C), ((0, C - 49), (0, 0)))
    w3 = p["conv3_w"].reshape(4, C, C)
    w4 = p["conv4_w"].reshape(9, C, C)
    w5 = p["conv5_w"].reshape(9, C, C)
    if k256:
        w3, w4, w5 = _pack_tap_pairs(w3), _pack_tap_pairs(w4), _pack_tap_pairs(w5)
    wf3 = jnp.pad(p["fc3_w"], ((0, 0), (0, C - p["fc3_w"].shape[1])))
    bf3 = jnp.pad(p["fc3_b"], (0, C - p["fc3_b"].shape[0]))
    return {
        "w1": w1.astype(bf16),
        "w2": p["conv2_w"].reshape(C, C).astype(bf16),
        "w3": w3.astype(bf16), "w4": w4.astype(bf16), "w5": w5.astype(bf16),
        "wf1": _fold_fc1_weight(p["fc1_w"]).astype(bf16),
        "wf2": p["fc2_w"].astype(bf16),
        "wf3": wf3.astype(bf16),
        "b": jnp.stack([p["conv1_b"], p["conv2_b"], p["conv3_b"], p["conv4_b"],
                        p["conv5_b"], p["fc1_b"], p["fc2_b"], bf3]).astype(jnp.float32),
    }


def _const_spec(arr):
    nd = arr.ndim
    return pl.BlockSpec(arr.shape, lambda i, nd=nd: (0,) * nd)


def alexnet_forward(kp, x_nchw, block_n=8):
    """x_nchw: (N, 1, 64, 64) f32. Returns (N, NUM_CLASSES) f32 logits."""
    N, cin, H, W = x_nchw.shape
    assert cin == 1 and H == 64 and W == 64
    assert block_n % 8 == 0 or N <= block_n
    NB = N if N <= block_n else block_n
    n_tiles = -(-N // NB)
    N_pad = n_tiles * NB
    if N_pad != N:
        x_nchw = jnp.pad(x_nchw, ((0, N_pad - N), (0, 0), (0, 0), (0, 0)))
    x1 = _conv1_im2col(x_nchw)                               # (N_pad*64, 128) bf16
    k256 = (kp["w3"].shape[1] == 2 * C)

    out = pl.pallas_call(
        functools.partial(_alexnet_kernel, NB, k256),
        out_shape=jax.ShapeDtypeStruct((N_pad, C), jnp.float32),
        grid_spec=pltpu.PrefetchScalarGridSpec(
            num_scalar_prefetch=0,
            grid=(n_tiles,),
            in_specs=[
                pl.BlockSpec((NB * 64, C), lambda i: (i, 0)),   # conv1 im2col (batch-tiled)
                _const_spec(kp["w1"]), _const_spec(kp["w2"]), _const_spec(kp["w3"]),
                _const_spec(kp["w4"]), _const_spec(kp["w5"]),
                _const_spec(kp["wf1"]), _const_spec(kp["wf2"]), _const_spec(kp["wf3"]),
                _const_spec(kp["b"]),
            ],
            out_specs=pl.BlockSpec((NB, C), lambda i: (i, 0)),
            scratch_shapes=[
                pltpu.VMEM((NB * 64, C), jnp.bfloat16),   # stage: conv2 out, later conv5 out
                pltpu.VMEM((NB * 64, C), jnp.bfloat16),   # conv3 input canvas (8-pitch)
                pltpu.VMEM((NB * 64, C), jnp.bfloat16),   # conv4 input canvas
                pltpu.VMEM((NB * 64, C), jnp.bfloat16),   # conv5 input canvas
                pltpu.VMEM((NB, 4 * C), jnp.bfloat16),    # pooled features feeding fc1
            ],
        ),
        compiler_params=pltpu.CompilerParams(
            dimension_semantics=("parallel",),
            vmem_limit_bytes=32 * 1024 * 1024,
        ),
    )(x1, kp["w1"], kp["w2"], kp["w3"], kp["w4"], kp["w5"],
      kp["wf1"], kp["wf2"], kp["wf3"], kp["b"])
    return out[:N, :NUM_CLASSES]


# ----------------------------------------------------------------------------
# Parameter init (torch-equivalent layouts: conv HWIO, linear (in, out))
# ----------------------------------------------------------------------------
def init_params(key, num_classes=NUM_CLASSES):
    ks = jax.random.split(key, 16)
    s = 0.02

    def w(k, shape):
        return jax.random.normal(k, shape, jnp.float32) * s

    return {
        "conv1_w": w(ks[0], (7, 7, 1, C)),    "conv1_b": w(ks[1], (C,)),
        "conv2_w": w(ks[2], (1, 1, C, C)),    "conv2_b": w(ks[3], (C,)),
        "conv3_w": w(ks[4], (2, 2, C, C)),    "conv3_b": w(ks[5], (C,)),
        "conv4_w": w(ks[6], (3, 3, C, C)),    "conv4_b": w(ks[7], (C,)),
        "conv5_w": w(ks[8], (3, 3, C, C)),    "conv5_b": w(ks[9], (C,)),
        "fc1_w": w(ks[10], (36 * C, C)),      "fc1_b": w(ks[11], (C,)),
        "fc2_w": w(ks[12], (C, C)),           "fc2_b": w(ks[13], (C,)),
        "fc3_w": w(ks[14], (C, num_classes)), "fc3_b": w(ks[15], (num_classes,)),
    }


if __name__ == "__main__":
    key = jax.random.PRNGKey(0)
    kp_key, kx = jax.random.split(key)

    params = init_params(kp_key)
    kparams = pack_params(params)             # one-time host-side weight repack / folding

    # NCHW input, 1 channel, 64x64 spatial (the size implied by Linear(4608, x)).
    x = jax.random.normal(kx, (2, 1, 64, 64), jnp.float32)

    fwd = jax.jit(alexnet_forward)
    out = jax.block_until_ready(fwd(kparams, x))
    assert out.shape == (2, NUM_CLASSES), out.shape
    assert bool(jnp.all(jnp.isfinite(out)))
    print("KERNEL_OK")
</pallas_src>

<mosaic_0001>
module attributes {stable_mosaic.version = 11 : i64} {
  func.func @_alexnet_kernel(%arg0: i32, %arg1: memref<128x128xbf16, #tpu.memory_space<vmem>>, %arg2: memref<128x128xbf16, #tpu.memory_space<vmem>>, %arg3: memref<128x128xbf16, #tpu.memory_space<vmem>>, %arg4: memref<2x256x128xbf16, #tpu.memory_space<vmem>>, %arg5: memref<5x256x128xbf16, #tpu.memory_space<vmem>>, %arg6: memref<5x256x128xbf16, #tpu.memory_space<vmem>>, %arg7: memref<512x128xbf16, #tpu.memory_space<vmem>>, %arg8: memref<128x128xbf16, #tpu.memory_space<vmem>>, %arg9: memref<128x128xbf16, #tpu.memory_space<vmem>>, %arg10: memref<8x128xf32, #tpu.memory_space<vmem>>, %arg11: memref<2x128xf32, #tpu.memory_space<vmem>>, %arg12: memref<128x128xbf16, #tpu.memory_space<vmem>>, %arg13: memref<128x128xbf16, #tpu.memory_space<vmem>>, %arg14: memref<128x128xbf16, #tpu.memory_space<vmem>>, %arg15: memref<128x128xbf16, #tpu.memory_space<vmem>>, %arg16: memref<2x512xbf16, #tpu.memory_space<vmem>>) attributes {dimension_semantics = [#tpu.dimension_semantics<parallel>], iteration_bounds = array<i64: 1>, scalar_prefetch = 0 : i64, scratch_operands = 5 : i64, tpu.core_type = #tpu.core_type<tc>, window_params = [{transform_indices = @transform_0, window_bounds = array<i64: 128, 128>}, {pipeline_mode = #tpu.pipeline_mode<synchronous>, transform_indices = @transform_1, window_bounds = array<i64: 128, 128>}, {pipeline_mode = #tpu.pipeline_mode<synchronous>, transform_indices = @transform_2, window_bounds = array<i64: 128, 128>}, {pipeline_mode = #tpu.pipeline_mode<synchronous>, transform_indices = @transform_3, window_bounds = array<i64: 2, 256, 128>}, {pipeline_mode = #tpu.pipeline_mode<synchronous>, transform_indices = @transform_4, window_bounds = array<i64: 5, 256, 128>}, {pipeline_mode = #tpu.pipeline_mode<synchronous>, transform_indices = @transform_5, window_bounds = array<i64: 5, 256, 128>}, {pipeline_mode = #tpu.pipeline_mode<synchronous>, transform_indices = @transform_6, window_bounds = array<i64: 512, 128>}, {pipeline_mode = #tpu.pipeline_mode<synchronous>, transform_indices = @transform_7, window_bounds = array<i64: 128, 128>}, {pipeline_mode = #tpu.pipeline_mode<synchronous>, transform_indices = @transform_8, window_bounds = array<i64: 128, 128>}, {pipeline_mode = #tpu.pipeline_mode<synchronous>, transform_indices = @transform_9, window_bounds = array<i64: 8, 128>}, {transform_indices = @transform_10, window_bounds = array<i64: 2, 128>}]} {
    %cst = arith.constant 0.000000e+00 : bf16
    %0 = vector.broadcast %cst : bf16 to vector<1x128xbf16>
    %cst_0 = arith.constant 0.000000e+00 : bf16
    %1 = vector.broadcast %cst_0 : bf16 to vector<8x128xbf16>
    %cst_1 = arith.constant 0.000000e+00 : bf16
    %2 = vector.broadcast %cst_1 : bf16 to vector<9x128xbf16>
    %cst_2 = arith.constant 0.000000e+00 : bf16
    %3 = vector.broadcast %cst_2 : bf16 to vector<16x128xbf16>
    %c0 = arith.constant 0 : index
    %c0_3 = arith.constant 0 : index
    %4 = vector.load %arg1[%c0, %c0_3] : memref<128x128xbf16, #tpu.memory_space<vmem>>, vector<128x128xbf16>
    %c0_4 = arith.constant 0 : index
    %c0_5 = arith.constant 0 : index
    %5 = vector.load %arg2[%c0_4, %c0_5] : memref<128x128xbf16, #tpu.memory_space<vmem>>, vector<128x128xbf16>
    %cst_6 = arith.constant dense<0.000000e+00> : vector<128x128xf32>
    %6 = tpu.matmul %4, %5, %cst_6 {dimension_numbers = #tpu.dot_dimension_numbers<[1], [0], [0], [1], [0, 0, 1, 1], [], []>} : vector<128x128xbf16>, vector<128x128xbf16>, vector<128x128xf32> -> vector<128x128xf32>
    %c0_7 = arith.constant 0 : index
    %c0_8 = arith.constant 0 : index
    %7 = vector.load %arg10[%c0_7, %c0_8] : memref<8x128xf32, #tpu.memory_space<vmem>>, vector<1x128xf32>
    %8 = vector.broadcast %7 : vector<1x128xf32> to vector<128x128xf32>
    %9 = arith.addf %6, %8 : vector<128x128xf32>
    %cst_9 = arith.constant 0.000000e+00 : f32
    %10 = vector.broadcast %cst_9 : f32 to vector<128x128xf32>
    %11 = arith.maximumf %9, %10 : vector<128x128xf32>
    %12 = arith.truncf %11 : vector<128x128xf32> to vector<128x128xbf16>
    %c0_10 = arith.constant 0 : index
    %c0_11 = arith.constant 0 : index
    %13 = vector.load %arg3[%c0_10, %c0_11] : memref<128x128xbf16, #tpu.memory_space<vmem>>, vector<128x128xbf16>
    %cst_12 = arith.constant dense<0.000000e+00> : vector<128x128xf32>
    %14 = tpu.matmul %12, %13, %cst_12 {dimension_numbers = #tpu.dot_dimension_numbers<[1], [0], [0], [1], [0, 0, 1, 1], [], []>} : vector<128x128xbf16>, vector<128x128xbf16>, vector<128x128xf32> -> vector<128x128xf32>
    %c1 = arith.constant 1 : index
    %c0_13 = arith.constant 0 : index
    %15 = vector.load %arg10[%c1, %c0_13] : memref<8x128xf32, #tpu.memory_space<vmem>>, vector<1x128xf32>
    %16 = vector.broadcast %15 : vector<1x128xf32> to vector<128x128xf32>
    %17 = arith.addf %14, %16 : vector<128x128xf32>
    %cst_14 = arith.constant 0.000000e+00 : f32
    %18 = vector.broadcast %cst_14 : f32 to vector<128x128xf32>
    %19 = arith.maximumf %17, %18 : vector<128x128xf32>
    %20 = arith.truncf %19 : vector<128x128xf32> to vector<128x128xbf16>
    %c0_15 = arith.constant 0 : index
    %c0_16 = arith.constant 0 : index
    %21 = vector.load %arg12[%c0_15, %c0_16] : memref<128x128xbf16, #tpu.memory_space<vmem>>, vector<128x128xbf16>
    tpu.vector_store %arg12[%c0_15, %c0_16], %20 {strides = array<i32>} : memref<128x128xbf16, #tpu.memory_space<vmem>>, vector<128x128xbf16>,
    %c1_17 = arith.constant 1 : index
    %c0_18 = arith.constant 0 : index
    %22 = vector.load %arg10[%c1_17, %c0_18] : memref<8x128xf32, #tpu.memory_space<vmem>>, vector<1x128xf32>
    %cst_19 = arith.constant 0.000000e+00 : f32
    %23 = vector.broadcast %cst_19 : f32 to vector<1x128xf32>
    %24 = arith.maximumf %22, %23 : vector<1x128xf32>
    %25 = arith.truncf %24 : vector<1x128xf32> to vector<1x128xbf16>
    %c0_20 = arith.constant 0 : index
    %c0_21 = arith.constant 0 : index
    %26 = vector.load %arg13[%c0_20, %c0_21] : memref<128x128xbf16, #tpu.memory_space<vmem>>, vector<8x128xbf16>
    tpu.vector_store %arg13[%c0_20, %c0_21], %1 {strides = array<i32>} : memref<128x128xbf16, #tpu.memory_space<vmem>>, vector<8x128xbf16>,
    %c48 = arith.constant 48 : index
    %c0_22 = arith.constant 0 : index
    %27 = vector.load %arg13[%c48, %c0_22] : memref<128x128xbf16, #tpu.memory_space<vmem>>, vector<16x128xbf16>
    tpu.vector_store %arg13[%c48, %c0_22], %3 {strides = array<i32>} : memref<128x128xbf16, #tpu.memory_space<vmem>>, vector<16x128xbf16>,
    %c0_23 = arith.constant 0 : index
    %c0_24 = arith.constant 0 : index
    %28 = vector.load %arg12[%c0_23, %c0_24] : memref<128x128xbf16, #tpu.memory_space<vmem>>, vector<8x128xbf16>
    %29 = vector.broadcast %25 : vector<1x128xbf16> to vector<8x128xbf16>
    %30 = arith.maximumf %28, %29 : vector<8x128xbf16>
    %31 = vector.extract_strided_slice %30 {offsets = [0, 0], sizes = [1, 128], strides = [1, 1]} : vector<8x128xbf16> to vector<1x128xbf16>
    %32 = arith.maximumf %31, %25 : vector<1x128xbf16>
    %33 = vector.extract_strided_slice %30 {offsets = [0, 0], sizes = [1, 128], strides = [1, 1]} : vector<8x128xbf16> to vector<1x128xbf16>
    %34 = vector.extract_strided_slice %30 {offsets = [1, 0], sizes = [1, 128], strides = [1, 1]} : vector<8x128xbf16> to vector<1x128xbf16>
    %35 = arith.maximumf %33, %34 : vector<1x128xbf16>
    %36 = vector.extract_strided_slice %30 {offsets = [2, 0], sizes = [1, 128], strides = [1, 1]} : vector<8x128xbf16> to vector<1x128xbf16>
    %37 = arith.maximumf %35, %36 : vector<1x128xbf16>
    %38 = vector.extract_strided_slice %30 {offsets = [2, 0], sizes = [1, 128], strides = [1, 1]} : vector<8x128xbf16> to vector<1x128xbf16>
    %39 = vector.extract_strided_slice %30 {offsets = [3, 0], sizes = [1, 128], strides = [1, 1]} : vector<8x128xbf16> to vector<1x128xbf16>
    %40 = arith.maximumf %38, %39 : vector<1x128xbf16>
    %41 = vector.extract_strided_slice %30 {offsets = [4, 0], sizes = [1, 128], strides = [1, 1]} : vector<8x128xbf16> to vector<1x128xbf16>
    %42 = arith.maximumf %40, %41 : vector<1x128xbf16>
    %43 = vector.extract_strided_slice %30 {offsets = [4, 0], sizes = [1, 128], strides = [1, 1]} : vector<8x128xbf16> to vector<1x128xbf16>
    %44 = vector.extract_strided_slice %30 {offsets = [5, 0], sizes = [1, 128], strides = [1, 1]} : vector<8x128xbf16> to vector<1x128xbf16>
    %45 = arith.maximumf %43, %44 : vector<1x128xbf16>
    %46 = vector.extract_strided_slice %30 {offsets = [6, 0], sizes = [1, 128], strides = [1, 1]} : vector<8x128xbf16> to vector<1x128xbf16>
    %47 = arith.maximumf %45, %46 : vector<1x128xbf16>
    %48 = vector.extract_strided_slice %30 {offsets = [6, 0], sizes = [1, 128], strides = [1, 1]} : vector<8x128xbf16> to vector<1x128xbf16>
    %49 = vector.extract_strided_slice %30 {offsets = [7, 0], sizes = [1, 128], strides = [1, 1]} : vector<8x128xbf16> to vector<1x128xbf16>
    %50 = arith.maximumf %48, %49 : vector<1x128xbf16>
    %51 = arith.maximumf %50, %25 : vector<1x128xbf16>
    %52 = tpu.concatenate %0, %32, %37, %42, %47, %51, %0, %0 in 0 : vector<1x128xbf16>, vector<1x128xbf16>, vector<1x128xbf16>, vector<1x128xbf16>, vector<1x128xbf16>, vector<1x128xbf16>, vector<1x128xbf16>, vector<1x128xbf16> -> vector<8x128xbf16>
    %c8 = arith.constant 8 : index
    %c0_25 = arith.constant 0 : index
    %53 = vector.load %arg13[%c8, %c0_25] : memref<128x128xbf16, #tpu.memory_space<vmem>>, vector<8x128xbf16>
    tpu.vector_store %arg13[%c8, %c0_25], %52 {strides = array<i32>} : memref<128x128xbf16, #tpu.memory_space<vmem>>, vector<8x128xbf16>,
    %c0_26 = arith.constant 0 : index
    %c0_27 = arith.constant 0 : index
    %54 = vector.load %arg12[%c0_26, %c0_27] : memref<128x128xbf16, #tpu.memory_space<vmem>>, vector<8x128xbf16>
    %c8_28 = arith.constant 8 : index
    %c0_29 = arith.constant 0 : index
    %55 = vector.load %arg12[%c8_28, %c0_29] : memref<128x128xbf16, #tpu.memory_space<vmem>>, vector<8x128xbf16>
    %56 = arith.maximumf %54, %55 : vector<8x128xbf16>
    %c16 = arith.constant 16 : index
    %c0_30 = arith.constant 0 : index
    %57 = vector.load %arg12[%c16, %c0_30] : memref<128x128xbf16, #tpu.memory_space<vmem>>, vector<8x128xbf16>
    %58 = arith.maximumf %56, %57 : vector<8x128xbf16>
    %59 = vector.extract_strided_slice %58 {offsets = [0, 0], sizes = [1, 128], strides = [1, 1]} : vector<8x128xbf16> to vector<1x128xbf16>
    %60 = arith.maximumf %59, %25 : vector<1x128xbf16>
    %61 = vector.extract_strided_slice %58 {offsets = [0, 0], sizes = [1, 128], strides = [1, 1]} : vector<8x128xbf16> to vector<1x128xbf16>
    %62 = vector.extract_strided_slice %58 {offsets = [1, 0], sizes = [1, 128], strides = [1, 1]} : vector<8x128xbf16> to vector<1x128xbf16>
    %63 = arith.maximumf %61, %62 : vector<1x128xbf16>
    %64 = vector.extract_strided_slice %58 {offsets = [2, 0], sizes = [1, 128], strides = [1, 1]} : vector<8x128xbf16> to vector<1x128xbf16>
    %65 = arith.maximumf %63, %64 : vector<1x128xbf16>
    %66 = vector.extract_strided_slice %58 {offsets = [2, 0], sizes = [1, 128], strides = [1, 1]} : vector<8x128xbf16> to vector<1x128xbf16>
    %67 = vector.extract_strided_slice %58 {offsets = [3, 0], sizes = [1, 128], strides = [1, 1]} : vector<8x128xbf16> to vector<1x128xbf16>
    %68 = arith.maximumf %66, %67 : vector<1x128xbf16>
    %69 = vector.extract_strided_slice %58 {offsets = [4, 0], sizes = [1, 128], strides = [1, 1]} : vector<8x128xbf16> to vector<1x128xbf16>
    %70 = arith.maximumf %68, %69 : vector<1x128xbf16>
    %71 = vector.extract_strided_slice %58 {offsets = [4, 0], sizes = [1, 128], strides = [1, 1]} : vector<8x128xbf16> to vector<1x128xbf16>
    %72 = vector.extract_strided_slice %58 {offsets = [5, 0], sizes = [1, 128], strides = [1, 1]} : vector<8x128xbf16> to vector<1x128xbf16>
    %73 = arith.maximumf %71, %72 : vector<1x128xbf16>
    %74 = vector.extract_strided_slice %58 {offsets = [6, 0], sizes = [1, 128], strides = [1, 1]} : vector<8x128xbf16> to vector<1x128xbf16>
    %75 = arith.maximumf %73, %74 : vector<1x128xbf16>
    %76 = vector.extract_strided_slice %58 {offsets = [6, 0], sizes = [1, 128], strides = [1, 1]} : vector<8x128xbf16> to vector<1x128xbf16>
    %77 = vector.extract_strided_slice %58 {offsets = [7, 0], sizes = [1, 128], strides = [1, 1]} : vector<8x128xbf16> to vector<1x128xbf16>
    %78 = arith.maximumf %76, %77 : vector<1x128xbf16>
    %79 = arith.maximumf %78, %25 : vector<1x128xbf16>
    %80 = tpu.concatenate %0, %60, %65, %70, %75, %79, %0, %0 in 0 : vector<1x128xbf16>, vector<1x128xbf16>, vector<1x128xbf16>, vector<1x128xbf16>, vector<1x128xbf16>, vector<1x128xbf16>, vector<1x128xbf16>, vector<1x128xbf16> -> vector<8x128xbf16>
    %c16_31 = arith.constant 16 : index
    %c0_32 = arith.constant 0 : index
    %81 = vector.load %arg13[%c16_31, %c0_32] : memref<128x128xbf16, #tpu.memory_space<vmem>>, vector<8x128xbf16>
    tpu.vector_store %arg13[%c16_31, %c0_32], %80 {strides = array<i32>} : memref<128x128xbf16, #tpu.memory_space<vmem>>, vector<8x128xbf16>,
    %c16_33 = arith.constant 16 : index
    %c0_34 = arith.constant 0 : index
    %82 = vector.load %arg12[%c16_33, %c0_34] : memref<128x128xbf16, #tpu.memory_space<vmem>>, vector<8x128xbf16>
    %c24 = arith.constant 24 : index
    %c0_35 = arith.constant 0 : index
    %83 = vector.load %arg12[%c24, %c0_35] : memref<128x128xbf16, #tpu.memory_space<vmem>>, vector<8x128xbf16>
    %84 = arith.maximumf %82, %83 : vector<8x128xbf16>
    %c32 = arith.constant 32 : index
    %c0_36 = arith.constant 0 : index
    %85 = vector.load %arg12[%c32, %c0_36] : memref<128x128xbf16, #tpu.memory_space<vmem>>, vector<8x128xbf16>
    %86 = arith.maximumf %84, %85 : vector<8x128xbf16>
    %87 = vector.extract_strided_slice %86 {offsets = [0, 0], sizes = [1, 128], strides = [1, 1]} : vector<8x128xbf16> to vector<1x128xbf16>
    %88 = arith.maximumf %87, %25 : vector<1x128xbf16>
    %89 = vector.extract_strided_slice %86 {offsets = [0, 0], sizes = [1, 128], strides = [1, 1]} : vector<8x128xbf16> to vector<1x128xbf16>
    %90 = vector.extract_strided_slice %86 {offsets = [1, 0], sizes = [1, 128], strides = [1, 1]} : vector<8x128xbf16> to vector<1x128xbf16>
    %91 = arith.maximumf %89, %90 : vector<1x128xbf16>
    %92 = vector.extract_strided_slice %86 {offsets = [2, 0], sizes = [1, 128], strides = [1, 1]} : vector<8x128xbf16> to vector<1x128xbf16>
    %93 = arith.maximumf %91, %92 : vector<1x128xbf16>
    %94 = vector.extract_strided_slice %86 {offsets = [2, 0], sizes = [1, 128], strides = [1, 1]} : vector<8x128xbf16> to vector<1x128xbf16>
    %95 = vector.extract_strided_slice %86 {offsets = [3, 0], sizes = [1, 128], strides = [1, 1]} : vector<8x128xbf16> to vector<1x128xbf16>
    %96 = arith.maximumf %94, %95 : vector<1x128xbf16>
    %97 = vector.extract_strided_slice %86 {offsets = [4, 0], sizes = [1, 128], strides = [1, 1]} : vector<8x128xbf16> to vector<1x128xbf16>
    %98 = arith.maximumf %96, %97 : vector<1x128xbf16>
    %99 = vector.extract_strided_slice %86 {offsets = [4, 0], sizes = [1, 128], strides = [1, 1]} : vector<8x128xbf16> to vector<1x128xbf16>
    %100 = vector.extract_strided_slice %86 {offsets = [5, 0], sizes = [1, 128], strides = [1, 1]} : vector<8x128xbf16> to vector<1x128xbf16>
    %101 = arith.maximumf %99, %100 : vector<1x128xbf16>
    %102 = vector.extract_strided_slice %86 {offsets = [6, 0], sizes = [1, 128], strides = [1, 1]} : vector<8x128xbf16> to vector<1x128xbf16>
    %103 = arith.maximumf %101, %102 : vector<1x128xbf16>
    %104 = vector.extract_strided_slice %86 {offsets = [6, 0], sizes = [1, 128], strides = [1, 1]} : vector<8x128xbf16> to vector<1x128xbf16>
    %105 = vector.extract_strided_slice %86 {offsets = [7, 0], sizes = [1, 128], strides = [1, 1]} : vector<8x128xbf16> to vector<1x128xbf16>
    %106 = arith.maximumf %104, %105 : vector<1x128xbf16>
    %107 = arith.maximumf %106, %25 : vector<1x128xbf16>
    %108 = tpu.concatenate %0, %88, %93, %98, %103, %107, %0, %0 in 0 : vector<1x128xbf16>, vector<1x128xbf16>, vector<1x128xbf16>, vector<1x128xbf16>, vector<1x128xbf16>, vector<1x128xbf16>, vector<1x128xbf16>, vector<1x128xbf16> -> vector<8x128xbf16>
    %c24_37 = arith.constant 24 : index
    %c0_38 = arith.constant 0 : index
    %109 = vector.load %arg13[%c24_37, %c0_38] : memref<128x128xbf16, #tpu.memory_space<vmem>>, vector<8x128xbf16>
    tpu.vector_store %arg13[%c24_37, %c0_38], %108 {strides = array<i32>} : memref<128x128xbf16, #tpu.memory_space<vmem>>, vector<8x128xbf16>,
    %c32_39 = arith.constant 32 : index
    %c0_40 = arith.constant 0 : index
    %110 = vector.load %arg12[%c32_39, %c0_40] : memref<128x128xbf16, #tpu.memory_space<vmem>>, vector<8x128xbf16>
    %c40 = arith.constant 40 : index
    %c0_41 = arith.constant 0 : index
    %111 = vector.load %arg12[%c40, %c0_41] : memref<128x128xbf16, #tpu.memory_space<vmem>>, vector<8x128xbf16>
    %112 = arith.maximumf %110, %111 : vector<8x128xbf16>
    %c48_42 = arith.constant 48 : index
    %c0_43 = arith.constant 0 : index
    %113 = vector.load %arg12[%c48_42, %c0_43] : memref<128x128xbf16, #tpu.memory_space<vmem>>, vector<8x128xbf16>
    %114 = arith.maximumf %112, %113 : vector<8x128xbf16>
    %115 = vector.extract_strided_slice %114 {offsets = [0, 0], sizes = [1, 128], strides = [1, 1]} : vector<8x128xbf16> to vector<1x128xbf16>
    %116 = arith.maximumf %115, %25 : vector<1x128xbf16>
    %117 = vector.extract_strided_slice %114 {offsets = [0, 0], sizes = [1, 128], strides = [1, 1]} : vector<8x128xbf16> to vector<1x128xbf16>
    %118 = vector.extract_strided_slice %114 {offsets = [1, 0], sizes = [1, 128], strides = [1, 1]} : vector<8x128xbf16> to vector<1x128xbf16>
    %119 = arith.maximumf %117, %118 : vector<1x128xbf16>
    %120 = vector.extract_strided_slice %114 {offsets = [2, 0], sizes = [1, 128], strides = [1, 1]} : vector<8x128xbf16> to vector<1x128xbf16>
    %121 = arith.maximumf %119, %120 : vector<1x128xbf16>
    %122 = vector.extract_strided_slice %114 {offsets = [2, 0], sizes = [1, 128], strides = [1, 1]} : vector<8x128xbf16> to vector<1x128xbf16>
    %123 = vector.extract_strided_slice %114 {offsets = [3, 0], sizes = [1, 128], strides = [1, 1]} : vector<8x128xbf16> to vector<1x128xbf16>
    %124 = arith.maximumf %122, %123 : vector<1x128xbf16>
    %125 = vector.extract_strided_slice %114 {offsets = [4, 0], sizes = [1, 128], strides = [1, 1]} : vector<8x128xbf16> to vector<1x128xbf16>
    %126 = arith.maximumf %124, %125 : vector<1x128xbf16>
    %127 = vector.extract_strided_slice %114 {offsets = [4, 0], sizes = [1, 128], strides = [1, 1]} : vector<8x128xbf16> to vector<1x128xbf16>
    %128 = vector.extract_strided_slice %114 {offsets = [5, 0], sizes = [1, 128], strides = [1, 1]} : vector<8x128xbf16> to vector<1x128xbf16>
    %129 = arith.maximumf %127, %128 : vector<1x128xbf16>
    %130 = vector.extract_strided_slice %114 {offsets = [6, 0], sizes = [1, 128], strides = [1, 1]} : vector<8x128xbf16> to vector<1x128xbf16>
    %131 = arith.maximumf %129, %130 : vector<1x128xbf16>
    %132 = vector.extract_strided_slice %114 {offsets = [6, 0], sizes = [1, 128], strides = [1, 1]} : vector<8x128xbf16> to vector<1x128xbf16>
    %133 = vector.extract_strided_slice %114 {offsets = [7, 0], sizes = [1, 128], strides = [1, 1]} : vector<8x128xbf16> to vector<1x128xbf16>
    %134 = arith.maximumf %132, %133 : vector<1x128xbf16>
    %135 = arith.maximumf %134, %25 : vector<1x128xbf16>
    %136 = tpu.concatenate %0, %116, %121, %126, %131, %135, %0, %0 in 0 : vector<1x128xbf16>, vector<1x128xbf16>, vector<1x128xbf16>, vector<1x128xbf16>, vector<1x128xbf16>, vector<1x128xbf16>, vector<1x128xbf16>, vector<1x128xbf16> -> vector<8x128xbf16>
    %c32_44 = arith.constant 32 : index
    %c0_45 = arith.constant 0 : index
    %137 = vector.load %arg13[%c32_44, %c0_45] : memref<128x128xbf16, #tpu.memory_space<vmem>>, vector<8x128xbf16>
    tpu.vector_store %arg13[%c32_44, %c0_45], %136 {strides = array<i32>} : memref<128x128xbf16, #tpu.memory_space<vmem>>, vector<8x128xbf16>,
    %c48_46 = arith.constant 48 : index
    %c0_47 = arith.constant 0 : index
    %138 = vector.load %arg12[%c48_46, %c0_47] : memref<128x128xbf16, #tpu.memory_space<vmem>>, vector<8x128xbf16>
    %c56 = arith.constant 56 : index
    %c0_48 = arith.constant 0 : index
    %139 = vector.load %arg12[%c56, %c0_48] : memref<128x128xbf16, #tpu.memory_space<vmem>>, vector<8x128xbf16>
    %140 = arith.maximumf %138, %139 : vector<8x128xbf16>
    %141 = vector.broadcast %25 : vector<1x128xbf16> to vector<8x128xbf16>
    %142 = arith.maximumf %140, %141 : vector<8x128xbf16>
    %143 = vector.extract_strided_slice %142 {offsets = [0, 0], sizes = [1, 128], strides = [1, 1]} : vector<8x128xbf16> to vector<1x128xbf16>
    %144 = arith.maximumf %143, %25 : vector<1x128xbf16>
    %145 = vector.extract_strided_slice %142 {offsets = [0, 0], sizes = [1, 128], strides = [1, 1]} : vector<8x128xbf16> to vector<1x128xbf16>
    %146 = vector.extract_strided_slice %142 {offsets = [1, 0], sizes = [1, 128], strides = [1, 1]} : vector<8x128xbf16> to vector<1x128xbf16>
    %147 = arith.maximumf %145, %146 : vector<1x128xbf16>
    %148 = vector.extract_strided_slice %142 {offsets = [2, 0], sizes = [1, 128], strides = [1, 1]} : vector<8x128xbf16> to vector<1x128xbf16>
    %149 = arith.maximumf %147, %148 : vector<1x128xbf16>
    %150 = vector.extract_strided_slice %142 {offsets = [2, 0], sizes = [1, 128], strides = [1, 1]} : vector<8x128xbf16> to vector<1x128xbf16>
    %151 = vector.extract_strided_slice %142 {offsets = [3, 0], sizes = [1, 128], strides = [1, 1]} : vector<8x128xbf16> to vector<1x128xbf16>
    %152 = arith.maximumf %150, %151 : vector<1x128xbf16>
    %153 = vector.extract_strided_slice %142 {offsets = [4, 0], sizes = [1, 128], strides = [1, 1]} : vector<8x128xbf16> to vector<1x128xbf16>
    %154 = arith.maximumf %152, %153 : vector<1x128xbf16>
    %155 = vector.extract_strided_slice %142 {offsets = [4, 0], sizes = [1, 128], strides = [1, 1]} : vector<8x128xbf16> to vector<1x128xbf16>
    %156 = vector.extract_strided_slice %142 {offsets = [5, 0], sizes = [1, 128], strides = [1, 1]} : vector<8x128xbf16> to vector<1x128xbf16>
    %157 = arith.maximumf %155, %156 : vector<1x128xbf16>
    %158 = vector.extract_strided_slice %142 {offsets = [6, 0], sizes = [1, 128], strides = [1, 1]} : vector<8x128xbf16> to vector<1x128xbf16>
    %159 = arith.maximumf %157, %158 : vector<1x128xbf16>
    %160 = vector.extract_strided_slice %142 {offsets = [6, 0], sizes = [1, 128], strides = [1, 1]} : vector<8x128xbf16> to vector<1x128xbf16>
    %161 = vector.extract_strided_slice %142 {offsets = [7, 0], sizes = [1, 128], strides = [1, 1]} : vector<8x128xbf16> to vector<1x128xbf16>
    %162 = arith.maximumf %160, %161 : vector<1x128xbf16>
    %163 = arith.maximumf %162, %25 : vector<1x128xbf16>
    %164 = tpu.concatenate %0, %144, %149, %154, %159, %163, %0, %0 in 0 : vector<1x128xbf16>, vector<1x128xbf16>, vector<1x128xbf16>, vector<1x128xbf16>, vector<1x128xbf16>, vector<1x128xbf16>, vector<1x128xbf16>, vector<1x128xbf16> -> vector<8x128xbf16>
    %c40_49 = arith.constant 40 : index
    %c0_50 = arith.constant 0 : index
    %165 = vector.load %arg13[%c40_49, %c0_50] : memref<128x128xbf16, #tpu.memory_space<vmem>>, vector<8x128xbf16>
    tpu.vector_store %arg13[%c40_49, %c0_50], %164 {strides = array<i32>} : memref<128x128xbf16, #tpu.memory_space<vmem>>, vector<8x128xbf16>,
    %c64 = arith.constant 64 : index
    %c0_51 = arith.constant 0 : index
    %166 = vector.load %arg13[%c64, %c0_51] : memref<128x128xbf16, #tpu.memory_space<vmem>>, vector<8x128xbf16>
    tpu.vector_store %arg13[%c64, %c0_51], %1 {strides = array<i32>} : memref<128x128xbf16, #tpu.memory_space<vmem>>, vector<8x128xbf16>,
    %c112 = arith.constant 112 : index
    %c0_52 = arith.constant 0 : index
    %167 = vector.load %arg13[%c112, %c0_52] : memref<128x128xbf16, #tpu.memory_space<vmem>>, vector<16x128xbf16>
    tpu.vector_store %arg13[%c112, %c0_52], %3 {strides = array<i32>} : memref<128x128xbf16, #tpu.memory_space<vmem>>, vector<16x128xbf16>,
    %c64_53 = arith.constant 64 : index
    %c0_54 = arith.constant 0 : index
    %168 = vector.load %arg12[%c64_53, %c0_54] : memref<128x128xbf16, #tpu.memory_space<vmem>>, vector<8x128xbf16>
    %169 = vector.broadcast %25 : vector<1x128xbf16> to vector<8x128xbf16>
    %170 = arith.maximumf %168, %169 : vector<8x128xbf16>
    %171 = vector.extract_strided_slice %170 {offsets = [0, 0], sizes = [1, 128], strides = [1, 1]} : vector<8x128xbf16> to vector<1x128xbf16>
    %172 = arith.maximumf %171, %25 : vector<1x128xbf16>
    %173 = vector.extract_strided_slice %170 {offsets = [0, 0], sizes = [1, 128], strides = [1, 1]} : vector<8x128xbf16> to vector<1x128xbf16>
    %174 = vector.extract_strided_slice %170 {offsets = [1, 0], sizes = [1, 128], strides = [1, 1]} : vector<8x128xbf16> to vector<1x128xbf16>
    %175 = arith.maximumf %173, %174 : vector<1x128xbf16>
    %176 = vector.extract_strided_slice %170 {offsets = [2, 0], sizes = [1, 128], strides = [1, 1]} : vector<8x128xbf16> to vector<1x128xbf16>
    %177 = arith.maximumf %175, %176 : vector<1x128xbf16>
    %178 = vector.extract_strided_slice %170 {offsets = [2, 0], sizes = [1, 128], strides = [1, 1]} : vector<8x128xbf16> to vector<1x128xbf16>
    %179 = vector.extract_strided_slice %170 {offsets = [3, 0], sizes = [1, 128], strides = [1, 1]} : vector<8x128xbf16> to vector<1x128xbf16>
    %180 = arith.maximumf %178, %179 : vector<1x128xbf16>
    %181 = vector.extract_strided_slice %170 {offsets = [4, 0], sizes = [1, 128], strides = [1, 1]} : vector<8x128xbf16> to vector<1x128xbf16>
    %182 = arith.maximumf %180, %181 : vector<1x128xbf16>
    %183 = vector.extract_strided_slice %170 {offsets = [4, 0], sizes = [1, 128], strides = [1, 1]} : vector<8x128xbf16> to vector<1x128xbf16>
    %184 = vector.extract_strided_slice %170 {offsets = [5, 0], sizes = [1, 128], strides = [1, 1]} : vector<8x128xbf16> to vector<1x128xbf16>
    %185 = arith.maximumf %183, %184 : vector<1x128xbf16>
    %186 = vector.extract_strided_slice %170 {offsets = [6, 0], sizes = [1, 128], strides = [1, 1]} : vector<8x128xbf16> to vector<1x128xbf16>
    %187 = arith.maximumf %185, %186 : vector<1x128xbf16>
    %188 = vector.extract_strided_slice %170 {offsets = [6, 0], sizes = [1, 128], strides = [1, 1]} : vector<8x128xbf16> to vector<1x128xbf16>
    %189 = vector.extract_strided_slice %170 {offsets = [7, 0], sizes = [1, 128], strides = [1, 1]} : vector<8x128xbf16> to vector<1x128xbf16>
    %190 = arith.maximumf %188, %189 : vector<1x128xbf16>
    %191 = arith.maximumf %190, %25 : vector<1x128xbf16>
    %192 = tpu.concatenate %0, %172, %177, %182, %187, %191, %0, %0 in 0 : vector<1x128xbf16>, vector<1x128xbf16>, vector<1x128xbf16>, vector<1x128xbf16>, vector<1x128xbf16>, vector<1x128xbf16>, vector<1x128xbf16>, vector<1x128xbf16> -> vector<8x128xbf16>
    %c72 = arith.constant 72 : index
    %c0_55 = arith.constant 0 : index
    %193 = vector.load %arg13[%c72, %c0_55] : memref<128x128xbf16, #tpu.memory_space<vmem>>, vector<8x128xbf16>
    tpu.vector_store %arg13[%c72, %c0_55], %192 {strides = array<i32>} : memref<128x128xbf16, #tpu.memory_space<vmem>>, vector<8x128xbf16>,
    %c64_56 = arith.constant 64 : index
    %c0_57 = arith.constant 0 : index
    %194 = vector.load %arg12[%c64_56, %c0_57] : memref<128x128xbf16, #tpu.memory_space<vmem>>, vector<8x128xbf16>
    %c72_58 = arith.constant 72 : index
    %c0_59 = arith.constant 0 : index
    %195 = vector.load %arg12[%c72_58, %c0_59] : memref<128x128xbf16, #tpu.memory_space<vmem>>, vector<8x128xbf16>
    %196 = arith.maximumf %194, %195 : vector<8x128xbf16>
    %c80 = arith.constant 80 : index
    %c0_60 = arith.constant 0 : index
    %197 = vector.load %arg12[%c80, %c0_60] : memref<128x128xbf16, #tpu.memory_space<vmem>>, vector<8x128xbf16>
    %198 = arith.maximumf %196, %197 : vector<8x128xbf16>
    %199 = vector.extract_strided_slice %198 {offsets = [0, 0], sizes = [1, 128], strides = [1, 1]} : vector<8x128xbf16> to vector<1x128xbf16>
    %200 = arith.maximumf %199, %25 : vector<1x128xbf16>
    %201 = vector.extract_strided_slice %198 {offsets = [0, 0], sizes = [1, 128], strides = [1, 1]} : vector<8x128xbf16> to vector<1x128xbf16>
    %202 = vector.extract_strided_slice %198 {offsets = [1, 0], sizes = [1, 128], strides = [1, 1]} : vector<8x128xbf16> to vector<1x128xbf16>
    %203 = arith.maximumf %201, %202 : vector<1x128xbf16>
    %204 = vector.extract_strided_slice %198 {offsets = [2, 0], sizes = [1, 128], strides = [1, 1]} : vector<8x128xbf16> to vector<1x128xbf16>
    %205 = arith.maximumf %203, %204 : vector<1x128xbf16>
    %206 = vector.extract_strided_slice %198 {offsets = [2, 0], sizes = [1, 128], strides = [1, 1]} : vector<8x128xbf16> to vector<1x128xbf16>
    %207 = vector.extract_strided_slice %198 {offsets = [3, 0], sizes = [1, 128], strides = [1, 1]} : vector<8x128xbf16> to vector<1x128xbf16>
    %208 = arith.maximumf %206, %207 : vector<1x128xbf16>
    %209 = vector.extract_strided_slice %198 {offsets = [4, 0], sizes = [1, 128], strides = [1, 1]} : vector<8x128xbf16> to vector<1x128xbf16>
    %210 = arith.maximumf %208, %209 : vector<1x128xbf16>
    %211 = vector.extract_strided_slice %198 {offsets = [4, 0], sizes = [1, 128], strides = [1, 1]} : vector<8x128xbf16> to vector<1x128xbf16>
    %212 = vector.extract_strided_slice %198 {offsets = [5, 0], sizes = [1, 128], strides = [1, 1]} : vector<8x128xbf16> to vector<1x128xbf16>
    %213 = arith.maximumf %211, %212 : vector<1x128xbf16>
    %214 = vector.extract_strided_slice %198 {offsets = [6, 0], sizes = [1, 128], strides = [1, 1]} : vector<8x128xbf16> to vector<1x128xbf16>
    %215 = arith.maximumf %213, %214 : vector<1x128xbf16>
    %216 = vector.extract_strided_slice %198 {offsets = [6, 0], sizes = [1, 128], strides = [1, 1]} : vector<8x128xbf16> to vector<1x128xbf16>
    %217 = vector.extract_strided_slice %198 {offsets = [7, 0], sizes = [1, 128], strides = [1, 1]} : vector<8x128xbf16> to vector<1x128xbf16>
    %218 = arith.maximumf %216, %217 : vector<1x128xbf16>
    %219 = arith.maximumf %218, %25 : vector<1x128xbf16>
    %220 = tpu.concatenate %0, %200, %205, %210, %215, %219, %0, %0 in 0 : vector<1x128xbf16>, vector<1x128xbf16>, vector<1x128xbf16>, vector<1x128xbf16>, vector<1x128xbf16>, vector<1x128xbf16>, vector<1x128xbf16>, vector<1x128xbf16> -> vector<8x128xbf16>
    %c80_61 = arith.constant 80 : index
    %c0_62 = arith.constant 0 : index
    %221 = vector.load %arg13[%c80_61, %c0_62] : memref<128x128xbf16, #tpu.memory_space<vmem>>, vector<8x128xbf16>
    tpu.vector_store %arg13[%c80_61, %c0_62], %220 {strides = array<i32>} : memref<128x128xbf16, #tpu.memory_space<vmem>>, vector<8x128xbf16>,
    %c80_63 = arith.constant 80 : index
    %c0_64 = arith.constant 0 : index
    %222 = vector.load %arg12[%c80_63, %c0_64] : memref<128x128xbf16, #tpu.memory_space<vmem>>, vector<8x128xbf16>
    %c88 = arith.constant 88 : index
    %c0_65 = arith.constant 0 : index
    %223 = vector.load %arg12[%c88, %c0_65] : memref<128x128xbf16, #tpu.memory_space<vmem>>, vector<8x128xbf16>
    %224 = arith.maximumf %222, %223 : vector<8x128xbf16>
    %c96 = arith.constant 96 : index
    %c0_66 = arith.constant 0 : index
    %225 = vector.load %arg12[%c96, %c0_66] : memref<128x128xbf16, #tpu.memory_space<vmem>>, vector<8x128xbf16>
    %226 = arith.maximumf %224, %225 : vector<8x128xbf16>
    %227 = vector.extract_strided_slice %226 {offsets = [0, 0], sizes = [1, 128], strides = [1, 1]} : vector<8x128xbf16> to vector<1x128xbf16>
    %228 = arith.maximumf %227, %25 : vector<1x128xbf16>
    %229 = vector.extract_strided_slice %226 {offsets = [0, 0], sizes = [1, 128], strides = [1, 1]} : vector<8x128xbf16> to vector<1x128xbf16>
    %230 = vector.extract_strided_slice %226 {offsets = [1, 0], sizes = [1, 128], strides = [1, 1]} : vector<8x128xbf16> to vector<1x128xbf16>
    %231 = arith.maximumf %229, %230 : vector<1x128xbf16>
    %232 = vector.extract_strided_slice %226 {offsets = [2, 0], sizes = [1, 128], strides = [1, 1]} : vector<8x128xbf16> to vector<1x128xbf16>
    %233 = arith.maximumf %231, %232 : vector<1x128xbf16>
    %234 = vector.extract_strided_slice %226 {offsets = [2, 0], sizes = [1, 128], strides = [1, 1]} : vector<8x128xbf16> to vector<1x128xbf16>
    %235 = vector.extract_strided_slice %226 {offsets = [3, 0], sizes = [1, 128], strides = [1, 1]} : vector<8x128xbf16> to vector<1x128xbf16>
    %236 = arith.maximumf %234, %235 : vector<1x128xbf16>
    %237 = vector.extract_strided_slice %226 {offsets = [4, 0], sizes = [1, 128], strides = [1, 1]} : vector<8x128xbf16> to vector<1x128xbf16>
    %238 = arith.maximumf %236, %237 : vector<1x128xbf16>
    %239 = vector.extract_strided_slice %226 {offsets = [4, 0], sizes = [1, 128], strides = [1, 1]} : vector<8x128xbf16> to vector<1x128xbf16>
    %240 = vector.extract_strided_slice %226 {offsets = [5, 0], sizes = [1, 128], strides = [1, 1]} : vector<8x128xbf16> to vector<1x128xbf16>
    %241 = arith.maximumf %239, %240 : vector<1x128xbf16>
    %242 = vector.extract_strided_slice %226 {offsets = [6, 0], sizes = [1, 128], strides = [1, 1]} : vector<8x128xbf16> to vector<1x128xbf16>
    %243 = arith.maximumf %241, %242 : vector<1x128xbf16>
    %244 = vector.extract_strided_slice %226 {offsets = [6, 0], sizes = [1, 128], strides = [1, 1]} : vector<8x128xbf16> to vector<1x128xbf16>
    %245 = vector.extract_strided_slice %226 {offsets = [7, 0], sizes = [1, 128], strides = [1, 1]} : vector<8x128xbf16> to vector<1x128xbf16>
    %246 = arith.maximumf %244, %245 : vector<1x128xbf16>
    %247 = arith.maximumf %246, %25 : vector<1x128xbf16>
    %248 = tpu.concatenate %0, %228, %233, %238, %243, %247, %0, %0 in 0 : vector<1x128xbf16>, vector<1x128xbf16>, vector<1x128xbf16>, vector<1x128xbf16>, vector<1x128xbf16>, vector<1x128xbf16>, vector<1x128xbf16>, vector<1x128xbf16> -> vector<8x128xbf16>
    %c88_67 = arith.constant 88 : index
    %c0_68 = arith.constant 0 : index
    %249 = vector.load %arg13[%c88_67, %c0_68] : memref<128x128xbf16, #tpu.memory_space<vmem>>, vector<8x128xbf16>
    tpu.vector_store %arg13[%c88_67, %c0_68], %248 {strides = array<i32>} : memref<128x128xbf16, #tpu.memory_space<vmem>>, vector<8x128xbf16>,
    %c96_69 = arith.constant 96 : index
    %c0_70 = arith.constant 0 : index
    %250 = vector.load %arg12[%c96_69, %c0_70] : memref<128x128xbf16, #tpu.memory_space<vmem>>, vector<8x128xbf16>
    %c104 = arith.constant 104 : index
    %c0_71 = arith.constant 0 : index
    %251 = vector.load %arg12[%c104, %c0_71] : memref<128x128xbf16, #tpu.memory_space<vmem>>, vector<8x128xbf16>
    %252 = arith.maximumf %250, %251 : vector<8x128xbf16>
    %c112_72 = arith.constant 112 : index
    %c0_73 = arith.constant 0 : index
    %253 = vector.load %arg12[%c112_72, %c0_73] : memref<128x128xbf16, #tpu.memory_space<vmem>>, vector<8x128xbf16>
    %254 = arith.maximumf %252, %253 : vector<8x128xbf16>
    %255 = vector.extract_strided_slice %254 {offsets = [0, 0], sizes = [1, 128], strides = [1, 1]} : vector<8x128xbf16> to vector<1x128xbf16>
    %256 = arith.maximumf %255, %25 : vector<1x128xbf16>
    %257 = vector.extract_strided_slice %254 {offsets = [0, 0], sizes = [1, 128], strides = [1, 1]} : vector<8x128xbf16> to vector<1x128xbf16>
    %258 = vector.extract_strided_slice %254 {offsets = [1, 0], sizes = [1, 128], strides = [1, 1]} : vector<8x128xbf16> to vector<1x128xbf16>
    %259 = arith.maximumf %257, %258 : vector<1x128xbf16>
    %260 = vector.extract_strided_slice %254 {offsets = [2, 0], sizes = [1, 128], strides = [1, 1]} : vector<8x128xbf16> to vector<1x128xbf16>
    %261 = arith.maximumf %259, %260 : vector<1x128xbf16>
    %262 = vector.extract_strided_slice %254 {offsets = [2, 0], sizes = [1, 128], strides = [1, 1]} : vector<8x128xbf16> to vector<1x128xbf16>
    %263 = vector.extract_strided_slice %254 {offsets = [3, 0], sizes = [1, 128], strides = [1, 1]} : vector<8x128xbf16> to vector<1x128xbf16>
    %264 = arith.maximumf %262, %263 : vector<1x128xbf16>
    %265 = vector.extract_strided_slice %254 {offsets = [4, 0], sizes = [1, 128], strides = [1, 1]} : vector<8x128xbf16> to vector<1x128xbf16>
    %266 = arith.maximumf %264, %265 : vector<1x128xbf16>
    %267 = vector.extract_strided_slice %254 {offsets = [4, 0], sizes = [1, 128], strides = [1, 1]} : vector<8x128xbf16> to vector<1x128xbf16>
    %268 = vector.extract_strided_slice %254 {offsets = [5, 0], sizes = [1, 128], strides = [1, 1]} : vector<8x128xbf16> to vector<1x128xbf16>
    %269 = arith.maximumf %267, %268 : vector<1x128xbf16>
    %270 = vector.extract_strided_slice %254 {offsets = [6, 0], sizes = [1, 128], strides = [1, 1]} : vector<8x128xbf16> to vector<1x128xbf16>
    %271 = arith.maximumf %269, %270 : vector<1x128xbf16>
    %272 = vector.extract_strided_slice %254 {offsets = [6, 0], sizes = [1, 128], strides = [1, 1]} : vector<8x128xbf16> to vector<1x128xbf16>
    %273 = vector.extract_strided_slice %254 {offsets = [7, 0], sizes = [1, 128], strides = [1, 1]} : vector<8x128xbf16> to vector<1x128xbf16>
    %274 = arith.maximumf %272, %273 : vector<1x128xbf16>
    %275 = arith.maximumf %274, %25 : vector<1x128xbf16>
    %276 = tpu.concatenate %0, %256, %261, %266, %271, %275, %0, %0 in 0 : vector<1x128xbf16>, vector<1x128xbf16>, vector<1x128xbf16>, vector<1x128xbf16>, vector<1x128xbf16>, vector<1x128xbf16>, vector<1x128xbf16>, vector<1x128xbf16> -> vector<8x128xbf16>
    %c96_74 = arith.constant 96 : index
    %c0_75 = arith.constant 0 : index
    %277 = vector.load %arg13[%c96_74, %c0_75] : memref<128x128xbf16, #tpu.memory_space<vmem>>, vector<8x128xbf16>
    tpu.vector_store %arg13[%c96_74, %c0_75], %276 {strides = array<i32>} : memref<128x128xbf16, #tpu.memory_space<vmem>>, vector<8x128xbf16>,
    %c112_76 = arith.constant 112 : index
    %c0_77 = arith.constant 0 : index
    %278 = vector.load %arg12[%c112_76, %c0_77] : memref<128x128xbf16, #tpu.memory_space<vmem>>, vector<8x128xbf16>
    %c120 = arith.constant 120 : index
    %c0_78 = arith.constant 0 : index
    %279 = vector.load %arg12[%c120, %c0_78] : memref<128x128xbf16, #tpu.memory_space<vmem>>, vector<8x128xbf16>
    %280 = arith.maximumf %278, %279 : vector<8x128xbf16>
    %281 = vector.broadcast %25 : vector<1x128xbf16> to vector<8x128xbf16>
    %282 = arith.maximumf %280, %281 : vector<8x128xbf16>
    %283 = vector.extract_strided_slice %282 {offsets = [0, 0], sizes = [1, 128], strides = [1, 1]} : vector<8x128xbf16> to vector<1x128xbf16>
    %284 = arith.maximumf %283, %25 : vector<1x128xbf16>
    %285 = vector.extract_strided_slice %282 {offsets = [0, 0], sizes = [1, 128], strides = [1, 1]} : vector<8x128xbf16> to vector<1x128xbf16>
    %286 = vector.extract_strided_slice %282 {offsets = [1, 0], sizes = [1, 128], strides = [1, 1]} : vector<8x128xbf16> to vector<1x128xbf16>
    %287 = arith.maximumf %285, %286 : vector<1x128xbf16>
    %288 = vector.extract_strided_slice %282 {offsets = [2, 0], sizes = [1, 128], strides = [1, 1]} : vector<8x128xbf16> to vector<1x128xbf16>
    %289 = arith.maximumf %287, %288 : vector<1x128xbf16>
    %290 = vector.extract_strided_slice %282 {offsets = [2, 0], sizes = [1, 128], strides = [1, 1]} : vector<8x128xbf16> to vector<1x128xbf16>
    %291 = vector.extract_strided_slice %282 {offsets = [3, 0], sizes = [1, 128], strides = [1, 1]} : vector<8x128xbf16> to vector<1x128xbf16>
    %292 = arith.maximumf %290, %291 : vector<1x128xbf16>
    %293 = vector.extract_strided_slice %282 {offsets = [4, 0], sizes = [1, 128], strides = [1, 1]} : vector<8x128xbf16> to vector<1x128xbf16>
    %294 = arith.maximumf %292, %293 : vector<1x128xbf16>
    %295 = vector.extract_strided_slice %282 {offsets = [4, 0], sizes = [1, 128], strides = [1, 1]} : vector<8x128xbf16> to vector<1x128xbf16>
    %296 = vector.extract_strided_slice %282 {offsets = [5, 0], sizes = [1, 128], strides = [1, 1]} : vector<8x128xbf16> to vector<1x128xbf16>
    %297 = arith.maximumf %295, %296 : vector<1x128xbf16>
    %298 = vector.extract_strided_slice %282 {offsets = [6, 0], sizes = [1, 128], strides = [1, 1]} : vector<8x128xbf16> to vector<1x128xbf16>
    %299 = arith.maximumf %297, %298 : vector<1x128xbf16>
    %300 = vector.extract_strided_slice %282 {offsets = [6, 0], sizes = [1, 128], strides = [1, 1]} : vector<8x128xbf16> to vector<1x128xbf16>
    %301 = vector.extract_strided_slice %282 {offsets = [7, 0], sizes = [1, 128], strides = [1, 1]} : vector<8x128xbf16> to vector<1x128xbf16>
    %302 = arith.maximumf %300, %301 : vector<1x128xbf16>
    %303 = arith.maximumf %302, %25 : vector<1x128xbf16>
    %304 = tpu.concatenate %0, %284, %289, %294, %299, %303, %0, %0 in 0 : vector<1x128xbf16>, vector<1x128xbf16>, vector<1x128xbf16>, vector<1x128xbf16>, vector<1x128xbf16>, vector<1x128xbf16>, vector<1x128xbf16>, vector<1x128xbf16> -> vector<8x128xbf16>
    %c104_79 = arith.constant 104 : index
    %c0_80 = arith.constant 0 : index
    %305 = vector.load %arg13[%c104_79, %c0_80] : memref<128x128xbf16, #tpu.memory_space<vmem>>, vector<8x128xbf16>
    tpu.vector_store %arg13[%c104_79, %c0_80], %304 {strides = array<i32>} : memref<128x128xbf16, #tpu.memory_space<vmem>>, vector<8x128xbf16>,
    %306 = tpu.iota {dimensions = array<i32: 0>} : vector<110x1xi32>
    %c8_i32 = arith.constant 8 : i32
    %c0_i32 = arith.constant 0 : i32
    %307 = arith.cmpi eq, %c8_i32, %c0_i32 : i32
    %c1_i32 = arith.constant 1 : i32
    %308 = arith.select %307, %c1_i32, %c8_i32 : i32
    %309 = vector.broadcast %308 : i32 to vector<110x1xi32>
    %310 = arith.remsi %306, %309 : vector<110x1xi32>
    %c0_i32_81 = arith.constant 0 : i32
    %311 = vector.broadcast %c0_i32_81 : i32 to vector<110x1xi32>
    %312 = arith.cmpi ne, %310, %311 : vector<110x1xi32>
    %c0_i32_82 = arith.constant 0 : i32
    %313 = vector.broadcast %c0_i32_82 : i32 to vector<110x1xi32>
    %314 = arith.cmpi slt, %310, %313 : vector<110x1xi32>
    %c0_i32_83 = arith.constant 0 : i32
    %315 = arith.cmpi slt, %308, %c0_i32_83 : i32
    %316 = vector.broadcast %315 : i1 to vector<110x1xi1>
    %317 = vector.broadcast %316 : vector<110x1xi1> to vector<110x1xi1>
    %318 = arith.xori %314, %317 : vector<110x1xi1>
    %319 = arith.andi %318, %312 : vector<110x1xi1>
    %320 = vector.broadcast %308 : i32 to vector<110x1xi32>
    %321 = arith.addi %310, %320 : vector<110x1xi32>
    %322 = arith.select %319, %321, %310 : vector<110x1xi1>, vector<110x1xi32>
    %c6_i32 = arith.constant 6 : i32
    %323 = vector.broadcast %c6_i32 : i32 to vector<110x1xi32>
    %324 = arith.cmpi slt, %322, %323 : vector<110x1xi32>
    %c64_i32 = arith.constant 64 : i32
    %c0_i32_84 = arith.constant 0 : i32
    %325 = arith.cmpi eq, %c64_i32, %c0_i32_84 : i32
    %c1_i32_85 = arith.constant 1 : i32
    %326 = arith.select %325, %c1_i32_85, %c64_i32 : i32
    %327 = vector.broadcast %326 : i32 to vector<110x1xi32>
    %328 = arith.remsi %306, %327 : vector<110x1xi32>
    %c0_i32_86 = arith.constant 0 : i32
    %329 = vector.broadcast %c0_i32_86 : i32 to vector<110x1xi32>
    %330 = arith.cmpi ne, %328, %329 : vector<110x1xi32>
    %c0_i32_87 = arith.constant 0 : i32
    %331 = vector.broadcast %c0_i32_87 : i32 to vector<110x1xi32>
    %332 = arith.cmpi slt, %328, %331 : vector<110x1xi32>
    %c0_i32_88 = arith.constant 0 : i32
    %333 = arith.cmpi slt, %326, %c0_i32_88 : i32
    %334 = vector.broadcast %333 : i1 to vector<110x1xi1>
    %335 = vector.broadcast %334 : vector<110x1xi1> to vector<110x1xi1>
    %336 = arith.xori %332, %335 : vector<110x1xi1>
    %337 = arith.andi %336, %330 : vector<110x1xi1>
    %338 = vector.broadcast %326 : i32 to vector<110x1xi32>
    %339 = arith.addi %328, %338 : vector<110x1xi32>
    %340 = arith.select %337, %339, %328 : vector<110x1xi1>, vector<110x1xi32>
    %c48_i32 = arith.constant 48 : i32
    %341 = vector.broadcast %c48_i32 : i32 to vector<110x1xi32>
    %342 = arith.cmpi slt, %340, %341 : vector<110x1xi32>
    %343 = arith.andi %324, %342 : vector<110x1xi1>
    %c0_89 = arith.constant 0 : index
    %c0_90 = arith.constant 0 : index
    %344 = vector.load %arg13[%c0_89, %c0_90] : memref<128x128xbf16, #tpu.memory_space<vmem>>, vector<110x128xbf16>
    %c1_91 = arith.constant 1 : index
    %c0_92 = arith.constant 0 : index
    %345 = vector.load %arg13[%c1_91, %c0_92] : memref<128x128xbf16, #tpu.memory_space<vmem>>, vector<110x128xbf16>
    %346 = tpu.concatenate %344, %345 in 1 : vector<110x128xbf16>, vector<110x128xbf16> -> vector<110x256xbf16>
    %c0_93 = arith.constant 0 : index
    %c0_94 = arith.constant 0 : index
    %c0_95 = arith.constant 0 : index
    %347 = vector.load %arg4[%c0_93, %c0_94, %c0_95] : memref<2x256x128xbf16, #tpu.memory_space<vmem>>, vector<1x256x128xbf16>
    %348 = vector.shape_cast %347 : vector<1x256x128xbf16> to vector<256x128xbf16>
    %cst_96 = arith.constant dense<0.000000e+00> : vector<110x128xf32>
    %349 = tpu.matmul %346, %348, %cst_96 {dimension_numbers = #tpu.dot_dimension_numbers<[1], [0], [0], [1], [0, 0, 1, 1], [], []>} : vector<110x256xbf16>, vector<256x128xbf16>, vector<110x128xf32> -> vector<110x128xf32>
    %c8_97 = arith.constant 8 : index
    %c0_98 = arith.constant 0 : index
    %350 = vector.load %arg13[%c8_97, %c0_98] : memref<128x128xbf16, #tpu.memory_space<vmem>>, vector<110x128xbf16>
    %c9 = arith.constant 9 : index
    %c0_99 = arith.constant 0 : index
    %351 = vector.load %arg13[%c9, %c0_99] : memref<128x128xbf16, #tpu.memory_space<vmem>>, vector<110x128xbf16>
    %352 = tpu.concatenate %350, %351 in 1 : vector<110x128xbf16>, vector<110x128xbf16> -> vector<110x256xbf16>
    %c1_100 = arith.constant 1 : index
    %c0_101 = arith.constant 0 : index
    %c0_102 = arith.constant 0 : index
    %353 = vector.load %arg4[%c1_100, %c0_101, %c0_102] : memref<2x256x128xbf16, #tpu.memory_space<vmem>>, vector<1x256x128xbf16>
    %354 = vector.shape_cast %353 : vector<1x256x128xbf16> to vector<256x128xbf16>
    %cst_103 = arith.constant dense<0.000000e+00> : vector<110x128xf32>
    %355 = tpu.matmul %352, %354, %cst_103 {dimension_numbers = #tpu.dot_dimension_numbers<[1], [0], [0], [1], [0, 0, 1, 1], [], []>} : vector<110x256xbf16>, vector<256x128xbf16>, vector<110x128xf32> -> vector<110x128xf32>
    %356 = arith.addf %349, %355 : vector<110x128xf32>
    %c2 = arith.constant 2 : index
    %c0_104 = arith.constant 0 : index
    %357 = vector.load %arg10[%c2, %c0_104] : memref<8x128xf32, #tpu.memory_space<vmem>>, vector<1x128xf32>
    %358 = vector.broadcast %357 : vector<1x128xf32> to vector<110x128xf32>
    %359 = arith.addf %356, %358 : vector<110x128xf32>
    %cst_105 = arith.constant 0.000000e+00 : f32
    %360 = vector.broadcast %cst_105 : f32 to vector<110x128xf32>
    %361 = arith.maximumf %359, %360 : vector<110x128xf32>
    %cst_106 = arith.constant 0.000000e+00 : f32
    %362 = vector.shape_cast %343 : vector<110x1xi1> to vector<110x1xi1>
    %363 = vector.broadcast %362 : vector<110x1xi1> to vector<110x128xi1>
    %364 = vector.broadcast %cst_106 : f32 to vector<110x128xf32>
    %365 = arith.select %363, %361, %364 : vector<110x128xi1>, vector<110x128xf32>
    %366 = arith.truncf %365 : vector<110x128xf32> to vector<110x128xbf16>
    %c0_107 = arith.constant 0 : index
    %c0_108 = arith.constant 0 : index
    %367 = vector.load %arg14[%c0_107, %c0_108] : memref<128x128xbf16, #tpu.memory_space<vmem>>, vector<9x128xbf16>
    tpu.vector_store %arg14[%c0_107, %c0_108], %2 {strides = array<i32>} : memref<128x128xbf16, #tpu.memory_space<vmem>>, vector<9x128xbf16>,
    %c9_109 = arith.constant 9 : index
    %c0_110 = arith.constant 0 : index
    %368 = vector.load %arg14[%c9_109, %c0_110] : memref<128x128xbf16, #tpu.memory_space<vmem>>, vector<110x128xbf16>
    tpu.vector_store %arg14[%c9_109, %c0_110], %366 {strides = array<i32>} : memref<128x128xbf16, #tpu.memory_space<vmem>>, vector<110x128xbf16>,
    %c119 = arith.constant 119 : index
    %c0_111 = arith.constant 0 : index
    %369 = vector.load %arg14[%c119, %c0_111] : memref<128x128xbf16, #tpu.memory_space<vmem>>, vector<9x128xbf16>
    tpu.vector_store %arg14[%c119, %c0_111], %2 {strides = array<i32>} : memref<128x128xbf16, #tpu.memory_space<vmem>>, vector<9x128xbf16>,
    %c0_112 = arith.constant 0 : index
    %c0_113 = arith.constant 0 : index
    %370 = vector.load %arg14[%c0_112, %c0_113] : memref<128x128xbf16, #tpu.memory_space<vmem>>, vector<110x128xbf16>
    %c1_114 = arith.constant 1 : index
    %c0_115 = arith.constant 0 : index
    %371 = vector.load %arg14[%c1_114, %c0_115] : memref<128x128xbf16, #tpu.memory_space<vmem>>, vector<110x128xbf16>
    %372 = tpu.concatenate %370, %371 in 1 : vector<110x128xbf16>, vector<110x128xbf16> -> vector<110x256xbf16>
    %c0_116 = arith.constant 0 : index
    %c0_117 = arith.constant 0 : index
    %c0_118 = arith.constant 0 : index
    %373 = vector.load %arg5[%c0_116, %c0_117, %c0_118] : memref<5x256x128xbf16, #tpu.memory_space<vmem>>, vector<1x256x128xbf16>
    %374 = vector.shape_cast %373 : vector<1x256x128xbf16> to vector<256x128xbf16>
    %cst_119 = arith.constant dense<0.000000e+00> : vector<110x128xf32>
    %375 = tpu.matmul %372, %374, %cst_119 {dimension_numbers = #tpu.dot_dimension_numbers<[1], [0], [0], [1], [0, 0, 1, 1], [], []>} : vector<110x256xbf16>, vector<256x128xbf16>, vector<110x128xf32> -> vector<110x128xf32>
    %c2_120 = arith.constant 2 : index
    %c0_121 = arith.constant 0 : index
    %376 = vector.load %arg14[%c2_120, %c0_121] : memref<128x128xbf16, #tpu.memory_space<vmem>>, vector<110x128xbf16>
    %c8_122 = arith.constant 8 : index
    %c0_123 = arith.constant 0 : index
    %377 = vector.load %arg14[%c8_122, %c0_123] : memref<128x128xbf16, #tpu.memory_space<vmem>>, vector<110x128xbf16>
    %378 = tpu.concatenate %376, %377 in 1 : vector<110x128xbf16>, vector<110x128xbf16> -> vector<110x256xbf16>
    %c1_124 = arith.constant 1 : index
    %c0_125 = arith.constant 0 : index
    %c0_126 = arith.constant 0 : index
    %379 = vector.load %arg5[%c1_124, %c0_125, %c0_126] : memref<5x256x128xbf16, #tpu.memory_space<vmem>>, vector<1x256x128xbf16>
    %380 = vector.shape_cast %379 : vector<1x256x128xbf16> to vector<256x128xbf16>
    %cst_127 = arith.constant dense<0.000000e+00> : vector<110x128xf32>
    %381 = tpu.matmul %378, %380, %cst_127 {dimension_numbers = #tpu.dot_dimension_numbers<[1], [0], [0], [1], [0, 0, 1, 1], [], []>} : vector<110x256xbf16>, vector<256x128xbf16>, vector<110x128xf32> -> vector<110x128xf32>
    %382 = arith.addf %375, %381 : vector<110x128xf32>
    %c9_128 = arith.constant 9 : index
    %c0_129 = arith.constant 0 : index
    %383 = vector.load %arg14[%c9_128, %c0_129] : memref<128x128xbf16, #tpu.memory_space<vmem>>, vector<110x128xbf16>
    %c10 = arith.constant 10 : index
    %c0_130 = arith.constant 0 : index
    %384 = vector.load %arg14[%c10, %c0_130] : memref<128x128xbf16, #tpu.memory_space<vmem>>, vector<110x128xbf16>
    %385 = tpu.concatenate %383, %384 in 1 : vector<110x128xbf16>, vector<110x128xbf16> -> vector<110x256xbf16>
    %c2_131 = arith.constant 2 : index
    %c0_132 = arith.constant 0 : index
    %c0_133 = arith.constant 0 : index
    %386 = vector.load %arg5[%c2_131, %c0_132, %c0_133] : memref<5x256x128xbf16, #tpu.memory_space<vmem>>, vector<1x256x128xbf16>
    %387 = vector.shape_cast %386 : vector<1x256x128xbf16> to vector<256x128xbf16>
    %cst_134 = arith.constant dense<0.000000e+00> : vector<110x128xf32>
    %388 = tpu.matmul %385, %387, %cst_134 {dimension_numbers = #tpu.dot_dimension_numbers<[1], [0], [0], [1], [0, 0, 1, 1], [], []>} : vector<110x256xbf16>, vector<256x128xbf16>, vector<110x128xf32> -> vector<110x128xf32>
    %389 = arith.addf %382, %388 : vector<110x128xf32>
    %c16_135 = arith.constant 16 : index
    %c0_136 = arith.constant 0 : index
    %390 = vector.load %arg14[%c16_135, %c0_136] : memref<128x128xbf16, #tpu.memory_space<vmem>>, vector<110x128xbf16>
    %c17 = arith.constant 17 : index
    %c0_137 = arith.constant 0 : index
    %391 = vector.load %arg14[%c17, %c0_137] : memref<128x128xbf16, #tpu.memory_space<vmem>>, vector<110x128xbf16>
    %392 = tpu.concatenate %390, %391 in 1 : vector<110x128xbf16>, vector<110x128xbf16> -> vector<110x256xbf16>
    %c3 = arith.constant 3 : index
    %c0_138 = arith.constant 0 : index
    %c0_139 = arith.constant 0 : index
    %393 = vector.load %arg5[%c3, %c0_138, %c0_139] : memref<5x256x128xbf16, #tpu.memory_space<vmem>>, vector<1x256x128xbf16>
    %394 = vector.shape_cast %393 : vector<1x256x128xbf16> to vector<256x128xbf16>
    %cst_140 = arith.constant dense<0.000000e+00> : vector<110x128xf32>
    %395 = tpu.matmul %392, %394, %cst_140 {dimension_numbers = #tpu.dot_dimension_numbers<[1], [0], [0], [1], [0, 0, 1, 1], [], []>} : vector<110x256xbf16>, vector<256x128xbf16>, vector<110x128xf32> -> vector<110x128xf32>
    %396 = arith.addf %389, %395 : vector<110x128xf32>
    %c18 = arith.constant 18 : index
    %c0_141 = arith.constant 0 : index
    %397 = vector.load %arg14[%c18, %c0_141] : memref<128x128xbf16, #tpu.memory_space<vmem>>, vector<110x128xbf16>
    %c18_142 = arith.constant 18 : index
    %c0_143 = arith.constant 0 : index
    %398 = vector.load %arg14[%c18_142, %c0_143] : memref<128x128xbf16, #tpu.memory_space<vmem>>, vector<110x128xbf16>
    %399 = tpu.concatenate %397, %398 in 1 : vector<110x128xbf16>, vector<110x128xbf16> -> vector<110x256xbf16>
    %c4 = arith.constant 4 : index
    %c0_144 = arith.constant 0 : index
    %c0_145 = arith.constant 0 : index
    %400 = vector.load %arg5[%c4, %c0_144, %c0_145] : memref<5x256x128xbf16, #tpu.memory_space<vmem>>, vector<1x256x128xbf16>
    %401 = vector.shape_cast %400 : vector<1x256x128xbf16> to vector<256x128xbf16>
    %cst_146 = arith.constant dense<0.000000e+00> : vector<110x128xf32>
    %402 = tpu.matmul %399, %401, %cst_146 {dimension_numbers = #tpu.dot_dimension_numbers<[1], [0], [0], [1], [0, 0, 1, 1], [], []>} : vector<110x256xbf16>, vector<256x128xbf16>, vector<110x128xf32> -> vector<110x128xf32>
    %403 = arith.addf %396, %402 : vector<110x128xf32>
    %c3_147 = arith.constant 3 : index
    %c0_148 = arith.constant 0 : index
    %404 = vector.load %arg10[%c3_147, %c0_148] : memref<8x128xf32, #tpu.memory_space<vmem>>, vector<1x128xf32>
    %405 = vector.broadcast %404 : vector<1x128xf32> to vector<110x128xf32>
    %406 = arith.addf %403, %405 : vector<110x128xf32>
    %cst_149 = arith.constant 0.000000e+00 : f32
    %407 = vector.broadcast %cst_149 : f32 to vector<110x128xf32>
    %408 = arith.maximumf %406, %407 : vector<110x128xf32>
    %cst_150 = arith.constant 0.000000e+00 : f32
    %409 = vector.shape_cast %343 : vector<110x1xi1> to vector<110x1xi1>
    %410 = vector.broadcast %409 : vector<110x1xi1> to vector<110x128xi1>
    %411 = vector.broadcast %cst_150 : f32 to vector<110x128xf32>
    %412 = arith.select %410, %408, %411 : vector<110x128xi1>, vector<110x128xf32>
    %413 = arith.truncf %412 : vector<110x128xf32> to vector<110x128xbf16>
    %c0_151 = arith.constant 0 : index
    %c0_152 = arith.constant 0 : index
    %414 = vector.load %arg15[%c0_151, %c0_152] : memref<128x128xbf16, #tpu.memory_space<vmem>>, vector<9x128xbf16>
    tpu.vector_store %arg15[%c0_151, %c0_152], %2 {strides = array<i32>} : memref<128x128xbf16, #tpu.memory_space<vmem>>, vector<9x128xbf16>,
    %c9_153 = arith.constant 9 : index
    %c0_154 = arith.constant 0 : index
    %415 = vector.load %arg15[%c9_153, %c0_154] : memref<128x128xbf16, #tpu.memory_space<vmem>>, vector<110x128xbf16>
    tpu.vector_store %arg15[%c9_153, %c0_154], %413 {strides = array<i32>} : memref<128x128xbf16, #tpu.memory_space<vmem>>, vector<110x128xbf16>,
    %c119_155 = arith.constant 119 : index
    %c0_156 = arith.constant 0 : index
    %416 = vector.load %arg15[%c119_155, %c0_156] : memref<128x128xbf16, #tpu.memory_space<vmem>>, vector<9x128xbf16>
    tpu.vector_store %arg15[%c119_155, %c0_156], %2 {strides = array<i32>} : memref<128x128xbf16, #tpu.memory_space<vmem>>, vector<9x128xbf16>,
    %c0_157 = arith.constant 0 : index
    %c0_158 = arith.constant 0 : index
    %417 = vector.load %arg15[%c0_157, %c0_158] : memref<128x128xbf16, #tpu.memory_space<vmem>>, vector<110x128xbf16>
    %c1_159 = arith.constant 1 : index
    %c0_160 = arith.constant 0 : index
    %418 = vector.load %arg15[%c1_159, %c0_160] : memref<128x128xbf16, #tpu.memory_space<vmem>>, vector<110x128xbf16>
    %419 = tpu.concatenate %417, %418 in 1 : vector<110x128xbf16>, vector<110x128xbf16> -> vector<110x256xbf16>
    %c0_161 = arith.constant 0 : index
    %c0_162 = arith.constant 0 : index
    %c0_163 = arith.constant 0 : index
    %420 = vector.load %arg6[%c0_161, %c0_162, %c0_163] : memref<5x256x128xbf16, #tpu.memory_space<vmem>>, vector<1x256x128xbf16>
    %421 = vector.shape_cast %420 : vector<1x256x128xbf16> to vector<256x128xbf16>
    %cst_164 = arith.constant dense<0.000000e+00> : vector<110x128xf32>
    %422 = tpu.matmul %419, %421, %cst_164 {dimension_numbers = #tpu.dot_dimension_numbers<[1], [0], [0], [1], [0, 0, 1, 1], [], []>} : vector<110x256xbf16>, vector<256x128xbf16>, vector<110x128xf32> -> vector<110x128xf32>
    %c2_165 = arith.constant 2 : index
    %c0_166 = arith.constant 0 : index
    %423 = vector.load %arg15[%c2_165, %c0_166] : memref<128x128xbf16, #tpu.memory_space<vmem>>, vector<110x128xbf16>
    %c8_167 = arith.constant 8 : index
    %c0_168 = arith.constant 0 : index
    %424 = vector.load %arg15[%c8_167, %c0_168] : memref<128x128xbf16, #tpu.memory_space<vmem>>, vector<110x128xbf16>
    %425 = tpu.concatenate %423, %424 in 1 : vector<110x128xbf16>, vector<110x128xbf16> -> vector<110x256xbf16>
    %c1_169 = arith.constant 1 : index
    %c0_170 = arith.constant 0 : index
    %c0_171 = arith.constant 0 : index
    %426 = vector.load %arg6[%c1_169, %c0_170, %c0_171] : memref<5x256x128xbf16, #tpu.memory_space<vmem>>, vector<1x256x128xbf16>
    %427 = vector.shape_cast %426 : vector<1x256x128xbf16> to vector<256x128xbf16>
    %cst_172 = arith.constant dense<0.000000e+00> : vector<110x128xf32>
    %428 = tpu.matmul %425, %427, %cst_172 {dimension_numbers = #tpu.dot_dimension_numbers<[1], [0], [0], [1], [0, 0, 1, 1], [], []>} : vector<110x256xbf16>, vector<256x128xbf16>, vector<110x128xf32> -> vector<110x128xf32>
    %429 = arith.addf %422, %428 : vector<110x128xf32>
    %c9_173 = arith.constant 9 : index
    %c0_174 = arith.constant 0 : index
    %430 = vector.load %arg15[%c9_173, %c0_174] : memref<128x128xbf16, #tpu.memory_space<vmem>>, vector<110x128xbf16>
    %c10_175 = arith.constant 10 : index
    %c0_176 = arith.constant 0 : index
    %431 = vector.load %arg15[%c10_175, %c0_176] : memref<128x128xbf16, #tpu.memory_space<vmem>>, vector<110x128xbf16>
    %432 = tpu.concatenate %430, %431 in 1 : vector<110x128xbf16>, vector<110x128xbf16> -> vector<110x256xbf16>
    %c2_177 = arith.constant 2 : index
    %c0_178 = arith.constant 0 : index
    %c0_179 = arith.constant 0 : index
    %433 = vector.load %arg6[%c2_177, %c0_178, %c0_179] : memref<5x256x128xbf16, #tpu.memory_space<vmem>>, vector<1x256x128xbf16>
    %434 = vector.shape_cast %433 : vector<1x256x128xbf16> to vector<256x128xbf16>
    %cst_180 = arith.constant dense<0.000000e+00> : vector<110x128xf32>
    %435 = tpu.matmul %432, %434, %cst_180 {dimension_numbers = #tpu.dot_dimension_numbers<[1], [0], [0], [1], [0, 0, 1, 1], [], []>} : vector<110x256xbf16>, vector<256x128xbf16>, vector<110x128xf32> -> vector<110x128xf32>
    %436 = arith.addf %429, %435 : vector<110x128xf32>
    %c16_181 = arith.constant 16 : index
    %c0_182 = arith.constant 0 : index
    %437 = vector.load %arg15[%c16_181, %c0_182] : memref<128x128xbf16, #tpu.memory_space<vmem>>, vector<110x128xbf16>
    %c17_183 = arith.constant 17 : index
    %c0_184 = arith.constant 0 : index
    %438 = vector.load %arg15[%c17_183, %c0_184] : memref<128x128xbf16, #tpu.memory_space<vmem>>, vector<110x128xbf16>
    %439 = tpu.concatenate %437, %438 in 1 : vector<110x128xbf16>, vector<110x128xbf16> -> vector<110x256xbf16>
    %c3_185 = arith.constant 3 : index
    %c0_186 = arith.constant 0 : index
    %c0_187 = arith.constant 0 : index
    %440 = vector.load %arg6[%c3_185, %c0_186, %c0_187] : memref<5x256x128xbf16, #tpu.memory_space<vmem>>, vector<1x256x128xbf16>
    %441 = vector.shape_cast %440 : vector<1x256x128xbf16> to vector<256x128xbf16>
    %cst_188 = arith.constant dense<0.000000e+00> : vector<110x128xf32>
    %442 = tpu.matmul %439, %441, %cst_188 {dimension_numbers = #tpu.dot_dimension_numbers<[1], [0], [0], [1], [0, 0, 1, 1], [], []>} : vector<110x256xbf16>, vector<256x128xbf16>, vector<110x128xf32> -> vector<110x128xf32>
    %443 = arith.addf %436, %442 : vector<110x128xf32>
    %c18_189 = arith.constant 18 : index
    %c0_190 = arith.constant 0 : index
    %444 = vector.load %arg15[%c18_189, %c0_190] : memref<128x128xbf16, #tpu.memory_space<vmem>>, vector<110x128xbf16>
    %c18_191 = arith.constant 18 : index
    %c0_192 = arith.constant 0 : index
    %445 = vector.load %arg15[%c18_191, %c0_192] : memref<128x128xbf16, #tpu.memory_space<vmem>>, vector<110x128xbf16>
    %446 = tpu.concatenate %444, %445 in 1 : vector<110x128xbf16>, vector<110x128xbf16> -> vector<110x256xbf16>
    %c4_193 = arith.constant 4 : index
    %c0_194 = arith.constant 0 : index
    %c0_195 = arith.constant 0 : index
    %447 = vector.load %arg6[%c4_193, %c0_194, %c0_195] : memref<5x256x128xbf16, #tpu.memory_space<vmem>>, vector<1x256x128xbf16>
    %448 = vector.shape_cast %447 : vector<1x256x128xbf16> to vector<256x128xbf16>
    %cst_196 = arith.constant dense<0.000000e+00> : vector<110x128xf32>
    %449 = tpu.matmul %446, %448, %cst_196 {dimension_numbers = #tpu.dot_dimension_numbers<[1], [0], [0], [1], [0, 0, 1, 1], [], []>} : vector<110x256xbf16>, vector<256x128xbf16>, vector<110x128xf32> -> vector<110x128xf32>
    %450 = arith.addf %443, %449 : vector<110x128xf32>
    %c4_197 = arith.constant 4 : index
    %c0_198 = arith.constant 0 : index
    %451 = vector.load %arg10[%c4_197, %c0_198] : memref<8x128xf32, #tpu.memory_space<vmem>>, vector<1x128xf32>
    %452 = vector.broadcast %451 : vector<1x128xf32> to vector<110x128xf32>
    %453 = arith.addf %450, %452 : vector<110x128xf32>
    %cst_199 = arith.constant 0.000000e+00 : f32
    %454 = vector.broadcast %cst_199 : f32 to vector<110x128xf32>
    %455 = arith.maximumf %453, %454 : vector<110x128xf32>
    %456 = arith.truncf %455 : vector<110x128xf32> to vector<110x128xbf16>
    %c0_200 = arith.constant 0 : index
    %c0_201 = arith.constant 0 : index
    %457 = vector.load %arg12[%c0_200, %c0_201] : memref<128x128xbf16, #tpu.memory_space<vmem>>, vector<110x128xbf16>
    tpu.vector_store %arg12[%c0_200, %c0_201], %456 {strides = array<i32>} : memref<128x128xbf16, #tpu.memory_space<vmem>>, vector<110x128xbf16>,
    %c0_202 = arith.constant 0 : index
    %c0_203 = arith.constant 0 : index
    %458 = vector.load %arg12[%c0_202, %c0_203] : memref<128x128xbf16, #tpu.memory_space<vmem>>, vector<8x128xbf16>
    %c8_204 = arith.constant 8 : index
    %c0_205 = arith.constant 0 : index
    %459 = vector.load %arg12[%c8_204, %c0_205] : memref<128x128xbf16, #tpu.memory_space<vmem>>, vector<8x128xbf16>
    %460 = arith.maximumf %458, %459 : vector<8x128xbf16>
    %c16_206 = arith.constant 16 : index
    %c0_207 = arith.constant 0 : index
    %461 = vector.load %arg12[%c16_206, %c0_207] : memref<128x128xbf16, #tpu.memory_space<vmem>>, vector<8x128xbf16>
    %462 = arith.maximumf %460, %461 : vector<8x128xbf16>
    %463 = vector.extract_strided_slice %462 {offsets = [0, 0], sizes = [1, 128], strides = [1, 1]} : vector<8x128xbf16> to vector<1x128xbf16>
    %464 = vector.extract_strided_slice %462 {offsets = [1, 0], sizes = [1, 128], strides = [1, 1]} : vector<8x128xbf16> to vector<1x128xbf16>
    %465 = arith.maximumf %463, %464 : vector<1x128xbf16>
    %466 = vector.extract_strided_slice %462 {offsets = [2, 0], sizes = [1, 128], strides = [1, 1]} : vector<8x128xbf16> to vector<1x128xbf16>
    %467 = arith.maximumf %465, %466 : vector<1x128xbf16>
    %468 = vector.extract_strided_slice %462 {offsets = [2, 0], sizes = [1, 128], strides = [1, 1]} : vector<8x128xbf16> to vector<1x128xbf16>
    %469 = vector.extract_strided_slice %462 {offsets = [3, 0], sizes = [1, 128], strides = [1, 1]} : vector<8x128xbf16> to vector<1x128xbf16>
    %470 = arith.maximumf %468, %469 : vector<1x128xbf16>
    %471 = vector.extract_strided_slice %462 {offsets = [4, 0], sizes = [1, 128], strides = [1, 1]} : vector<8x128xbf16> to vector<1x128xbf16>
    %472 = arith.maximumf %470, %471 : vector<1x128xbf16>
    %c16_208 = arith.constant 16 : index
    %c0_209 = arith.constant 0 : index
    %473 = vector.load %arg12[%c16_208, %c0_209] : memref<128x128xbf16, #tpu.memory_space<vmem>>, vector<8x128xbf16>
    %c24_210 = arith.constant 24 : index
    %c0_211 = arith.constant 0 : index
    %474 = vector.load %arg12[%c24_210, %c0_211] : memref<128x128xbf16, #tpu.memory_space<vmem>>, vector<8x128xbf16>
    %475 = arith.maximumf %473, %474 : vector<8x128xbf16>
    %c32_212 = arith.constant 32 : index
    %c0_213 = arith.constant 0 : index
    %476 = vector.load %arg12[%c32_212, %c0_213] : memref<128x128xbf16, #tpu.memory_space<vmem>>, vector<8x128xbf16>
    %477 = arith.maximumf %475, %476 : vector<8x128xbf16>
    %478 = vector.extract_strided_slice %477 {offsets = [0, 0], sizes = [1, 128], strides = [1, 1]} : vector<8x128xbf16> to vector<1x128xbf16>
    %479 = vector.extract_strided_slice %477 {offsets = [1, 0], sizes = [1, 128], strides = [1, 1]} : vector<8x128xbf16> to vector<1x128xbf16>
    %480 = arith.maximumf %478, %479 : vector<1x128xbf16>
    %481 = vector.extract_strided_slice %477 {offsets = [2, 0], sizes = [1, 128], strides = [1, 1]} : vector<8x128xbf16> to vector<1x128xbf16>
    %482 = arith.maximumf %480, %481 : vector<1x128xbf16>
    %483 = vector.extract_strided_slice %477 {offsets = [2, 0], sizes = [1, 128], strides = [1, 1]} : vector<8x128xbf16> to vector<1x128xbf16>
    %484 = vector.extract_strided_slice %477 {offsets = [3, 0], sizes = [1, 128], strides = [1, 1]} : vector<8x128xbf16> to vector<1x128xbf16>
    %485 = arith.maximumf %483, %484 : vector<1x128xbf16>
    %486 = vector.extract_strided_slice %477 {offsets = [4, 0], sizes = [1, 128], strides = [1, 1]} : vector<8x128xbf16> to vector<1x128xbf16>
    %487 = arith.maximumf %485, %486 : vector<1x128xbf16>
    %488 = tpu.concatenate %467, %472, %482, %487 in 1 : vector<1x128xbf16>, vector<1x128xbf16>, vector<1x128xbf16>, vector<1x128xbf16> -> vector<1x512xbf16>
    %c0_214 = arith.constant 0 : index
    %c0_215 = arith.constant 0 : index
    %489 = vector.load %arg16[%c0_214, %c0_215] : memref<2x512xbf16, #tpu.memory_space<vmem>>, vector<1x512xbf16>
    tpu.vector_store %arg16[%c0_214, %c0_215], %488 {strides = array<i32>} : memref<2x512xbf16, #tpu.memory_space<vmem>>, vector<1x512xbf16>,
    %c64_216 = arith.constant 64 : index
    %c0_217 = arith.constant 0 : index
    %490 = vector.load %arg12[%c64_216, %c0_217] : memref<128x128xbf16, #tpu.memory_space<vmem>>, vector<8x128xbf16>
    %c72_218 = arith.constant 72 : index
    %c0_219 = arith.constant 0 : index
    %491 = vector.load %arg12[%c72_218, %c0_219] : memref<128x128xbf16, #tpu.memory_space<vmem>>, vector<8x128xbf16>
    %492 = arith.maximumf %490, %491 : vector<8x128xbf16>
    %c80_220 = arith.constant 80 : index
    %c0_221 = arith.constant 0 : index
    %493 = vector.load %arg12[%c80_220, %c0_221] : memref<128x128xbf16, #tpu.memory_space<vmem>>, vector<8x128xbf16>
    %494 = arith.maximumf %492, %493 : vector<8x128xbf16>
    %495 = vector.extract_strided_slice %494 {offsets = [0, 0], sizes = [1, 128], strides = [1, 1]} : vector<8x128xbf16> to vector<1x128xbf16>
    %496 = vector.extract_strided_slice %494 {offsets = [1, 0], sizes = [1, 128], strides = [1, 1]} : vector<8x128xbf16> to vector<1x128xbf16>
    %497 = arith.maximumf %495, %496 : vector<1x128xbf16>
    %498 = vector.extract_strided_slice %494 {offsets = [2, 0], sizes = [1, 128], strides = [1, 1]} : vector<8x128xbf16> to vector<1x128xbf16>
    %499 = arith.maximumf %497, %498 : vector<1x128xbf16>
    %500 = vector.extract_strided_slice %494 {offsets = [2, 0], sizes = [1, 128], strides = [1, 1]} : vector<8x128xbf16> to vector<1x128xbf16>
    %501 = vector.extract_strided_slice %494 {offsets = [3, 0], sizes = [1, 128], strides = [1, 1]} : vector<8x128xbf16> to vector<1x128xbf16>
    %502 = arith.maximumf %500, %501 : vector<1x128xbf16>
    %503 = vector.extract_strided_slice %494 {offsets = [4, 0], sizes = [1, 128], strides = [1, 1]} : vector<8x128xbf16> to vector<1x128xbf16>
    %504 = arith.maximumf %502, %503 : vector<1x128xbf16>
    %c80_222 = arith.constant 80 : index
    %c0_223 = arith.constant 0 : index
    %505 = vector.load %arg12[%c80_222, %c0_223] : memref<128x128xbf16, #tpu.memory_space<vmem>>, vector<8x128xbf16>
    %c88_224 = arith.constant 88 : index
    %c0_225 = arith.constant 0 : index
    %506 = vector.load %arg12[%c88_224, %c0_225] : memref<128x128xbf16, #tpu.memory_space<vmem>>, vector<8x128xbf16>
    %507 = arith.maximumf %505, %506 : vector<8x128xbf16>
    %c96_226 = arith.constant 96 : index
    %c0_227 = arith.constant 0 : index
    %508 = vector.load %arg12[%c96_226, %c0_227] : memref<128x128xbf16, #tpu.memory_space<vmem>>, vector<8x128xbf16>
    %509 = arith.maximumf %507, %508 : vector<8x128xbf16>
    %510 = vector.extract_strided_slice %509 {offsets = [0, 0], sizes = [1, 128], strides = [1, 1]} : vector<8x128xbf16> to vector<1x128xbf16>
    %511 = vector.extract_strided_slice %509 {offsets = [1, 0], sizes = [1, 128], strides = [1, 1]} : vector<8x128xbf16> to vector<1x128xbf16>
    %512 = arith.maximumf %510, %511 : vector<1x128xbf16>
    %513 = vector.extract_strided_slice %509 {offsets = [2, 0], sizes = [1, 128], strides = [1, 1]} : vector<8x128xbf16> to vector<1x128xbf16>
    %514 = arith.maximumf %512, %513 : vector<1x128xbf16>
    %515 = vector.extract_strided_slice %509 {offsets = [2, 0], sizes = [1, 128], strides = [1, 1]} : vector<8x128xbf16> to vector<1x128xbf16>
    %516 = vector.extract_strided_slice %509 {offsets = [3, 0], sizes = [1, 128], strides = [1, 1]} : vector<8x128xbf16> to vector<1x128xbf16>
    %517 = arith.maximumf %515, %516 : vector<1x128xbf16>
    %518 = vector.extract_strided_slice %509 {offsets = [4, 0], sizes = [1, 128], strides = [1, 1]} : vector<8x128xbf16> to vector<1x128xbf16>
    %519 = arith.maximumf %517, %518 : vector<1x128xbf16>
    %520 = tpu.concatenate %499, %504, %514, %519 in 1 : vector<1x128xbf16>, vector<1x128xbf16>, vector<1x128xbf16>, vector<1x128xbf16> -> vector<1x512xbf16>
    %c1_228 = arith.constant 1 : index
    %c0_229 = arith.constant 0 : index
    %521 = vector.load %arg16[%c1_228, %c0_229] : memref<2x512xbf16, #tpu.memory_space<vmem>>, vector<1x512xbf16>
    tpu.vector_store %arg16[%c1_228, %c0_229], %520 {strides = array<i32>} : memref<2x512xbf16, #tpu.memory_space<vmem>>, vector<1x512xbf16>,
    %c0_230 = arith.constant 0 : index
    %c0_231 = arith.constant 0 : index
    %522 = vector.load %arg16[%c0_230, %c0_231] : memref<2x512xbf16, #tpu.memory_space<vmem>>, vector<2x512xbf16>
    %c0_232 = arith.constant 0 : index
    %c0_233 = arith.constant 0 : index
    %523 = vector.load %arg7[%c0_232, %c0_233] : memref<512x128xbf16, #tpu.memory_space<vmem>>, vector<512x128xbf16>
    %cst_234 = arith.constant dense<0.000000e+00> : vector<2x128xf32>
    %524 = tpu.matmul %522, %523, %cst_234 {dimension_numbers = #tpu.dot_dimension_numbers<[1], [0], [0], [1], [0, 0, 1, 1], [], []>} : vector<2x512xbf16>, vector<512x128xbf16>, vector<2x128xf32> -> vector<2x128xf32>
    %c5 = arith.constant 5 : index
    %c0_235 = arith.constant 0 : index
    %525 = vector.load %arg10[%c5, %c0_235] : memref<8x128xf32, #tpu.memory_space<vmem>>, vector<1x128xf32>
    %526 = vector.broadcast %525 : vector<1x128xf32> to vector<2x128xf32>
    %527 = arith.addf %524, %526 : vector<2x128xf32>
    %cst_236 = arith.constant 0.000000e+00 : f32
    %528 = vector.broadcast %cst_236 : f32 to vector<2x128xf32>
    %529 = arith.maximumf %527, %528 : vector<2x128xf32>
    %530 = arith.truncf %529 : vector<2x128xf32> to vector<2x128xbf16>
    %c0_237 = arith.constant 0 : index
    %c0_238 = arith.constant 0 : index
    %531 = vector.load %arg8[%c0_237, %c0_238] : memref<128x128xbf16, #tpu.memory_space<vmem>>, vector<128x128xbf16>
    %cst_239 = arith.constant dense<0.000000e+00> : vector<2x128xf32>
    %532 = tpu.matmul %530, %531, %cst_239 {dimension_numbers = #tpu.dot_dimension_numbers<[1], [0], [0], [1], [0, 0, 1, 1], [], []>} : vector<2x128xbf16>, vector<128x128xbf16>, vector<2x128xf32> -> vector<2x128xf32>
    %c6 = arith.constant 6 : index
    %c0_240 = arith.constant 0 : index
    %533 = vector.load %arg10[%c6, %c0_240] : memref<8x128xf32, #tpu.memory_space<vmem>>, vector<1x128xf32>
    %534 = vector.broadcast %533 : vector<1x128xf32> to vector<2x128xf32>
    %535 = arith.addf %532, %534 : vector<2x128xf32>
    %cst_241 = arith.constant 0.000000e+00 : f32
    %536 = vector.broadcast %cst_241 : f32 to vector<2x128xf32>
    %537 = arith.maximumf %535, %536 : vector<2x128xf32>
    %538 = arith.truncf %537 : vector<2x128xf32> to vector<2x128xbf16>
    %c0_242 = arith.constant 0 : index
    %c0_243 = arith.constant 0 : index
    %539 = vector.load %arg9[%c0_242, %c0_243] : memref<128x128xbf16, #tpu.memory_space<vmem>>, vector<128x128xbf16>
    %cst_244 = arith.constant dense<0.000000e+00> : vector<2x128xf32>
    %540 = tpu.matmul %538, %539, %cst_244 {dimension_numbers = #tpu.dot_dimension_numbers<[1], [0], [0], [1], [0, 0, 1, 1], [], []>} : vector<2x128xbf16>, vector<128x128xbf16>, vector<2x128xf32> -> vector<2x128xf32>
    %c7 = arith.constant 7 : index
    %c0_245 = arith.constant 0 : index
    %541 = vector.load %arg10[%c7, %c0_245] : memref<8x128xf32, #tpu.memory_space<vmem>>, vector<1x128xf32>
    %542 = vector.broadcast %541 : vector<1x128xf32> to vector<2x128xf32>
    %543 = arith.addf %540, %542 : vector<2x128xf32>
    %c0_246 = arith.constant 0 : index
    %c0_247 = arith.constant 0 : index
    %544 = vector.load %arg11[%c0_246, %c0_247] : memref<2x128xf32, #tpu.memory_space<vmem>>, vector<2x128xf32>
    tpu.vector_store %arg11[%c0_246, %c0_247], %543 {strides = array<i32>} : memref<2x128xf32, #tpu.memory_space<vmem>>, vector<2x128xf32>,
    return
  }
  func.func @transform_0(%arg0: i32) -> (i32, i32) {
    %c0_i32 = arith.constant 0 : i32
    %c0_i32_0 = arith.constant 0 : i32
    return %arg0, %c0_i32 : i32, i32
  }
  func.func @transform_1(%arg0: i32) -> (i32, i32) {
    %c0_i32 = arith.constant 0 : i32
    %c0_i32_0 = arith.constant 0 : i32
    %c0_i32_1 = arith.constant 0 : i32
    return %c0_i32, %c0_i32_0 : i32, i32
  }
  func.func @transform_2(%arg0: i32) -> (i32, i32) {
    %c0_i32 = arith.constant 0 : i32
    %c0_i32_0 = arith.constant 0 : i32
    %c0_i32_1 = arith.constant 0 : i32
    return %c0_i32, %c0_i32_0 : i32, i32
  }
  func.func @transform_3(%arg0: i32) -> (i32, i32, i32) {
    %c0_i32 = arith.constant 0 : i32
    %c0_i32_0 = arith.constant 0 : i32
    %c0_i32_1 = arith.constant 0 : i32
    %c0_i32_2 = arith.constant 0 : i32
    return %c0_i32, %c0_i32_0, %c0_i32_1 : i32, i32, i32
  }
  func.func @transform_4(%arg0: i32) -> (i32, i32, i32) {
    %c0_i32 = arith.constant 0 : i32
    %c0_i32_0 = arith.constant 0 : i32
    %c0_i32_1 = arith.constant 0 : i32
    %c0_i32_2 = arith.constant 0 : i32
    return %c0_i32, %c0_i32_0, %c0_i32_1 : i32, i32, i32
  }
  func.func @transform_5(%arg0: i32) -> (i32, i32, i32) {
    %c0_i32 = arith.constant 0 : i32
    %c0_i32_0 = arith.constant 0 : i32
    %c0_i32_1 = arith.constant 0 : i32
    %c0_i32_2 = arith.constant 0 : i32
    return %c0_i32, %c0_i32_0, %c0_i32_1 : i32, i32, i32
  }
  func.func @transform_6(%arg0: i32) -> (i32, i32) {
    %c0_i32 = arith.constant 0 : i32
    %c0_i32_0 = arith.constant 0 : i32
    %c0_i32_1 = arith.constant 0 : i32
    return %c0_i32, %c0_i32_0 : i32, i32
  }
  func.func @transform_7(%arg0: i32) -> (i32, i32) {
    %c0_i32 = arith.constant 0 : i32
    %c0_i32_0 = arith.constant 0 : i32
    %c0_i32_1 = arith.constant 0 : i32
    return %c0_i32, %c0_i32_0 : i32, i32
  }
  func.func @transform_8(%arg0: i32) -> (i32, i32) {
    %c0_i32 = arith.constant 0 : i32
    %c0_i32_0 = arith.constant 0 : i32
    %c0_i32_1 = arith.constant 0 : i32
    return %c0_i32, %c0_i32_0 : i32, i32
  }
  func.func @transform_9(%arg0: i32) -> (i32, i32) {
    %c0_i32 = arith.constant 0 : i32
    %c0_i32_0 = arith.constant 0 : i32
    %c0_i32_1 = arith.constant 0 : i32
    return %c0_i32, %c0_i32_0 : i32, i32
  }
  func.func @transform_10(%arg0: i32) -> (i32, i32) {
    %c0_i32 = arith.constant 0 : i32
    %c0_i32_0 = arith.constant 0 : i32
    return %arg0, %c0_i32 : i32, i32
  }
}

</mosaic_0001>

<bundles_post_ra>
// kernel: alexnet_forward.1
= control target key start
LH: loop header
LB: loop body
LE: loop exit
PB: predicated region body
PF: predicated region fallthrough
CT: control target
= control target key end

     0   :  { %15 = vsyncpa [#allocation8], 0  ;;  %s10326_s0 = inlined_call_operand.vmem [shape: bf16[128,128], index: 0, kind: input, shape index: {}]   ;;  %s10327_s1 = inlined_call_operand.vmem [shape: bf16[128,128], index: 1, kind: input, shape index: {}]   ;;  %s10328_s2 = inlined_call_operand.vmem [shape: bf16[128,128], index: 2, kind: input, shape index: {}]   ;;  %s10329_s3 = inlined_call_operand.vmem [shape: bf16[2,256,128], index: 3, kind: input, shape index: {}]   ;;  %s10330_s4 = inlined_call_operand.vmem [shape: bf16[5,256,128], index: 4, kind: input, shape index: {}]   ;;  %s10331_s5 = inlined_call_operand.vmem [shape: bf16[5,256,128], index: 5, kind: input, shape index: {}]   ;;  %s10332_s6 = inlined_call_operand.hbm [shape: bf16[512,128], index: 6, kind: input, shape index: {}]   ;;  %s10333_s7 = inlined_call_operand.hbm [shape: bf16[128,128], index: 7, kind: input, shape index: {}]   ;;  %s10334_s8 = inlined_call_operand.hbm [shape: bf16[128,128], index: 8, kind: input, shape index: {}]   ;;  %s10335_s9 = inlined_call_operand.vmem [shape: f32[8,128], index: 9, kind: input, shape index: {}]   ;;  %s10336_s10 = inlined_call_operand.hbm [shape: f32[2,128], index: 10, kind: output, shape index: {}]  }
   0x1   :  { %16 = vsyncpa [#allocation11], 0 }
   0x2   :  { %17 = vsyncpa [#allocation9], 0  ;;  %s8047_s13 = smov [#allocation10]   ;;  %s8048_s15 = smov [#allocation7]  }
   0x3   :  { %s47_s14 = sshll.u32 %s8047_s13, 4  ;;  %s35_s16 = sshll.u32 %s8048_s15, 4  ;;  %s48_s14 = int_to_ptr.vmem [resolvable:$true] %s47_s14  ;;  %s8112_s16 = int_to_ptr.vmem [resolvable:$true] %s35_s16 }
   0x4   :  { %s7953_s19 = scalar_lea.hbm %s10333_s7, 1024 }
   0x5   :  { %p7954_p0 = scmp.ne.s32.totalorder %s10333_s7, %s7953_s19  ;;  %p7957_p1 = scmp.lt.u32.totalorder %s7953_s19, %s10333_s7 }
   0x7   :  { %p7959_p2 = pnand %p7957_p1, %p7954_p0 }
   0x9   :  { %7962 = shalt.err (!%p7959_p2)
}
   0xa   :  { %s7963_s24 = scalar_lea.vmem %s48_s14, 1024  ;;  %p7968_p4 = scmp.lt.s32.totalorder %s48_s14, %s48_s14 }
   0xb   :  { %p7964_p3 = scmp.ne.s32.totalorder %s48_s14, %s7963_s24  ;;  %p7969_p5 = scmp.lt.s32.totalorder %s7963_s24, %s7963_s24 }
   0xd   :  { %p7970_p6 = por %p7969_p5, %p7968_p4 }
   0xf   :  { %p7971_p7 = pnand %p7970_p6, %p7964_p3 }
  0x11   :  { %7974 = shalt.err (!%p7971_p7)
}
  0x12   :  { %s8049_s25 = smov 64   ;;  %s8050_s26 = smov 4  }
  0x13   :  { %53 = dma.hbm_to_vmem [thread:$0]  %s10333_s7, 1024, %s48_s14, [#allocation11], %s8049_s25, %s8049_s25, %s8050_s26  }
  0x14   :  { %s7975_s11 = scalar_lea.hbm %s10332_s6, 4096 }
  0x15   :  { %p7976_p8 = scmp.ne.s32.totalorder %s10332_s6, %s7975_s11  ;;  %p7979_p9 = scmp.lt.u32.totalorder %s7975_s11, %s10332_s6 }
  0x17   :  { %p7981_p10 = pnand %p7979_p9, %p7976_p8 }
  0x19   :  { %7984 = shalt.err (!%p7981_p10)
}
  0x1a   :  { %s7985_s18 = scalar_lea.vmem %s8112_s16, 4096  ;;  %p7990_p12 = scmp.lt.s32.totalorder %s8112_s16, %s8112_s16 }
  0x1b   :  { %p7986_p11 = scmp.ne.s32.totalorder %s8112_s16, %s7985_s18  ;;  %p7991_p13 = scmp.lt.s32.totalorder %s7985_s18, %s7985_s18 }
  0x1d   :  { %p7992_p0 = por %p7991_p13, %p7990_p12 }
  0x1f   :  { %p7993_p1 = pnand %p7992_p0, %p7986_p11 }
  0x21   :  { %7996 = shalt.err (!%p7993_p1)
}
  0x22   :  { %41 = dma.hbm_to_vmem [thread:$0]  %s10332_s6, 4096, %s8112_s16, [#allocation8], %s8049_s25, %s8049_s25, %s8050_s26  }
  0x23   :  { %s8051_s19 = smov [#allocation12]   ;;  %s7997_s23 = scalar_lea.hbm %s10334_s8, 1024 }
  0x24   :  { %s59_s20 = sshll.u32 %s8051_s19, 4  ;;  %p7998_p2 = scmp.ne.s32.totalorder %s10334_s8, %s7997_s23  ;;  %s60_s20 = int_to_ptr.vmem [resolvable:$true] %s59_s20 }
  0x25   :  { %p8001_p3 = scmp.lt.u32.totalorder %s7997_s23, %s10334_s8 }
  0x27   :  { %p8003_p4 = pnand %p8001_p3, %p7998_p2 }
  0x29   :  { %8006 = shalt.err (!%p8003_p4)
}
  0x2a   :  { %s8007_s30 = scalar_lea.vmem %s60_s20, 1024  ;;  %p8012_p6 = scmp.lt.s32.totalorder %s60_s20, %s60_s20 }
  0x2b   :  { %p8008_p5 = scmp.ne.s32.totalorder %s60_s20, %s8007_s30  ;;  %p8013_p7 = scmp.lt.s32.totalorder %s8007_s30, %s8007_s30 }
  0x2d   :  { %p8014_p8 = por %p8013_p7, %p8012_p6 }
  0x2f   :  { %p8015_p9 = pnand %p8014_p8, %p8008_p5 }
  0x31   :  { %8018 = shalt.err (!%p8015_p9)
}
  0x32   :  { %65 = dma.hbm_to_vmem [thread:$0]  %s10334_s8, 1024, %s60_s20, [#allocation11], %s8049_s25, %s8049_s25, %s8050_s26  }
  0x33   :  { %8041 = dma.done.wait [#allocation8], 4096  }
  0x34   :  { %8042 = vsyncadd [#allocation8], 4294963200 }
  0x35   :  { %8043 = dma.done.wait [#allocation11], 2048  }
  0x36   :  { %8044 = vsyncadd [#allocation11], 4294965248  ;;  %v7688_v0 = vld [vmem:[%s10327_s1] sm:$0xff]   ;;  %v7689_v1 = vld [vmem:[%s10327_s1 + $0x8] sm:$0xff]   ;;  %vm10337_vm0 = vcmask 1040384   ;;  %vm582_vm2 = vcmask 1041408  }
  0x37   :  { %7574 = vmatprep.subr.bf16.mxu0 %v7688_v0  ;;  %v7690_v2 = vld [vmem:[%s10327_s1 + $0x10] sm:$0xff]   ;;  %v7691_v3 = vld [vmem:[%s10327_s1 + $0x18] sm:$0xff]   ;;  %v7696_v4 = vld [vmem:[%s10326_s0] sm:$0xff]   ;;  %vm574_vm1 = vsmask.f32 256  ;;  %vm590_vm4 = vcmask 1042432  }
  0x38   :  { %7575 = vmatpush3.bf16.msra.mxu0 %v7688_v0  ;;  %7590 = vmatprep.mubr.bf16.mxu0 %v7696_v4  ;;  %v7692_v5 = vld [vmem:[%s10327_s1 + $0x20] sm:$0xff]   ;;  %v7693_v6 = vld [vmem:[%s10327_s1 + $0x28] sm:$0xff]   ;;  %v7694_v9 = vld [vmem:[%s10327_s1 + $0x30] sm:$0xff]   ;;  %vm10339_vm3 = vsmask.f32 1280  ;;  %vm599_vm7 = vcmask 1043456  }
  0x39   :  { %7576 = vmatprep.subr.bf16.mxu0 %v7689_v1  ;;  %v7704_v7 = vld [vmem:[%s10328_s2] sm:$0xff]   ;;  %v7705_v8 = vld [vmem:[%s10328_s2 + $0x8] sm:$0xff]   ;;  %v7706_v10 = vld [vmem:[%s10328_s2 + $0x10] sm:$0xff]   ;;  %vm10338_vm5 = vsmask.f32 2304  ;;  %vm10342_vm13 = vcmask 1044480  }
  0x3a   :  { %7606 = vmatprep.subr.bf16.mxu1 %v7704_v7  ;;  %v7695_v11 = vld [vmem:[%s10327_s1 + $0x38] sm:$0xff]   ;;  %v7708_v13 = vld [vmem:[%s10328_s2 + $0x20] sm:$0xff]   ;;  %v7697_v14 = vld [vmem:[%s10326_s0 + $0x8] sm:$0xff]   ;;  %vm10340_vm8 = vsmask.f32 3328 }
  0x3b   :  { %7607 = vmatpush3.bf16.msra.mxu1 %v7704_v7  ;;  %v7707_v12 = vld [vmem:[%s10328_s2 + $0x18] sm:$0xff]   ;;  %v7698_v15 = vld [vmem:[%s10326_s0 + $0x10] sm:$0xff]   ;;  %v7709_v16 = vld [vmem:[%s10328_s2 + $0x28] sm:$0xff]   ;;  %vm10343_vm12 = vsmask.f32 7424 }
  0x3c   :  { %7577 = vmatpush3.bf16.msra.mxu0 %v7689_v1  ;;  %7608 = vmatprep.subr.bf16.mxu1 %v7705_v8  ;;  %v7699_v17 = vld [vmem:[%s10326_s0 + $0x18] sm:$0xff]   ;;  %v7700_v18 = vld [vmem:[%s10326_s0 + $0x20] sm:$0xff]   ;;  %v7701_v19 = vld [vmem:[%s10326_s0 + $0x28] sm:$0xff]   ;;  %vm10341_vm14 = vsmask.f32 4352 }
  0x3d   :  { %7578 = vmatprep.subr.bf16.mxu0 %v7690_v2  ;;  %v7702_v20 = vld [vmem:[%s10326_s0 + $0x30] sm:$0xff]   ;;  %v7703_v21 = vld [vmem:[%s10326_s0 + $0x38] sm:$0xff]   ;;  %v6223_v24 = vld [vmem:[%s10335_s9] ss:$0 sm:$0xff] }
  0x3e   :  { %v7710_v22 = vld [vmem:[%s10328_s2 + $0x30] sm:$0xff]   ;;  %v7711_v23 = vld [vmem:[%s10328_s2 + $0x38] sm:$0xff]   ;;  %vm8385_vm6 = vmand %vm10337_vm0, %vm574_vm1 }
  0x3f   :  { %7609 = vmatpush3.bf16.msra.mxu1 %v7705_v8  ;;  %vm8431_vm9 = vmand %vm582_vm2, %vm10339_vm3 }
  0x40   :  { %7579 = vmatpush3.bf16.msra.mxu0 %v7690_v2  ;;  %7610 = vmatprep.subr.bf16.mxu1 %v7706_v10  ;;  %vm8448_vm10 = vmand %vm590_vm4, %vm10338_vm5  ;;  %vm10344_vm5 = vcmask 1046528  }
  0x41   :  { %7580 = vmatprep.subr.bf16.mxu0 %v7691_v3  ;;  %vm8465_vm11 = vmand %vm599_vm7, %vm10340_vm8 }
  0x42   :  { %vm8713_vm15 = vmand %vm10342_vm13, %vm10341_vm14 }
  0x43   :  { %7611 = vmatpush3.bf16.msra.mxu1 %v7706_v10 }
  0x44   :  { %7581 = vmatpush3.bf16.msra.mxu0 %v7691_v3  ;;  %7612 = vmatprep.subr.bf16.mxu1 %v7707_v12 }
  0x45   :  { %7582 = vmatprep.subr.bf16.mxu0 %v7692_v5 }
  0x47   :  { %7613 = vmatpush3.bf16.msra.mxu1 %v7707_v12 }
  0x48   :  { %7583 = vmatpush3.bf16.msra.mxu0 %v7692_v5  ;;  %7614 = vmatprep.subr.bf16.mxu1 %v7708_v13 }
  0x49   :  { %7584 = vmatprep.subr.bf16.mxu0 %v7693_v6 }
  0x4b   :  { %7615 = vmatpush3.bf16.msra.mxu1 %v7708_v13 }
  0x4c   :  { %7585 = vmatpush3.bf16.msra.mxu0 %v7693_v6  ;;  %7616 = vmatprep.subr.bf16.mxu1 %v7709_v16 }
  0x4d   :  { %7586 = vmatprep.subr.bf16.mxu0 %v7694_v9 }
  0x4f   :  { %7617 = vmatpush3.bf16.msra.mxu1 %v7709_v16 }
  0x50   :  { %7587 = vmatpush3.bf16.msra.mxu0 %v7694_v9  ;;  %7618 = vmatprep.subr.bf16.mxu1 %v7710_v22 }
  0x51   :  { %7588 = vmatprep.subr.bf16.mxu0 %v7695_v11 }
  0x53   :  { %7619 = vmatpush3.bf16.msra.mxu1 %v7710_v22  ;;  %v7717_v22 = vld [vmem:[%s10329_s3 + $0x80] sm:$0xff]  }
  0x54   :  { %7589 = vmatpush3.bf16.msra.mxu0 %v7695_v11  ;;  %7620 = vmatprep.subr.bf16.mxu1 %v7711_v23 }
  0x57   :  { %7591 = vmatmul.mubr.bf16.vlgmr.msra.gmra.mrb[0].mxu0 %v7697_v14  ;;  %7621 = vmatpush3.bf16.msra.mxu1 %v7711_v23  ;;  %v7718_v23 = vld [vmem:[%s10329_s3 + $0x50] sm:$0xff]  }
  0x58   :  { %7594 = vmatprep.mubr.bf16.mxu0 %v7698_v15 }
  0x5f   :  { %7595 = vmatmul.mubr.bf16.gmra.mrb[4].mxu0 %v7699_v17  ;;  %v7712_v17 = vld [vmem:[%s10329_s3 + $0x40] sm:$0xff]  }
  0x60   :  { %7598 = vmatprep.mubr.bf16.mxu0 %v7700_v18  ;;  %6874 = vmatprep.subr.bf16.mxu1 %v7712_v17  ;;  %v7713_v18 = vld [vmem:[%s10329_s3] sm:$0xff]  }
  0x67   :  { %7599 = vmatmul.mubr.bf16.gmra.mrb[8].mxu0 %v7701_v19  ;;  %v7714_v19 = vld [vmem:[%s10329_s3 + $0x48] sm:$0xff]  }
  0x68   :  { %7602 = vmatprep.mubr.bf16.mxu0 %v7702_v20  ;;  %v7716_v20 = vld [vmem:[%s10329_s3 + $0x8] sm:$0xff]  }
  0x6f   :  { %7603 = vmatmul.mubr.bf16.gmra.mrb[12].mxu0 %v7703_v21  ;;  %v7715_v21 = vld [vmem:[%s10329_s3 + $0xc0] sm:$0xff]  }
  0x70   :  { %6816 = vmatprep.subr.bf16.mxu0 %v7715_v21 }
  0x71   :  { %6817 = vmatpush3.bf16.msra.mxu0 %v7717_v22 }
 0x12a   :  { %v7592_v25 = vpop.f32.mrb[0].mxu0 }
 0x12b   :  { %v254_v26 = vadd.f32 %v7592_v25, %v6223_v24  ;;  %v245_v27 = vpop.f32.mrb[1].mxu0  ;;  %v7719_v25 = vld [vmem:[%s10329_s3 + $0xc8] sm:$0xff]  }
 0x12c   :  { %v246_v28 = vadd.f32 %v6223_v24, %v245_v27  ;;  %v7593_v29 = vpop.f32.mrb[2].mxu0  ;;  %6818 = vmatprep.subr.bf16.mxu0 %v7719_v25  ;;  %v7722_v27 = vld [vmem:[%s10329_s3 + $0x58] sm:$0xff]  }
 0x12d   :  { %v257_v30 = vadd.f32 %v7593_v29, %v6223_v24  ;;  %v248_v31 = vpop.f32.mrb[3].mxu0  ;;  %v310_v33 = vmax.f32 %v254_v26, 0.0  ;;  %v7721_v26 = vld [vmem:[%s10329_s3 + $0x88] sm:$0xff]   ;;  %v7724_v29 = vld [vmem:[%s10329_s3 + $0x18] sm:$0xff]  }
 0x12e   :  { %v249_v32 = vadd.f32 %v6223_v24, %v248_v31  ;;  %v308_v35 = vmax.f32 %v246_v28, 0.0  ;;  %v8052_v28 = vmov 0   ;;  %6819 = vmatpush3.bf16.msra.mxu0 %v7721_v26  ;;  %v7725_v31 = vld [vmem:[%s10329_s3 + $0x90] sm:$0xff]  }
 0x12f   :  { %v311_v34 = vmax.f32 %v257_v30, 0.0  ;;  %533 = vst [vmem:[#allocation3] sm:$0xf] %v8052_v28  ;;  %534 = vst [vmem:[#allocation3 + $0x18] sm:$0xff] %v8052_v28  ;;  %v7723_v30 = vld [vmem:[%s10329_s3 + $0xd0] sm:$0xff]  }
 0x130   :  { %v309_v36 = vmax.f32 %v249_v32, 0.0  ;;  %808 = vst [vmem:[#allocation3 + $0x20] sm:$0xf] %v8052_v28  ;;  %809 = vst [vmem:[#allocation3 + $0x38] sm:$0xff] %v8052_v28  ;;  %6820 = vmatprep.subr.bf16.mxu0 %v7723_v30  ;;  %v7726_v32 = vld [vmem:[%s10329_s3 + $0x60] sm:$0xff]  }
 0x131   :  { %v325_v37 = vpack.c.bf16 %v311_v34, %v310_v33  ;;  %v7728_v33 = vld [vmem:[%s10329_s3 + $0x20] sm:$0xff]   ;;  %v7727_v34 = vld [vmem:[%s10329_s3 + $0xd8] sm:$0xff]  }
 0x132   :  { %v7596_v38 = vpop.f32.mrb[4].mxu0  ;;  %v324_v39 = vpack.c.bf16 %v309_v36, %v308_v35  ;;  %6821 = vmatpush3.bf16.msra.mxu0 %v7725_v31  ;;  %v7729_v35 = vld [vmem:[%s10329_s3 + $0x98] sm:$0xff]   ;;  %v7730_v36 = vld [vmem:[%s10329_s3 + $0x68] sm:$0xff]  }
 0x133   :  { %v270_v40 = vadd.f32 %v7596_v38, %v6223_v24  ;;  %v261_v41 = vpop.f32.mrb[5].mxu0  ;;  %6822 = vmatprep.subr.bf16.mxu0 %v7727_v34  ;;  %v7731_v38 = vld [vmem:[%s10329_s3 + $0xe0] sm:$0xff]  }
 0x134   :  { %v262_v42 = vadd.f32 %v6223_v24, %v261_v41  ;;  %v7597_v43 = vpop.f32.mrb[6].mxu0  ;;  %7622 = vmatprep.mubr.bf16.mxu1 %v324_v39  ;;  %v7733_v39 = vld [vmem:[%s10329_s3 + $0xa0] sm:$0xff]   ;;  %v7736_v41 = vld [vmem:[%s10329_s3 + $0x30] sm:$0xff]  }
 0x135   :  { %v273_v44 = vadd.f32 %v7597_v43, %v6223_v24  ;;  %v264_v45 = vpop.f32.mrb[7].mxu0  ;;  %7623 = vmatmul.mubr.bf16.vlgmr.msra.gmra.mrb[0].mxu1 %v325_v37  ;;  %v314_v47 = vmax.f32 %v270_v40, 0.0  ;;  %v7732_v37 = vld [vmem:[%s10329_s3 + $0x28] sm:$0xff]   ;;  %v7734_v40 = vld [vmem:[%s10329_s3 + $0x70] sm:$0xff]  }
 0x136   :  { %v265_v46 = vadd.f32 %v6223_v24, %v264_v45  ;;  %v312_v49 = vmax.f32 %v262_v42, 0.0  ;;  %6875 = vmatpush3.bf16.msra.mxu1 %v7713_v18  ;;  %6823 = vmatpush3.bf16.msra.mxu0 %v7729_v35  ;;  %v7735_v42 = vld [vmem:[%s10329_s3 + $0xe8] sm:$0xff]   ;;  %v7740_v45 = vld [vmem:[%s10329_s3 + $0x38] sm:$0xff]  }
 0x137   :  { %v315_v48 = vmax.f32 %v273_v44, 0.0  ;;  %6876 = vmatprep.subr.bf16.mxu1 %v7714_v19  ;;  %6824 = vmatprep.subr.bf16.mxu0 %v7731_v38  ;;  %v7737_v43 = vld [vmem:[%s10329_s3 + $0xa8] sm:$0xff]   ;;  %v7738_v44 = vld [vmem:[%s10329_s3 + $0x78] sm:$0xff]  }
 0x138   :  { %v313_v50 = vmax.f32 %v265_v46, 0.0  ;;  %v7739_v46 = vld [vmem:[%s10329_s3 + $0xf0] sm:$0xff]  }
 0x139   :  { %v327_v51 = vpack.c.bf16 %v315_v48, %v314_v47  ;;  %v7741_v47 = vld [vmem:[%s10329_s3 + $0xb0] sm:$0xff]   ;;  %v7742_v48 = vld [vmem:[%s10329_s3 + $0xf8] sm:$0xff]  }
 0x13a   :  { %v326_v52 = vpack.c.bf16 %v313_v50, %v312_v49  ;;  %v7600_v53 = vpop.f32.mrb[8].mxu0  ;;  %6877 = vmatpush3.bf16.msra.mxu1 %v7716_v20  ;;  %6825 = vmatpush3.bf16.msra.mxu0 %v7733_v39  ;;  %v7743_v49 = vld [vmem:[%s10329_s3 + $0xb8] sm:$0xff]   ;;  %v8342_v50 = vld [vmem:[%s10335_s9 + $0x1] ss:$0 sm:$0xff] }
 0x13b   :  { %v286_v54 = vadd.f32 %v7600_v53, %v6223_v24  ;;  %v277_v55 = vpop.f32.mrb[9].mxu0  ;;  %6878 = vmatprep.subr.bf16.mxu1 %v7718_v23  ;;  %6826 = vmatprep.subr.bf16.mxu0 %v7735_v42 }
 0x13c   :  { %v278_v56 = vadd.f32 %v6223_v24, %v277_v55  ;;  %v7601_v57 = vpop.f32.mrb[10].mxu0  ;;  %7626 = vmatprep.mubr.bf16.mxu1 %v326_v52 }
 0x13d   :  { %v318_v58 = vmax.f32 %v286_v54, 0.0  ;;  %v289_v59 = vadd.f32 %v7601_v57, %v6223_v24  ;;  %v280_v60 = vpop.f32.mrb[11].mxu0  ;;  %7627 = vmatmul.mubr.bf16.gmra.mrb[4].mxu1 %v327_v51  ;;  %v530_v51 = vld [vmem:[%s10335_s9 + $0x1] sm:$0x1] }
 0x13e   :  { %v316_v61 = vmax.f32 %v278_v56, 0.0  ;;  %v281_v62 = vadd.f32 %v6223_v24, %v280_v60  ;;  %6827 = vmatpush3.bf16.msra.mxu0 %v7737_v43  ;;  %v531_v57 = vmax.f32 %v530_v51, 0.0 }
 0x13f   :  { %v319_v63 = vmax.f32 %v289_v59, 0.0  ;;  %6828 = vmatprep.subr.bf16.mxu0 %v7739_v46 }
 0x140   :  { %v317_v0 = vmax.f32 %v281_v62, 0.0 }
 0x141   :  { %v329_v1 = vpack.c.bf16 %v319_v63, %v318_v58  ;;  %v539_v58 = vlaneseq }
 0x142   :  { %v328_v2 = vpack.c.bf16 %v317_v0, %v316_v61  ;;  %v7604_v3 = vpop.f32.mrb[12].mxu0  ;;  %6829 = vmatpush3.bf16.msra.mxu0 %v7741_v47 }
 0x143   :  { %v302_v4 = vadd.f32 %v7604_v3, %v6223_v24  ;;  %v293_v5 = vpop.f32.mrb[13].mxu0  ;;  %6830 = vmatprep.subr.bf16.mxu0 %v7742_v48  ;;  %v8353_v3 = vshrl.u32 %v539_v58, 7 }
 0x144   :  { %v294_v6 = vadd.f32 %v6223_v24, %v293_v5  ;;  %v7605_v7 = vpop.f32.mrb[14].mxu0  ;;  %7630 = vmatprep.mubr.bf16.mxu1 %v328_v2  ;;  %v8351_v2 = vpack.c.bf16 %v531_v57, %v531_v57 }
 0x145   :  { %v322_v8 = vmax.f32 %v302_v4, 0.0  ;;  %v305_v9 = vadd.f32 %v7605_v7, %v6223_v24  ;;  %v296_v10 = vpop.f32.mrb[15].mxu0  ;;  %7631 = vmatmul.mubr.bf16.gmra.mrb[8].mxu1 %v329_v1  ;;  %10365 = vst [vmem:[#allocation17_spill] sm:$0xff] %v8353_v3 }
 0x146   :  { %v320_v11 = vmax.f32 %v294_v6, 0.0  ;;  %v297_v12 = vadd.f32 %v6223_v24, %v296_v10  ;;  %v7720_v24 = vld [vmem:[%s10329_s3 + $0x10] sm:$0xff]   ;;  %6831 = vmatpush3.bf16.msra.mxu0 %v7743_v49  ;;  %v541_v10 = vsub.s32 0, %v8353_v3  ;;  %s8056_s3 = smov [#allocation13]  }
 0x147   :  { %v323_v13 = vmax.f32 %v305_v9, 0.0  ;;  %6879 = vmatpush3.bf16.msra.mxu1 %v7720_v24  ;;  %v537_v9 = vpack.i.b16 %v8351_v2, %v8351_v2  ;;  %s6213_s24 = sshll.u32 %s8056_s3, 4  ;;  %s6214_s24 = int_to_ptr.vmem [resolvable:$true] %s6213_s24 }
 0x148   :  { %v321_v14 = vmax.f32 %v297_v12, 0.0  ;;  %6880 = vmatprep.subr.bf16.mxu1 %v7722_v27  ;;  %s8019_s27 = scalar_lea.vmem %s6214_s24, 32  ;;  %p8024_p11 = scmp.lt.s32.totalorder %s6214_s24, %s6214_s24 }
 0x149   :  { %v331_v15 = vpack.c.bf16 %v323_v13, %v322_v8  ;;  %v8362_v18 = vrot.slane %v537_v9, %v541_v10  ;;  %p8020_p10 = scmp.ne.s32.totalorder %s6214_s24, %s8019_s27  ;;  %p8025_p12 = scmp.lt.s32.totalorder %s8019_s27, %s8019_s27 }
 0x14a   :  { %v330_v16 = vpack.c.bf16 %v321_v14, %v320_v11 }
 0x14b   :  { %6881 = vmatpush3.bf16.msra.mxu1 %v7724_v29  ;;  %p8026_p13 = por %p8025_p12, %p8024_p11 }
 0x14c   :  { %7634 = vmatprep.mubr.bf16.mxu1 %v330_v16  ;;  %6882 = vmatprep.subr.bf16.mxu1 %v7726_v32 }
 0x14d   :  { %7635 = vmatmul.mubr.bf16.gmra.mrb[12].mxu1 %v331_v15  ;;  %p8027_p0 = pnand %p8026_p13, %p8020_p10 }
 0x14f   :  { %6883 = vmatpush3.bf16.msra.mxu1 %v7728_v33 }
 0x150   :  { %6884 = vmatprep.subr.bf16.mxu1 %v7730_v36 }
 0x153   :  { %6885 = vmatpush3.bf16.msra.mxu1 %v7732_v37 }
 0x154   :  { %6886 = vmatprep.subr.bf16.mxu1 %v7734_v40 }
 0x157   :  { %6887 = vmatpush3.bf16.msra.mxu1 %v7736_v41 }
 0x158   :  { %6888 = vmatprep.subr.bf16.mxu1 %v7738_v44  ;;  %v8370_v44 = vrot.slane %v8351_v2, 5 }
 0x15b   :  { %6889 = vmatpush3.bf16.msra.mxu1 %v7740_v45 }
 0x208   :  { %v7624_v52 = vpop.f32.mrb[0].mxu1 }
 0x209   :  { %v444_v53 = vadd.f32 %v7624_v52, %v8342_v50  ;;  %v435_v54 = vpop.f32.mrb[1].mxu1 }
 0x20a   :  { %v436_v55 = vadd.f32 %v8342_v50, %v435_v54  ;;  %v7625_v56 = vpop.f32.mrb[2].mxu1 }
 0x20b   :  { %v447_v59 = vadd.f32 %v7625_v56, %v8342_v50  ;;  %v438_v60 = vpop.f32.mrb[3].mxu1  ;;  %v500_v62 = vmax.f32 %v444_v53, 0.0 }
 0x20c   :  { %v439_v61 = vadd.f32 %v8342_v50, %v438_v60  ;;  %v498_v0 = vmax.f32 %v436_v55, 0.0 }
 0x20d   :  { %v501_v63 = vmax.f32 %v447_v59, 0.0 }
 0x20e   :  { %v499_v1 = vmax.f32 %v439_v61, 0.0 }
 0x20f   :  { %v515_v4 = vpack.c.bf16 %v501_v63, %v500_v62 }
 0x210   :  { %v514_v5 = vpack.c.bf16 %v499_v1, %v498_v0  ;;  %v7628_v6 = vpop.f32.mrb[4].mxu1 }
 0x211   :  { %523 = vst [vmem:[#allocation2 + $0x8] sm:$0xff] %v515_v4  ;;  %v460_v7 = vadd.f32 %v7628_v6, %v8342_v50  ;;  %v451_v8 = vpop.f32.mrb[5].mxu1 }
 0x212   :  { %522 = vst [vmem:[#allocation2] sm:$0xff] %v514_v5  ;;  %v452_v11 = vadd.f32 %v8342_v50, %v451_v8  ;;  %v7629_v12 = vpop.f32.mrb[6].mxu1 }
 0x213   :  { %v463_v13 = vadd.f32 %v7629_v12, %v8342_v50  ;;  %v454_v14 = vpop.f32.mrb[7].mxu1  ;;  %v504_v16 = vmax.f32 %v460_v7, 0.0 }
 0x214   :  { %v455_v15 = vadd.f32 %v8342_v50, %v454_v14  ;;  %v502_v19 = vmax.f32 %v452_v11, 0.0 }
 0x215   :  { %v505_v17 = vmax.f32 %v463_v13, 0.0 }
 0x216   :  { %v503_v20 = vmax.f32 %v455_v15, 0.0 }
 0x217   :  { %v517_v21 = vpack.c.bf16 %v505_v17, %v504_v16 }
 0x218   :  { %v516_v22 = vpack.c.bf16 %v503_v20, %v502_v19  ;;  %v657_v23 = vld [vmem:[#allocation2 + $0x8] sm:$0xf0]  ;;  %v7632_v25 = vpop.f32.mrb[8].mxu1  ;;  %v613_v42 = vld [vmem:[#allocation2 + $0x8] sm:$0xf]  ;;  %v10366_v19 = vmov 0 }
 0x219   :  { %v535_v24 = vld [vmem:[#allocation2] sm:$0xf]  ;;  %525 = vst [vmem:[#allocation2 + $0x18] sm:$0xff] %v517_v21  ;;  %v608_v27 = vld [vmem:[#allocation2] sm:$0xf0]  ;;  %v476_v29 = vadd.f32 %v7632_v25, %v8342_v50  ;;  %v467_v30 = vpop.f32.mrb[9].mxu1 }
 0x21a   :  { %v543_v26 = vmax.bf16 %v8362_v18, %v535_v24  ;;  %524 = vst [vmem:[#allocation2 + $0x10] sm:$0xff] %v516_v22  ;;  %v610_v31 = vrot.slane %v608_v27, 4  ;;  %v468_v32 = vadd.f32 %v8342_v50, %v467_v30  ;;  %v7633_v33 = vpop.f32.mrb[10].mxu1  ;;  %v659_v34 = vrot.slane %v657_v23, 4  ;;  %v607_v36 = vld [vmem:[#allocation2] sm:$0xf] }
 0x21b   :  { %v470_v37 = vpop.f32.mrb[11].mxu1  ;;  %v508_v39 = vmax.f32 %v476_v29, 0.0  ;;  %v479_v40 = vadd.f32 %v7633_v33, %v8342_v50  ;;  %v656_v49 = vld [vmem:[#allocation2 + $0x8] sm:$0xf]  ;;  %v10367_v19 = vsel %vm8385_vm6, 4294967295, %v10366_v19 }
 0x21c   :  { %v546_v35 = vshrl.u32 %v543_v26, 16  ;;  %v612_v38 = vmax.bf16 %v610_v31, %v607_v36  ;;  %v471_v41 = vadd.f32 %v8342_v50, %v470_v37  ;;  %v506_v46 = vmax.f32 %v468_v32, 0.0  ;;  %10368 = vst [vmem:[#allocation18_spill] sm:$0xff] %v10367_v19 }
 0x21d   :  { %v509_v47 = vmax.f32 %v479_v40, 0.0  ;;  %v551_v51 = vrot.slane %v543_v26, 1  ;;  %v661_v53 = vmax.bf16 %v659_v34, %v656_v49  ;;  %v544_v54 = vmax.bf16 %v543_v26, %v8351_v2 }
 0x21e   :  { %v549_v43 = vmax.bf16 %v546_v35, %v543_v26  ;;  %v614_v45 = vmax.bf16 %v613_v42, %v612_v38  ;;  %v507_v48 = vmax.f32 %v471_v41, 0.0 }
 0x21f   :  { %v519_v58 = vpack.c.bf16 %v509_v47, %v508_v39  ;;  %v559_v10 = vshll.u32 %v544_v54, 16 }
 0x220   :  { %v7636_v52 = vpop.f32.mrb[12].mxu1  ;;  %v617_v55 = vshrl.u32 %v614_v45, 16  ;;  %v758_v56 = vld [vmem:[#allocation2 + $0x18] sm:$0xf0]  ;;  %v8373_v59 = vmax.bf16 %v551_v51, %v549_v43  ;;  %v557_v60 = vmax.bf16 %v8370_v44, %v549_v43  ;;  %v615_v62 = vmax.bf16 %v614_v45, %v8351_v2  ;;  %v757_v0 = vld [vmem:[#allocation2 + $0x18] sm:$0xf] }
 0x221   :  { %v662_v57 = vld [vmem:[#allocation2 + $0x10] sm:$0xf]  ;;  %v760_v61 = vrot.slane %v758_v56, 4  ;;  %v709_v4 = vld [vmem:[#allocation2 + $0x10] sm:$0xf0]  ;;  %527 = vst [vmem:[#allocation2 + $0x28] sm:$0xff] %v519_v58  ;;  %v518_v5 = vpack.c.bf16 %v507_v48, %v506_v46  ;;  %v492_v31 = vadd.f32 %v7636_v52, %v8342_v50 }
 0x222   :  { %v8377_v63 = vmax.bf16 %v617_v55, %v614_v45  ;;  %v663_v1 = vmax.bf16 %v662_v57, %v661_v53  ;;  %v483_v6 = vpop.f32.mrb[13].mxu1  ;;  %v711_v8 = vrot.slane %v709_v4, 4  ;;  %v622_v11 = vrot.slane %v614_v45, 1  ;;  %v708_v14 = vld [vmem:[#allocation2 + $0x10] sm:$0xf] }
 0x223   :  { %v762_v7 = vmax.bf16 %v760_v61, %v757_v0  ;;  %v7637_v9 = vpop.f32.mrb[14].mxu1  ;;  %526 = vst [vmem:[#allocation2 + $0x20] sm:$0xff] %v518_v5  ;;  %v563_v16 = vrot.slane %v8373_v59, 7  ;;  %v8381_v17 = vshll.u32 %v557_v60, 16  ;;  %v8393_v23 = vshll.u32 %v615_v62, 16 }
 0x224   :  { %v664_v12 = vmax.bf16 %v663_v1, %v8351_v2  ;;  %v666_v13 = vshrl.u32 %v663_v1, 16  ;;  %v486_v15 = vpop.f32.mrb[15].mxu1  ;;  %v713_v21 = vmax.bf16 %v711_v8, %v708_v14  ;;  %v8391_v22 = vmax.bf16 %v622_v11, %v8377_v63  ;;  %v714_v26 = vld [vmem:[#allocation2 + $0x18] sm:$0xf] }
 0x225   :  { %v763_v20 = vmax.bf16 %v762_v7, %v8362_v18  ;;  %v671_v25 = vrot.slane %v663_v1, 1  ;;  %v576_v32 = vsel %vm8385_vm6, 0, %v559_v10  ;;  %v565_v35 = vshll.u32 %v8373_v59, 16 }
 0x226   :  { %v669_v24 = vmax.bf16 %v666_v13, %v663_v1  ;;  %v8396_v30 = vshll.u32 %v664_v12, 16  ;;  %v8403_v34 = vmax.bf16 %v714_v26, %v713_v21  ;;  %v571_v36 = vrot.slane %v8381_v17, 1 }
 0x227   :  { %v764_v27 = vmax.bf16 %v763_v20, %v8351_v2  ;;  %v766_v29 = vshrl.u32 %v763_v20, 16  ;;  %v580_v37 = vsel %vm10337_vm0, %v576_v32, %v563_v16  ;;  %v631_v39 = vrot.slane %v8391_v22, 7 }
 0x228   :  { %v8401_v33 = vmax.bf16 %v671_v25, %v669_v24  ;;  %v674_v38 = vmax.bf16 %v669_v24, %v8370_v44  ;;  %v641_v40 = vsel %vm8385_vm6, 0, %v8393_v23  ;;  %v771_v43 = vrot.slane %v763_v20, 1  ;;  %v862_v5 = vld [vmem:[#allocation2 + $0x28] sm:$0xf]  ;;  %v906_v24 = vld [vmem:[#allocation2 + $0x28] sm:$0xf0] }
 0x229   :  { %v8413_v41 = vmax.bf16 %v766_v29, %v763_v20  ;;  %v8415_v42 = vshll.u32 %v764_v27, 16  ;;  %v690_v45 = vsel %vm8385_vm6, 0, %v8396_v30  ;;  %v512_v47 = vmax.f32 %v492_v31, 0.0 }
 0x22a   :  { %v810_v46 = vld [vmem:[#allocation2 + $0x20] sm:$0xf]  ;;  %v484_v48 = vadd.f32 %v8342_v50, %v483_v6  ;;  %v680_v49 = vrot.slane %v8401_v33, 7  ;;  %v682_v51 = vshll.u32 %v8401_v33, 16  ;;  %v716_v52 = vmax.bf16 %v8403_v34, %v8351_v2  ;;  %v857_v54 = vld [vmem:[#allocation2 + $0x20] sm:$0xf0] }
 0x22b   :  { %v718_v53 = vshrl.u32 %v8403_v34, 16  ;;  %v8426_v55 = vshll.u32 %v674_v38, 16  ;;  %v723_v56 = vrot.slane %v8403_v34, 1  ;;  %v811_v58 = vmax.bf16 %v810_v46, %v8362_v18  ;;  %v856_v60 = vld [vmem:[#allocation2 + $0x20] sm:$0xf] }
 0x22c   :  { %v859_v61 = vrot.slane %v857_v54, 4  ;;  %v8437_v62 = vmax.bf16 %v771_v43, %v8413_v41  ;;  %v774_v0 = vmax.bf16 %v8413_v41, %v8370_v44  ;;  %v790_v1 = vsel %vm8385_vm6, 0, %v8415_v42 }
 0x22d   :  { %v495_v4 = vadd.f32 %v7637_v9, %v8342_v50  ;;  %v812_v6 = vmax.bf16 %v811_v58, %v8351_v2  ;;  %v814_v7 = vshrl.u32 %v811_v58, 16  ;;  %v819_v8 = vrot.slane %v811_v58, 1 }
 0x22e   :  { %v510_v10 = vmax.f32 %v484_v48, 0.0  ;;  %v861_v12 = vmax.bf16 %v859_v61, %v856_v60  ;;  %v487_v14 = vadd.f32 %v8342_v50, %v486_v15  ;;  %v585_v16 = vsel %vm8431_vm9, %v580_v37, %v565_v35 }
 0x22f   :  { %v513_v13 = vmax.f32 %v495_v4, 0.0  ;;  %v688_v9 = vrot.slane %v8426_v55, 1  ;;  %v8457_v17 = vmax.bf16 %v718_v53, %v8403_v34  ;;  %v817_v20 = vmax.bf16 %v814_v7, %v811_v58 }
 0x230   :  { %v588_v21 = vsel %vm582_vm2, %v585_v16, %v8373_v59  ;;  %v863_v25 = vmax.bf16 %v862_v5, %v861_v12  ;;  %v511_v27 = vmax.f32 %v487_v14, 0.0  ;;  %v10373_v50 = vmov 0 }
 0x231   :  { %v521_v26 = vpack.c.bf16 %v513_v13, %v512_v47  ;;  %v593_v29 = vsel %vm8448_vm10, %v588_v21, %v571_v36  ;;  %v10374_v50 = vsel %vm8465_vm11, 4294967295, %v10373_v50  ;;  %v8469_v15 = vmax.bf16 %v819_v8, %v817_v20 }
 0x232   :  { %10375 = vst [vmem:[#allocation19_spill] sm:$0xff] %v10374_v50  ;;  %v824_v30 = vshll.u32 %v812_v6, 16  ;;  %v597_v31 = vsel %vm590_vm4, %v593_v29, 0  ;;  %v625_v59 = vmax.bf16 %v8377_v63, %v8370_v44  ;;  %v822_v32 = vmax.bf16 %v817_v20, %v8370_v44 }
 0x233   :  { %v864_v34 = vmax.bf16 %v863_v25, %v8351_v2  ;;  %v866_v35 = vshrl.u32 %v863_v25, 16  ;;  %529 = vst [vmem:[#allocation2 + $0x38] sm:$0xff] %v521_v26  ;;  %v520_v36 = vpack.c.bf16 %v511_v27, %v510_v10  ;;  %v693_v37 = vsel %vm10337_vm0, %v690_v45, %v680_v49 }
 0x234   :  { %v728_v38 = vshll.u32 %v716_v52, 16  ;;  %v908_v43 = vrot.slane %v906_v24, 4  ;;  %v602_v46 = vsel %vm8465_vm11, %v597_v31, 0  ;;  %v828_v47 = vrot.slane %v8469_v15, 7  ;;  %v905_v52 = vld [vmem:[#allocation2 + $0x28] sm:$0xf] }
 0x235   :  { %v869_v48 = vmax.bf16 %v866_v35, %v863_v25  ;;  %528 = vst [vmem:[#allocation2 + $0x30] sm:$0xff] %v520_v36  ;;  %v604_v53 = vrot.slane %v602_v46, 4  ;;  %v633_v63 = vshll.u32 %v8391_v22, 16  ;;  %v838_v54 = vsel %vm8385_vm6, 0, %v824_v30 }
 0x236   :  { %v871_v55 = vrot.slane %v863_v25, 1  ;;  %v637_v58 = vshll.u32 %v625_v59, 16  ;;  %v644_v45 = vsel %vm10337_vm0, %v641_v40, %v631_v39  ;;  %v8491_v49 = vmax.bf16 %v723_v56, %v8457_v17 }
 0x237   :  { %v830_v60 = vshll.u32 %v8469_v15, 16  ;;  %v8494_v61 = vshll.u32 %v822_v32, 16  ;;  %v876_v4 = vshll.u32 %v864_v34, 16  ;;  %606 = vst [vmem:[#allocation3] sm:$0xf0] %v604_v53  ;;  %v646_v7 = vsel %vm8431_vm9, %v644_v45, %v633_v63 }
 0x238   :  { %v8496_v5 = vmax.bf16 %v871_v55, %v869_v48  ;;  %v639_v6 = vrot.slane %v637_v58, 1  ;;  %v695_v23 = vsel %vm8431_vm9, %v693_v37, %v682_v51  ;;  %v780_v39 = vrot.slane %v8437_v62, 7 }
 0x239   :  { %v742_v40 = vsel %vm8385_vm6, 0, %v728_v38  ;;  %v841_v56 = vsel %vm10337_vm0, %v838_v54, %v828_v47  ;;  %v648_v8 = vsel %vm582_vm2, %v646_v7, %v8391_v22  ;;  %v910_v10 = vmax.bf16 %v908_v43, %v905_v52 }
 0x23a   :  { %v874_v12 = vmax.bf16 %v869_v48, %v8370_v44  ;;  %v1006_v13 = vld [vmem:[#allocation2 + $0x38] sm:$0xf]  ;;  %v1007_v14 = vld [vmem:[#allocation2 + $0x38] sm:$0xf0]  ;;  %v650_v16 = vsel %vm8448_vm10, %v648_v8, %v639_v6  ;;  %v697_v51 = vsel %vm582_vm2, %v695_v23, %v8401_v33  ;;  %v732_v20 = vrot.slane %v8491_v49, 7 }
 0x23b   :  { %v836_v21 = vrot.slane %v8494_v61, 1  ;;  %v1009_v24 = vrot.slane %v1007_v14, 4  ;;  %v652_v25 = vsel %vm590_vm4, %v650_v16, 0  ;;  %v843_v22 = vsel %vm8431_vm9, %v841_v56, %v830_v60  ;;  %v963_v46 = vld [vmem:[#allocation2 + $0x38] sm:$0xf] }
 0x23c   :  { %v880_v26 = vrot.slane %v8496_v5, 7  ;;  %v890_v27 = vsel %vm8385_vm6, 0, %v876_v4  ;;  %v911_v29 = vld [vmem:[#allocation2 + $0x30] sm:$0xf]  ;;  %v958_v30 = vld [vmem:[#allocation2 + $0x30] sm:$0xf0]  ;;  %v699_v33 = vsel %vm8448_vm10, %v697_v51, %v688_v9  ;;  %v726_v43 = vmax.bf16 %v8457_v17, %v8370_v44 }
 0x23d   :  { %v1011_v31 = vmax.bf16 %v1009_v24, %v1006_v13  ;;  %v912_v59 = vmax.bf16 %v911_v29, %v910_v10  ;;  %v957_v32 = vld [vmem:[#allocation2 + $0x30] sm:$0xf]  ;;  %v960_v34 = vrot.slane %v958_v30, 4  ;;  %v654_v35 = vsel %vm8465_vm11, %v652_v25, 0 }
 0x23e   :  { %v882_v36 = vshll.u32 %v8496_v5, 16  ;;  %v8528_v37 = vshll.u32 %v874_v12, 16  ;;  %655 = vst [vmem:[#allocation3 + $0x8] sm:$0xf] %v654_v35  ;;  %v701_v38 = vsel %vm590_vm4, %v699_v33, 0  ;;  %v745_v48 = vsel %vm10337_vm0, %v742_v40, %v732_v20  ;;  %v8545_v60 = vld [vmem:[#allocation3] sm:$0xff] }
 0x23f   :  { %v1012_v9 = vmax.bf16 %v1011_v31, %v8362_v18  ;;  %v915_v47 = vshrl.u32 %v912_v59, 16  ;;  %v793_v53 = vsel %vm10337_vm0, %v790_v1, %v780_v39  ;;  %v893_v63 = vsel %vm10337_vm0, %v890_v27, %v880_v26 }
 0x240   :  { %v913_v54 = vmax.bf16 %v912_v59, %v8351_v2  ;;  %v962_v55 = vmax.bf16 %v960_v34, %v957_v32  ;;  %v703_v17 = vsel %vm8465_vm11, %v701_v38, 0  ;;  %v920_v52 = vrot.slane %v912_v59, 1 }
 0x241   :  { %v1013_v58 = vmax.bf16 %v1012_v9, %v8351_v2  ;;  %v1015_v18 = vshrl.u32 %v1012_v9, 16  ;;  %v918_v45 = vmax.bf16 %v915_v47, %v912_v59  ;;  %v888_v4 = vrot.slane %v8528_v37, 1 }
 0x242   :  { %v1020_v42 = vrot.slane %v1012_v9, 1  ;;  %v964_v6 = vmax.bf16 %v963_v46, %v962_v55  ;;  %v705_v1 = vrot.slane %v703_v17, 4  ;;  %v845_v40 = vsel %vm582_vm2, %v843_v22, %v8469_v15 }
 0x243   :  { %v1018_v7 = vmax.bf16 %v1015_v18, %v1012_v9  ;;  %v8548_v23 = vmax.bf16 %v920_v52, %v918_v45  ;;  %v923_v39 = vmax.bf16 %v918_v45, %v8370_v44  ;;  %v925_v56 = vshll.u32 %v913_v54, 16 }
 0x244   :  { %v967_v8 = vshrl.u32 %v964_v6, 16  ;;  %707 = vst [vmem:[#allocation3 + $0x8] sm:$0xf0] %v705_v1  ;;  %v1462_v10 = vshll.u32 %v8545_v60, 16  ;;  %v895_v12 = vsel %vm8431_vm9, %v893_v63, %v882_v36  ;;  %v1025_v13 = vshll.u32 %v1013_v58, 16 }
 0x245   :  { %v929_v14 = vrot.slane %v8548_v23, 7  ;;  %v965_v16 = vmax.bf16 %v964_v6, %v8351_v2  ;;  %v738_v51 = vshll.u32 %v726_v43, 16  ;;  %v8558_v20 = vmax.bf16 %v1020_v42, %v1018_v7 }
 0x246   :  { %v1023_v24 = vmax.bf16 %v1018_v7, %v8370_v44  ;;  %v970_v15 = vmax.bf16 %v967_v8, %v964_v6  ;;  %v972_v25 = vrot.slane %v964_v6, 1  ;;  %v935_v22 = vshll.u32 %v923_v39, 16 }
 0x247   :  { %v1460_v26 = vshrl.u32 %v8545_v60, 16  ;;  %v734_v27 = vshll.u32 %v8491_v49, 16  ;;  %v782_v29 = vshll.u32 %v8437_v62, 16  ;;  %v931_v30 = vshll.u32 %v8548_v23, 16 }
 0x248   :  { %v939_v2 = vsel %vm8385_vm6, 0, %v925_v56  ;;  %v974_v33 = vmax.bf16 %v972_v25, %v970_v15  ;;  %v1464_v31 = vrot.slane %v1462_v10, 1  ;;  %v1039_v59 = vsel %vm8385_vm6, 0, %v1025_v13 }
 0x249   :  { %v942_v32 = vsel %vm10337_vm0, %v939_v2, %v929_v14  ;;  %v975_v34 = vmax.bf16 %v970_v15, %v8370_v44  ;;  %v977_v35 = vshll.u32 %v965_v16, 16  ;;  %v1029_v36 = vrot.slane %v8558_v20, 7  ;;  %v8607_v16 = vld [vmem:[#allocation3] sm:$0xf0] }
 0x24a   :  { %v1031_v38 = vshll.u32 %v8558_v20, 16  ;;  %v1035_v43 = vshll.u32 %v1023_v24, 16  ;;  %v740_v46 = vrot.slane %v738_v51, 1  ;;  %v937_v9 = vrot.slane %v935_v22, 1 }
 0x24b   :  { %v8573_v47 = vld [vmem:[#allocation3 + $0x8] sm:$0xff]  ;;  %v747_v63 = vsel %vm8431_vm9, %v745_v48, %v734_v27  ;;  %v786_v54 = vshll.u32 %v774_v0, 16  ;;  %v795_v55 = vsel %vm8431_vm9, %v793_v53, %v782_v29  ;;  %v944_v17 = vsel %vm8431_vm9, %v942_v32, %v931_v30 }
 0x24c   :  { %v981_v58 = vrot.slane %v974_v33, 7  ;;  %v1467_v18 = vshll.u32 %v8573_v47, 16  ;;  %v749_v45 = vsel %vm582_vm2, %v747_v63, %v8491_v49  ;;  %v987_v52 = vshll.u32 %v975_v34, 16 }
 0x24d   :  { %v751_v48 = vsel %vm8448_vm10, %v749_v45, %v740_v46  ;;  %v788_v42 = vrot.slane %v786_v54, 1  ;;  %v797_v44 = vsel %vm582_vm2, %v795_v55, %v8437_v62  ;;  %v991_v41 = vsel %vm8385_vm6, 0, %v977_v35 }
 0x24e   :  { %v1465_v0 = vor.u32 %v1464_v31, %v1460_v26  ;;  %v1469_v53 = vrot.slane %v1467_v18, 1  ;;  %v753_v6 = vsel %vm590_vm4, %v751_v48, 0  ;;  %v983_v1 = vshll.u32 %v974_v33, 16 }
 0x24f   :  { %v755_v7 = vsel %vm8465_vm11, %v753_v6, 0  ;;  %v799_v49 = vsel %vm8448_vm10, %v797_v44, %v788_v42  ;;  %v847_v39 = vsel %vm8448_vm10, %v845_v40, %v836_v21  ;;  %v1037_v62 = vrot.slane %v1035_v43, 1 }
 0x250   :  { %v994_v56 = vsel %vm10337_vm0, %v991_v41, %v981_v58  ;;  %v1470_v8 = vsel %vm10343_vm12, %v1465_v0, %v1469_v53  ;;  %756 = vst [vmem:[#allocation3 + $0x10] sm:$0xf] %v755_v7  ;;  %v801_v10 = vsel %vm590_vm4, %v799_v49, 0  ;;  %v989_v13 = vrot.slane %v987_v52, 1 }
 0x251   :  { %2023 = vmatprep.mubr.bf16.mxu1 %v1470_v8  ;;  %v803_v14 = vsel %vm8465_vm11, %v801_v10, 0  ;;  %v849_v61 = vsel %vm590_vm4, %v847_v39, 0  ;;  %v897_v21 = vsel %vm582_vm2, %v895_v12, %v8496_v5  ;;  %v1042_v40 = vsel %vm10337_vm0, %v1039_v59, %v1029_v36 }
 0x252   :  { %2024 = vmatmul.mubr.bf16.vlgmr.msra.gmra.mrb[16].mxu1 %v8545_v60  ;;  %v805_v51 = vrot.slane %v803_v14, 4  ;;  %v851_v24 = vsel %vm8465_vm11, %v849_v61, 0  ;;  %v899_v15 = vsel %vm8448_vm10, %v897_v21, %v888_v4  ;;  %v946_v26 = vsel %vm582_vm2, %v944_v17, %v8548_v23 }
 0x253   :  { %v853_v25 = vrot.slane %v851_v24, 4  ;;  %v901_v22 = vsel %vm590_vm4, %v899_v15, 0  ;;  %v996_v5 = vsel %vm8431_vm9, %v994_v56, %v983_v1  ;;  %v1565_v60 = vshll.u32 %v8607_v16, 16 }
 0x254   :  { %807 = vst [vmem:[#allocation3 + $0x10] sm:$0xf0] %v805_v51  ;;  %v903_v12 = vsel %vm8465_vm11, %v901_v22, 0  ;;  %v948_v37 = vsel %vm8448_vm10, %v946_v26, %v937_v9  ;;  %v998_v4 = vsel %vm582_vm2, %v996_v5, %v974_v33  ;;  %v1044_v29 = vsel %vm8431_vm9, %v1042_v40, %v1031_v38  ;;  %v1561_v5 = vld [vmem:[#allocation3 + $0x38] sm:$0xf] }
 0x255   :  { %855 = vst [vmem:[#allocation3 + $0x20] sm:$0xf0] %v853_v25  ;;  %904 = vst [vmem:[#allocation3 + $0x28] sm:$0xf] %v903_v12  ;;  %v950_v27 = vsel %vm590_vm4, %v948_v37, 0  ;;  %v1000_v23 = vsel %vm8448_vm10, %v998_v4, %v989_v13  ;;  %v1046_v31 = vsel %vm582_vm2, %v1044_v29, %v8558_v20  ;;  %v1567_v34 = vrot.slane %v1565_v60, 1 }
 0x256   :  { %v952_v30 = vsel %vm8465_vm11, %v950_v27, 0  ;;  %v1002_v2 = vsel %vm590_vm4, %v1000_v23, 0  ;;  %v1048_v32 = vsel %vm8448_vm10, %v1046_v31, %v1037_v62  ;;  %v1471_v36 = vshrl.u32 %v8573_v47, 16 }
 0x257   :  { %v954_v59 = vrot.slane %v952_v30, 4  ;;  %v1004_v33 = vsel %vm8465_vm11, %v1002_v2, 0  ;;  %v1050_v57 = vsel %vm590_vm4, %v1048_v32, 0  ;;  %v1563_v38 = vshrl.u32 %v8607_v16, 16 }
 0x258   :  { %1005 = vst [vmem:[#allocation3 + $0x30] sm:$0xf] %v1004_v33  ;;  %v1052_v35 = vsel %vm8465_vm11, %v1050_v57, 0  ;;  %v1473_v46 = vor.u32 %v1471_v36, %v1469_v53  ;;  %v1588_v11 = vrot.slane %v8052_v28, 1  ;;  %v1667_v52 = vrot.slane %v8573_v47, 4 }
 0x259   :  { %956 = vst [vmem:[#allocation3 + $0x28] sm:$0xf0] %v954_v59  ;;  %v1054_v20 = vrot.slane %v1052_v35, 4  ;;  %v1568_v63 = vor.u32 %v1567_v34, %v1563_v38  ;;  %v1666_v41 = vrot.slane %v8607_v16, 4  ;;  %v8672_v24 = vrot.slane %v8052_v28, 4 }
 0x25a   :  { %v1618_v4 = vshll.u32 %v1561_v5, 16  ;;  %v1622_v34 = vshrl.u32 %v1561_v5, 16  ;;  %v7774_v5 = vld [vmem:[%s10330_s4 + $0xf8] sm:$0xff]   ;;  %vm2238_vm4 = vcmask 1047556   ;;  %vm10407_vm6 = vsmask.f32 4352 }
 0x25b   :  { %v1452_v43 = vld [vmem:[#allocation3 + $0x10] sm:$0xff]  ;;  %1056 = vst [vmem:[#allocation3 + $0x30] sm:$0xf0] %v1054_v20  ;;  %v1573_v17 = vsel %vm10343_vm12, %v1568_v63, %v1469_v53  ;;  %v1668_v49 = vsel %vm599_vm7, %v1666_v41, %v1667_v52  ;;  %v1560_v63 = vld [vmem:[#allocation3 + $0x38] sm:$0x7] }
 0x25c   :  { %v1475_v9 = vshll.u32 %v1452_v43, 16  ;;  %v8650_v54 = vld [vmem:[#allocation3 + $0x20] sm:$0xff]  ;;  %v1582_v58 = vshrl.u32 %v1452_v43, 16  ;;  %v1669_v42 = vrot.slane %v1573_v17, 4  ;;  %v1672_v8 = vrot.slane %v1452_v43, 4  ;;  %v7756_v41 = vld [vmem:[%s10330_s4 + $0x50] sm:$0xff]  }
 0x25d   :  { %v1594_v18 = vshll.u32 %v8650_v54, 16  ;;  %v1598_v10 = vshrl.u32 %v8650_v54, 16  ;;  %v1680_v27 = vrot.slane %v8650_v54, 4  ;;  %v1620_v30 = vrot.slane %v1618_v4, 1  ;;  %v7745_v17 = vld [vmem:[%s10330_s4 + $0x80] sm:$0xff]  }
 0x25e   :  { %v1477_v55 = vrot.slane %v1475_v9, 1  ;;  %v1673_v16 = vsel %vm599_vm7, %v1667_v52, %v1672_v8  ;;  %v1677_v60 = vsel %vm599_vm7, %v1672_v8, %v8672_v24  ;;  %v7754_v52 = vld [vmem:[%s10330_s4 + $0x8] sm:$0xff]   ;;  %v7753_v8 = vld [vmem:[%s10330_s4 + $0xd8] sm:$0xff]  }
 0x25f   :  { %v1596_v6 = vrot.slane %v1594_v18, 1  ;;  %v1681_v2 = vsel %vm599_vm7, %v8672_v24, %v1680_v27  ;;  %v1624_v36 = vor.u32 %v1622_v34, %v1620_v30  ;;  %v7751_v18 = vld [vmem:[%s10330_s4] sm:$0xff]  }
 0x260   :  { %v1478_v45 = vsel %vm10343_vm12, %v1473_v46, %v1477_v55  ;;  %v1584_v48 = vor.u32 %v1582_v58, %v1477_v55  ;;  %v8661_v7 = vld [vmem:[#allocation3 + $0x28] sm:$0xff]  ;;  %v7744_v55 = vld [vmem:[%s10330_s4 + $0xc0] sm:$0xff]  }
 0x261   :  { %2031 = vmatprep.mubr.bf16.mxu1 %v1478_v45  ;;  %v1670_v44 = vrot.slane %v1478_v45, 4  ;;  %v1597_v62 = vsel %vm10343_vm12, %v1588_v11, %v1596_v6  ;;  %v1602_v56 = vshll.u32 %v8661_v7, 16  ;;  %v1600_v61 = vor.u32 %v1598_v10, %v1596_v6  ;;  %6932 = vmatprep.subr.bf16.mxu0 %v7744_v55  ;;  %v7750_v58 = vld [vmem:[%s10330_s4 + $0x40] sm:$0xff]   ;;  %v7752_v45 = vld [vmem:[%s10330_s4 + $0x48] sm:$0xff]  }
 0x262   :  { %v1589_v0 = vsel %vm10343_vm12, %v1584_v48, %v1588_v11  ;;  %2032 = vmatmul.mubr.bf16.gmra.mrb[20].mxu1 %v8573_v47  ;;  %v1678_v47 = vrot.slane %v1597_v62, 4  ;;  %v1559_v14 = vld [vmem:[#allocation3 + $0x30] sm:$0xff]  ;;  %v1606_v15 = vshrl.u32 %v8661_v7, 16  ;;  %v1684_v33 = vrot.slane %v8661_v7, 4  ;;  %6990 = vmatprep.subr.bf16.mxu1 %v7750_v58  ;;  %v7746_v6 = vld [vmem:[%s10330_s4 + $0xc8] sm:$0xff]  }
 0x263   :  { %v1671_v53 = vsel %vm599_vm7, %v1669_v42, %v1670_v44  ;;  %v1674_v1 = vrot.slane %v1589_v0, 4  ;;  %2039 = vmatprep.mubr.bf16.mxu1 %v1589_v0  ;;  %v1604_v13 = vrot.slane %v1602_v56, 1  ;;  %v1610_v51 = vshll.u32 %v1559_v14, 16  ;;  %6991 = vmatpush3.bf16.msra.mxu1 %v7751_v18  ;;  %v2165_v42 = vld [vmem:[#allocation4] sm:$0x1f]  ;;  %v7757_v0 = vld [vmem:[%s10330_s4 + $0x10] sm:$0xff]  }
 0x264   :  { %1838 = vmatprep.mubr.bf16.mxu0 %v1671_v53  ;;  %v1614_v23 = vshrl.u32 %v1559_v14, 16  ;;  %v1685_v57 = vsel %vm599_vm7, %v1680_v27, %v1684_v33  ;;  %v1688_v38 = vrot.slane %v1559_v14, 4  ;;  %v1694_v20 = vrot.slane %v1624_v36, 4  ;;  %6992 = vmatprep.subr.bf16.mxu1 %v7752_v45  ;;  %v7747_v53 = vld [vmem:[%s10330_s4 + $0x88] sm:$0xff]   ;;  %v7763_v56 = vld [vmem:[%s10330_s4 + $0x20] sm:$0xff]  }
 0x265   :  { %1839 = vmatmul.mubr.bf16.vlgmr.msra.gmra.mrb[16].mxu0 %v1668_v49  ;;  %v1675_v39 = vsel %vm599_vm7, %v1670_v44, %v1674_v1  ;;  %v1679_v21 = vsel %vm599_vm7, %v1674_v1, %v1678_v47  ;;  %v1605_v40 = vsel %vm10343_vm12, %v1600_v61, %v1604_v13  ;;  %v1608_v22 = vor.u32 %v1606_v15, %v1604_v13  ;;  %v7759_v1 = vld [vmem:[%s10330_s4 + $0x58] sm:$0xff]   ;;  %v7748_v49 = vld [vmem:[%s10330_s4 + $0xd0] sm:$0xff]   ;;  %v7766_v10 = vld [vmem:[%s10330_s4 + $0x68] sm:$0xff]  }
 0x266   :  { %1846 = vmatprep.mubr.bf16.mxu0 %v1675_v39  ;;  %v1682_v25 = vrot.slane %v1605_v40, 4  ;;  %v1612_v26 = vrot.slane %v1610_v51, 1  ;;  %v1689_v46 = vsel %vm599_vm7, %v1684_v33, %v1688_v38  ;;  %6933 = vmatpush3.bf16.msra.mxu0 %v7745_v17  ;;  %v2166_v44 = vsel %vm8713_vm15, 0, %v2165_v42  ;;  %v7749_v39 = vld [vmem:[%s10330_s4 + $0x90] sm:$0xff]   ;;  %v7767_v13 = vld [vmem:[%s10330_s4 + $0x28] sm:$0xff]   ;;  %v7758_v14 = vld [vmem:[%s10330_s4 + $0xe0] sm:$0xff]  }
 0x267   :  { %6993 = vmatpush3.bf16.msra.mxu1 %v7754_v52  ;;  %2167 = vst [vmem:[#allocation4] sm:$0x1f] %v2166_v44  ;;  %6934 = vmatprep.subr.bf16.mxu0 %v7746_v6  ;;  %v7768_v61 = vld [vmem:[%s10330_s4 + $0x70] sm:$0xff]   ;;  %v7765_v51 = vld [vmem:[%s10330_s4 + $0xa8] sm:$0xff]   ;;  %v7772_v15 = vld [vmem:[%s10330_s4 + $0x78] sm:$0xff]  }
 0x268   :  { %v1683_v12 = vsel %vm599_vm7, %v1678_v47, %v1682_v25  ;;  %v1613_v37 = vsel %vm10343_vm12, %v1608_v22, %v1612_v26  ;;  %6994 = vmatprep.subr.bf16.mxu1 %v7756_v41  ;;  %v7755_v47 = vld [vmem:[%s10330_s4 + $0x98] sm:$0xff]   ;;  %v7770_v22 = vld [vmem:[%s10330_s4 + $0xf0] sm:$0xff]   ;;  %v7826_v48 = vld [vmem:[%s10331_s5 + $0xc8] sm:$0xff]  }
 0x269   :  { %v1686_v29 = vrot.slane %v1613_v37, 4 }
 0x26a   :  { %2040 = vmatmul.mubr.bf16.gmra.mrb[24].mxu1 %v1452_v43  ;;  %v1456_v43 = vld [vmem:[#allocation3 + $0x30] sm:$0x7f]  ;;  %6935 = vmatpush3.bf16.msra.mxu0 %v7747_v53 }
 0x26b   :  { %2047 = vmatprep.mubr.bf16.mxu1 %v1597_v62  ;;  %v1687_v31 = vsel %vm599_vm7, %v1682_v25, %v1686_v29  ;;  %6995 = vmatpush3.bf16.msra.mxu1 %v7757_v0  ;;  %v7762_v62 = vld [vmem:[%s10330_s4 + $0x60] sm:$0xff]   ;;  %v7773_v25 = vld [vmem:[%s10330_s4 + $0x38] sm:$0xff]  }
 0x26c   :  { %6996 = vmatprep.subr.bf16.mxu1 %v7759_v1  ;;  %6936 = vmatprep.subr.bf16.mxu0 %v7748_v49  ;;  %v1060_v1 = vadd.s32 16, %v8353_v3  ;;  %v1061_v49 = vadd.s32 24, %v8353_v3 }
 0x26d   :  { %1847 = vmatmul.mubr.bf16.gmra.mrb[20].mxu0 %v1673_v16  ;;  %v7760_v16 = vld [vmem:[%s10330_s4 + $0xa0] sm:$0xff]  }
 0x26e   :  { %1854 = vmatprep.mubr.bf16.mxu0 %v1679_v21  ;;  %6937 = vmatpush3.bf16.msra.mxu0 %v7749_v39  ;;  %v7769_v21 = vld [vmem:[%s10330_s4 + $0x30] sm:$0xff]  }
 0x26f   :  { %6938 = vmatprep.subr.bf16.mxu0 %v7753_v8 }
 0x272   :  { %2048 = vmatmul.mubr.bf16.gmra.mrb[28].mxu1 %v8052_v28  ;;  %v1616_v28 = vor.u32 %v1614_v23, %v1612_v26  ;;  %6939 = vmatpush3.bf16.msra.mxu0 %v7755_v47  ;;  %v7771_v26 = vld [vmem:[%s10330_s4 + $0xb0] sm:$0xff]  }
 0x273   :  { %2055 = vmatprep.mubr.bf16.mxu1 %v1605_v40  ;;  %6940 = vmatprep.subr.bf16.mxu0 %v7758_v14  ;;  %v7764_v40 = vld [vmem:[%s10330_s4 + $0xe8] sm:$0xff]  }
 0x274   :  { %v1621_v59 = vsel %vm10343_vm12, %v1616_v28, %v1620_v30 }
 0x275   :  { %1855 = vmatmul.mubr.bf16.gmra.mrb[24].mxu0 %v1677_v60  ;;  %v1690_v32 = vrot.slane %v1621_v59, 4  ;;  %v7775_v60 = vld [vmem:[%s10330_s4 + $0xb8] sm:$0xff]  }
 0x276   :  { %1862 = vmatprep.mubr.bf16.mxu0 %v1683_v12  ;;  %6941 = vmatpush3.bf16.msra.mxu0 %v7760_v16  ;;  %v7782_v12 = vld [vmem:[%s10330_s4 + $0x1c0] sm:$0xff]  }
 0x277   :  { %v1691_v35 = vsel %vm599_vm7, %v1686_v29, %v1690_v32  ;;  %v1695_v9 = vsel %vm599_vm7, %v1690_v32, %v1694_v20  ;;  %6942 = vmatprep.subr.bf16.mxu0 %v7764_v40  ;;  %v1097_v40 = vand.u32 7, %v1061_v49 }
 0x279   :  { %vm8834_vm10 = vcmp.lt.s32.totalorder %v1097_v40, 6 }
 0x27a   :  { %2056 = vmatmul.mubr.bf16.gmra.mrb[32].mxu1 %v8650_v54  ;;  %v1692_v54 = vrot.slane %v1560_v63, 4  ;;  %6943 = vmatpush3.bf16.msra.mxu0 %v7765_v51 }
 0x27b   :  { %2063 = vmatprep.mubr.bf16.mxu1 %v1613_v37  ;;  %6944 = vmatprep.subr.bf16.mxu0 %v7770_v22  ;;  %v7776_v37 = vld [vmem:[%s10330_s4 + $0x140] sm:$0xff]   ;;  %v1062_v22 = vadd.s32 32, %v8353_v3 }
 0x27c   :  { %v1693_v11 = vsel %vm599_vm7, %v1688_v38, %v1692_v54  ;;  %vm2239_vm7 = vsmask.f32 7954 }
 0x27d   :  { %1863 = vmatmul.mubr.bf16.gmra.mrb[28].mxu0 %v1681_v2  ;;  %vm8839_vm0 = vmand %vm2238_vm4, %vm2239_vm7 }
 0x27e   :  { %1870 = vmatprep.mubr.bf16.mxu0 %v1687_v31  ;;  %6945 = vmatpush3.bf16.msra.mxu0 %v7771_v26 }
 0x27f   :  { %6946 = vmatprep.subr.bf16.mxu0 %v7774_v5 }
 0x282   :  { %2064 = vmatmul.mubr.bf16.gmra.mrb[36].mxu1 %v8661_v7  ;;  %v7761_v7 = vld [vmem:[%s10330_s4 + $0x18] sm:$0xff]   ;;  %6947 = vmatpush3.bf16.msra.mxu0 %v7775_v60 }
 0x283   :  { %2071 = vmatprep.mubr.bf16.mxu1 %v1616_v28  ;;  %6997 = vmatpush3.bf16.msra.mxu1 %v7761_v7 }
 0x284   :  { %6998 = vmatprep.subr.bf16.mxu1 %v7762_v62  ;;  %7048 = vmatprep.subr.bf16.mxu0 %v7776_v37 }
 0x285   :  { %1871 = vmatmul.mubr.bf16.gmra.mrb[32].mxu0 %v1685_v57 }
 0x286   :  { %1878 = vmatprep.mubr.bf16.mxu0 %v1691_v35  ;;  %v1059_v35 = vadd.s32 8, %v8353_v3 }
 0x287   :  { %6999 = vmatpush3.bf16.msra.mxu1 %v7763_v56 }
 0x288   :  { %7000 = vmatprep.subr.bf16.mxu1 %v7766_v10 }
 0x28a   :  { %2072 = vmatmul.mubr.bf16.gmra.mrb[40].mxu1 %v1456_v43  ;;  %v8807_v43 = vld [vmem:[%s10335_s9 + $0x2] ss:$0 sm:$0xff] }
 0x28b   :  { %7001 = vmatpush3.bf16.msra.mxu1 %v7767_v13 }
 0x28c   :  { %7002 = vmatprep.subr.bf16.mxu1 %v7768_v61 }
 0x28d   :  { %1879 = vmatmul.mubr.bf16.gmra.mrb[36].mxu0 %v1689_v46 }
 0x28e   :  { %1886 = vmatprep.mubr.bf16.mxu0 %v1695_v9  ;;  %v1076_v9 = vand.u32 7, %v8353_v3 }
 0x28f   :  { %7003 = vmatpush3.bf16.msra.mxu1 %v7769_v21  ;;  %v1090_v21 = vand.u32 7, %v1060_v1 }
 0x290   :  { %7004 = vmatprep.subr.bf16.mxu1 %v7772_v15  ;;  %vm8811_vm1 = vcmp.lt.s32.totalorder %v1076_v9, 6 }
 0x291   :  { %vm8830_vm9 = vcmp.lt.s32.totalorder %v1090_v21, 6  ;;  %v1067_v21 = vadd.s32 72, %v8353_v3 }
 0x293   :  { %7005 = vmatpush3.bf16.msra.mxu1 %v7773_v25 }
 0x294   :  { %7106 = vmatprep.subr.bf16.mxu1 %v7782_v12  ;;  %v1063_v12 = vadd.s32 40, %v8353_v3 }
 0x295   :  { %1887 = vmatmul.mubr.bf16.gmra.mrb[40].mxu0 %v1693_v11  ;;  %v1083_v11 = vand.u32 7, %v1059_v35 }
 0x297   :  { %vm8816_vm2 = vcmp.lt.s32.totalorder %v1083_v11, 6 }
 0x325   :  { %v6890_v4 = vpop.f32.mrb[16].mxu1 }
 0x326   :  { %v6891_v27 = vpop.f32.mrb[17].mxu1 }
 0x327   :  { %v6892_v23 = vadd.f32 %v6891_v27, %v6890_v4  ;;  %v6893_v29 = vpop.f32.mrb[18].mxu1 }
 0x328   :  { %v6894_v28 = vpop.f32.mrb[19].mxu1 }
 0x329   :  { %v6895_v30 = vadd.f32 %v6894_v28, %v6893_v29 }
 0x335   :  { %v6896_v2 = vpop.f32.mrb[20].mxu1 }
 0x336   :  { %v6897_v31 = vpop.f32.mrb[21].mxu1 }
 0x337   :  { %v6898_v59 = vadd.f32 %v6897_v31, %v6896_v2  ;;  %v6899_v33 = vpop.f32.mrb[22].mxu1 }
 0x338   :  { %v6832_v32 = vpop.f32.mrb[16].mxu0  ;;  %v6900_v34 = vpop.f32.mrb[23].mxu1 }
 0x339   :  { %v6833_v57 = vpop.f32.mrb[17].mxu0  ;;  %v6901_v36 = vadd.f32 %v6900_v34, %v6899_v33 }
 0x33a   :  { %v6834_v38 = vadd.f32 %v6833_v57, %v6832_v32  ;;  %v6835_v20 = vpop.f32.mrb[18].mxu0  ;;  %v2241_v32 = vld [vmem:[#allocation4] sm:$0xf0]  ;;  %v1104_v57 = vand.u32 7, %v1062_v22 }
 0x33b   :  { %v6836_v46 = vpop.f32.mrb[19].mxu0 }
 0x33c   :  { %v2026_v63 = vadd.f32 %v6892_v23, %v6834_v38  ;;  %v6837_v54 = vadd.f32 %v6836_v46, %v6835_v20  ;;  %v1111_v20 = vand.u32 7, %v1063_v12  ;;  %vm8849_vm4 = vcmp.lt.s32.totalorder %v1104_v57, 6 }
 0x33d   :  { %v6902_v55 = vpop.f32.mrb[24].mxu1  ;;  %v8876_v12 = vadd.s32 88, %v8353_v3  ;;  %v8887_v57 = vadd.s32 96, %v8353_v3 }
 0x33e   :  { %v2085_v17 = vadd.f32 %v8807_v43, %v2026_v63  ;;  %v2029_v58 = vadd.f32 %v6895_v30, %v6837_v54  ;;  %v6903_v18 = vpop.f32.mrb[25].mxu1  ;;  %vm8854_vm7 = vcmp.lt.s32.totalorder %v1111_v20, 6 }
 0x33f   :  { %v6904_v45 = vadd.f32 %v6903_v18, %v6902_v55  ;;  %v6905_v52 = vpop.f32.mrb[26].mxu1 }
 0x340   :  { %v2099_v44 = vmax.f32 %v2085_v17, 0.0  ;;  %v2086_v41 = vadd.f32 %v8807_v43, %v2029_v58  ;;  %v6838_v0 = vpop.f32.mrb[20].mxu0  ;;  %v6906_v6 = vpop.f32.mrb[27].mxu1 }
 0x341   :  { %v6839_v7 = vpop.f32.mrb[21].mxu0  ;;  %v6907_v39 = vadd.f32 %v6906_v6, %v6905_v52 }
 0x342   :  { %v2100_v62 = vmax.f32 %v2086_v41, 0.0  ;;  %v6840_v56 = vadd.f32 %v6839_v7, %v6838_v0  ;;  %v6841_v8 = vpop.f32.mrb[22].mxu0  ;;  %v2141_v10 = vsel %vm8811_vm1, %v2099_v44, 0.0 }
 0x343   :  { %v6842_v47 = vpop.f32.mrb[23].mxu0 }
 0x344   :  { %v2142_v13 = vsel %vm8816_vm2, %v2100_v62, 0.0  ;;  %v2034_v14 = vadd.f32 %v6898_v59, %v6840_v56  ;;  %v6843_v16 = vadd.f32 %v6842_v47, %v6841_v8  ;;  %v7952_v56 = vld [vmem:[#allocation3 + $0x18] sm:$0xff] }
 0x345   :  { %v2155_v61 = vpack.c.bf16 %v2142_v13, %v2141_v10  ;;  %v6908_v51 = vpop.f32.mrb[28].mxu1  ;;  %v2197_v8 = vrot.slane %v7952_v56, 3  ;;  %v1066_v13 = vadd.s32 64, %v8353_v3 }
 0x346   :  { %v2087_v15 = vadd.f32 %v8807_v43, %v2034_v14  ;;  %v2037_v25 = vadd.f32 %v6901_v36, %v6843_v16  ;;  %v6909_v26 = vpop.f32.mrb[29].mxu1 }
 0x347   :  { %v2169_v5 = vshrl.u32 %v2155_v61, 16  ;;  %v2172_v60 = vshll.u32 %v2155_v61, 16  ;;  %v6911_v37 = vpop.f32.mrb[30].mxu1 }
 0x348   :  { %v2101_v4 = vmax.f32 %v2087_v15, 0.0  ;;  %v2088_v27 = vadd.f32 %v8807_v43, %v2037_v25  ;;  %v6844_v23 = vpop.f32.mrb[24].mxu0  ;;  %v6912_v29 = vpop.f32.mrb[31].mxu1  ;;  %v8866_v15 = vadd.s32 80, %v8353_v3 }
 0x349   :  { %v2171_v28 = vrot.slane %v2169_v5, 3  ;;  %v2174_v30 = vrot.slane %v2172_v60, 4  ;;  %v6845_v59 = vpop.f32.mrb[25].mxu0  ;;  %v8873_v60 = vor.u32 %v2197_v8, %v8672_v24  ;;  %v1139_v29 = vand.u32 7, %v1067_v21 }
 0x34a   :  { %v2102_v34 = vmax.f32 %v2088_v27, 0.0  ;;  %v6846_v35 = vadd.f32 %v6845_v59, %v6844_v23  ;;  %v6847_v36 = vpop.f32.mrb[26].mxu0  ;;  %v2143_v9 = vsel %vm8830_vm9, %v2101_v4, 0.0  ;;  %v1132_v27 = vand.u32 7, %v1066_v13 }
 0x34b   :  { %v2175_v38 = vor.u32 %v2174_v30, %v2171_v28  ;;  %v6848_v46 = vpop.f32.mrb[27].mxu0  ;;  %v1146_v24 = vand.u32 7, %v8866_v15  ;;  %vm8898_vm8 = vcmp.lt.s32.totalorder %v1139_v29, 6 }
 0x34c   :  { %v2144_v63 = vsel %vm8834_vm10, %v2102_v34, 0.0  ;;  %v2042_v54 = vadd.f32 %v6904_v45, %v6846_v35  ;;  %v6849_v11 = vadd.f32 %v6848_v46, %v6847_v36  ;;  %vm8894_vm3 = vcmp.lt.s32.totalorder %v1132_v27, 6 }
 0x34d   :  { %v2242_v55 = vsel %vm8839_vm0, %v2175_v38, %v2241_v32  ;;  %v2156_v17 = vpack.c.bf16 %v2144_v63, %v2143_v9  ;;  %v6914_v58 = vpop.f32.mrb[32].mxu1 }
 0x34e   :  { %2243 = vst [vmem:[#allocation4] sm:$0xf0] %v2242_v55  ;;  %v2089_v52 = vadd.f32 %v8807_v43, %v2042_v54  ;;  %v2045_v44 = vadd.f32 %v6907_v39, %v6849_v11  ;;  %v6915_v41 = vpop.f32.mrb[33].mxu1  ;;  %v1153_v11 = vand.u32 7, %v8876_v12  ;;  %v7780_v12 = vld [vmem:[%s10330_s4 + $0x150] sm:$0xff]  }
 0x34f   :  { %v2177_v0 = vshrl.u32 %v2156_v17, 16  ;;  %v2180_v6 = vshll.u32 %v2156_v17, 16  ;;  %v8858_v45 = vadd.f32 %v6915_v41, %v6914_v58  ;;  %v6917_v7 = vpop.f32.mrb[34].mxu1 }
 0x350   :  { %v2103_v49 = vmax.f32 %v2089_v52, 0.0  ;;  %v2090_v62 = vadd.f32 %v8807_v43, %v2045_v44  ;;  %v6850_v47 = vpop.f32.mrb[28].mxu0  ;;  %v6918_v10 = vpop.f32.mrb[35].mxu1 }
 0x351   :  { %v2179_v39 = vrot.slane %v2177_v0, 3  ;;  %v2182_v14 = vrot.slane %v2180_v6, 4  ;;  %v6851_v16 = vpop.f32.mrb[29].mxu0  ;;  %v8862_v61 = vadd.f32 %v6918_v10, %v6917_v7  ;;  %v1160_v47 = vand.u32 7, %v8887_v57  ;;  %v7871_v6 = vld [vmem:[%s10331_s5 + $0x1d8] sm:$0xff]  }
 0x352   :  { %v2104_v40 = vmax.f32 %v2090_v62, 0.0  ;;  %v6853_v51 = vpop.f32.mrb[30].mxu0  ;;  %v2145_v26 = vsel %vm8849_vm4, %v2103_v49, 0.0 }
 0x353   :  { %v2183_v25 = vor.u32 %v2182_v14, %v2179_v39  ;;  %v6854_v22 = vpop.f32.mrb[31].mxu0 }
 0x354   :  { %v2146_v5 = vsel %vm8854_vm7, %v2104_v40, 0.0  ;;  %v7783_v40 = vld [vmem:[%s10330_s4 + $0x180] sm:$0xff]  }
 0x355   :  { %v8879_v37 = vsel %vm10341_vm14, %v2175_v38, %v2183_v25  ;;  %v2157_v4 = vpack.c.bf16 %v2146_v5, %v2145_v26  ;;  %v6920_v23 = vpop.f32.mrb[36].mxu1  ;;  %v2259_v28 = vld [vmem:[#allocation4] sm:$0xff]  ;;  %v8919_v5 = vadd.s32 104, %v8353_v3 }
 0x356   :  { %v8881_v30 = vld [vmem:[#allocation4] sm:$0xf0]  ;;  %2244 = vst [vmem:[#allocation4 + $0x8] sm:$0xff] %v8879_v37  ;;  %v6921_v59 = vpop.f32.mrb[37].mxu1  ;;  %v2270_v32 = vshll.u32 %v2259_v28, 16  ;;  %v2275_v34 = vshll.u32 %v8879_v37, 16 }
 0x357   :  { %v2186_v35 = vshrl.u32 %v2157_v4, 16  ;;  %v2189_v36 = vshll.u32 %v2157_v4, 16  ;;  %v8889_v38 = vadd.f32 %v6921_v59, %v6920_v23  ;;  %v6923_v20 = vpop.f32.mrb[38].mxu1  ;;  %v2378_v46 = vrot.slane %v8881_v30, 3  ;;  %v2361_v9 = vld [vmem:[#allocation4] sm:$0xfe] }
 0x358   :  { %v6856_v63 = vpop.f32.mrb[32].mxu0  ;;  %v6924_v54 = vpop.f32.mrb[39].mxu1  ;;  %v2268_v55 = vshrl.u32 %v2259_v28, 16  ;;  %v2272_v17 = vrot.slane %v2270_v32, 1  ;;  %v2379_v58 = vrot.slane %v8879_v37, 3  ;;  %v8906_v49 = vrot.slane %v2275_v34, 1 }
 0x359   :  { %v2188_v52 = vrot.slane %v2186_v35, 3  ;;  %v2191_v44 = vrot.slane %v2189_v36, 4  ;;  %v6857_v0 = vpop.f32.mrb[33].mxu0  ;;  %v8902_v7 = vadd.f32 %v6924_v54, %v6923_v20  ;;  %v2279_v14 = vshrl.u32 %v8879_v37, 16  ;;  %v7784_v4 = vld [vmem:[%s10330_s4 + $0x1c8] sm:$0xff]  }
 0x35a   :  { %v6858_v62 = vadd.f32 %v6857_v0, %v6856_v63  ;;  %v6859_v56 = vpop.f32.mrb[34].mxu0  ;;  %v2273_v8 = vor.u32 %v2272_v17, %v2268_v55  ;;  %v2380_v10 = vsel %vm10342_vm13, %v2378_v46, %v2379_v58  ;;  %v2434_v16 = vrot.slane %v2361_v9, 1 }
 0x35b   :  { %v2192_v13 = vor.u32 %v2191_v44, %v2188_v52  ;;  %v6860_v39 = vpop.f32.mrb[35].mxu0  ;;  %v2435_v21 = vrot.slane %v8879_v37, 1  ;;  %v2437_v59 = vrot.slane %v2380_v10, 1 }
 0x35c   :  { %v2058_v51 = vadd.f32 %v8858_v45, %v6858_v62  ;;  %v6861_v22 = vadd.f32 %v6860_v39, %v6859_v56  ;;  %v2278_v26 = vsel %vm10343_vm12, %v2273_v8, %v8906_v49  ;;  %v2281_v45 = vor.u32 %v2279_v14, %v8906_v49  ;;  %v7788_v56 = vld [vmem:[%s10330_s4 + $0x1d0] sm:$0xff]  }
 0x35d   :  { %v8925_v27 = vsel %vm10341_vm14, %v2183_v25, %v2192_v13  ;;  %v8929_v23 = vsel %vm10341_vm14, %v2192_v13, %v8873_v60  ;;  %v6926_v29 = vpop.f32.mrb[40].mxu1  ;;  %2787 = vmatprep.mubr.bf16.mxu1 %v2278_v26  ;;  %v2436_v63 = vsel %vm10344_vm5, %v2434_v16, %v2435_v21  ;;  %vm8957_vm14 = vcmp.lt.s32.totalorder %v1146_v24, 6  ;;  %v7777_v26 = vld [vmem:[%s10330_s4 + $0x100] sm:$0xff]  }
 0x35e   :  { %v2093_v32 = vadd.f32 %v8807_v43, %v2058_v51  ;;  %v2061_v35 = vadd.f32 %v8862_v61, %v6861_v22  ;;  %v6927_v36 = vpop.f32.mrb[41].mxu1  ;;  %2788 = vmatmul.mubr.bf16.vlgmr.msra.gmra.mrb[44].mxu1 %v2259_v28  ;;  %v2283_v25 = vshll.u32 %v8925_v27, 16  ;;  %v2381_v20 = vrot.slane %v8925_v27, 3  ;;  %v7786_v61 = vld [vmem:[%s10330_s4 + $0x188] sm:$0xff]  }
 0x35f   :  { %v8938_v46 = vadd.f32 %v6927_v36, %v6926_v29  ;;  %v6929_v9 = vpop.f32.mrb[42].mxu1  ;;  %v10352_v54 = vshll.u32 %v8929_v23, 16  ;;  %v2383_v55 = vrot.slane %v8929_v23, 3  ;;  %7107 = vmatpush3.bf16.msra.mxu1 %v7783_v40  ;;  %v10396_v8 = vmov 0 }
 0x360   :  { %v2107_v28 = vmax.f32 %v2093_v32, 0.0  ;;  %v2094_v17 = vadd.f32 %v8807_v43, %v2061_v35  ;;  %v6862_v52 = vpop.f32.mrb[36].mxu0  ;;  %v6930_v44 = vpop.f32.mrb[43].mxu1  ;;  %v2285_v0 = vrot.slane %v2283_v25, 1  ;;  %v2382_v62 = vsel %vm10342_vm13, %v2379_v58, %v2381_v20  ;;  %7108 = vmatprep.subr.bf16.mxu1 %v7784_v4 }
 0x361   :  { %v10397_v8 = vsel %vm8957_vm14, 4294967295, %v10396_v8  ;;  %v6863_v10 = vpop.f32.mrb[37].mxu0  ;;  %v8961_v13 = vadd.f32 %v6930_v44, %v6929_v9  ;;  %v2438_v39 = vrot.slane %v2382_v62, 1  ;;  %v2287_v16 = vshrl.u32 %v8925_v27, 16  ;;  %v7791_v62 = vld [vmem:[%s10330_s4 + $0x1d8] sm:$0xff]  }
 0x362   :  { %v8967_v58 = vsel %vm10342_vm13, %v2381_v20, %v2383_v55  ;;  %v2108_v40 = vmax.f32 %v2094_v17, 0.0  ;;  %v6864_v51 = vadd.f32 %v6863_v10, %v6862_v52  ;;  %v6865_v22 = vpop.f32.mrb[38].mxu0  ;;  %v8970_v15 = vsel %vm10343_vm12, %v2281_v45, %v2285_v0  ;;  %v7789_v52 = vld [vmem:[%s10330_s4 + $0x190] sm:$0xff]  }
 0x363   :  { %v2293_v24 = vrot.slane %v10352_v54, 1  ;;  %v6866_v4 = vpop.f32.mrb[39].mxu0  ;;  %2795 = vmatprep.mubr.bf16.mxu1 %v8970_v15  ;;  %v2439_v29 = vsel %vm10344_vm5, %v2437_v59, %v2438_v39  ;;  %v2289_v32 = vor.u32 %v2287_v16, %v2285_v0  ;;  %v2442_v35 = vrot.slane %v8967_v58, 1  ;;  %7109 = vmatpush3.bf16.msra.mxu1 %v7786_v61  ;;  %v7778_v59 = vld [vmem:[%s10330_s4 + $0x148] sm:$0xff]   ;;  %v8996_v61 = vld [vmem:[#allocation4] sm:$0xe0] }
 0x364   :  { %v8983_v45 = vrot.slane %v8925_v27, 1  ;;  %v2149_v36 = vsel %vm8894_vm3, %v2107_v28, 0.0  ;;  %v2150_v20 = vsel %vm8898_vm8, %v2108_v40, 0.0  ;;  %v2066_v9 = vadd.f32 %v8889_v38, %v6864_v51  ;;  %2602 = vmatprep.mubr.bf16.mxu0 %v2439_v29  ;;  %7110 = vmatprep.subr.bf16.mxu1 %v7788_v56  ;;  %v7793_v29 = vld [vmem:[%s10330_s4 + $0x198] sm:$0xff]   ;;  %v7801_v58 = vld [vmem:[%s10330_s4 + $0x1b0] sm:$0xff]  }
 0x365   :  { %v6867_v17 = vadd.f32 %v6866_v4, %v6865_v22  ;;  %v2159_v44 = vpack.c.bf16 %v2150_v20, %v2149_v36  ;;  %v1167_v28 = vand.u32 7, %v8919_v5  ;;  %2603 = vmatmul.mubr.bf16.vlgmr.msra.gmra.mrb[44].mxu0 %v2436_v63  ;;  %v2443_v38 = vsel %vm10344_vm5, %v2438_v39, %v2442_v35 }
 0x366   :  { %v2441_v0 = vsel %vm10344_vm5, %v2435_v21, %v8983_v45  ;;  %v2095_v56 = vadd.f32 %v8807_v43, %v2066_v9  ;;  %vm9012_vm13 = vcmp.lt.s32.totalorder %v1153_v11, 6  ;;  %v10398_v5 = vmov 0  ;;  %2796 = vmatmul.mubr.bf16.gmra.mrb[48].mxu1 %v8879_v37  ;;  %7049 = vmatpush3.bf16.msra.mxu0 %v7777_v26  ;;  %v7779_v21 = vld [vmem:[%s10330_s4 + $0x108] sm:$0xff]  }
 0x367   :  { %v10399_v5 = vsel %vm9012_vm13, 4294967295, %v10398_v5  ;;  %v2069_v63 = vadd.f32 %v8902_v7, %v6867_v17  ;;  %v9019_v10 = vsel %vm10343_vm12, %v2289_v32, %v2293_v24  ;;  %v2204_v39 = vshrl.u32 %v2159_v44, 16  ;;  %2610 = vmatprep.mubr.bf16.mxu0 %v2443_v38  ;;  %7050 = vmatprep.subr.bf16.mxu0 %v7778_v59 }
 0x368   :  { %10400 = vst [vmem:[#allocation20_spill] sm:$0xff] %v10399_v5  ;;  %v2207_v40 = vshll.u32 %v2159_v44, 16  ;;  %2803 = vmatprep.mubr.bf16.mxu1 %v9019_v10  ;;  %v2963_v11 = vshrl.u32 %v8970_v15, 16  ;;  %v2849_v7 = vshll.u32 %v8996_v61, 16  ;;  %v2109_v51 = vmax.f32 %v2095_v56, 0.0  ;;  %v6868_v26 = vpop.f32.mrb[40].mxu0  ;;  %7111 = vmatpush3.bf16.msra.mxu1 %v7789_v52 }
 0x369   :  { %v2096_v22 = vadd.f32 %v8807_v43, %v2069_v63  ;;  %v10353_v4 = vshrl.u32 %v8929_v23, 16  ;;  %v9037_v32 = vrot.slane %v2279_v14, 4  ;;  %v2206_v36 = vrot.slane %v2204_v39, 3  ;;  %v6869_v17 = vpop.f32.mrb[41].mxu0  ;;  %7112 = vmatprep.subr.bf16.mxu1 %v7791_v62  ;;  %v7794_v52 = vld [vmem:[%s10330_s4 + $0x1e0] sm:$0xff]  }
 0x36a   :  { %v2209_v20 = vrot.slane %v2207_v40, 4  ;;  %vm9041_vm12 = vcmp.lt.s32.totalorder %v1160_v47, 6  ;;  %v10401_v9 = vmov 0  ;;  %vm9045_vm5 = vcmp.lt.s32.totalorder %v1167_v28, 6  ;;  %v6871_v47 = vpop.f32.mrb[42].mxu0  ;;  %7051 = vmatpush3.bf16.msra.mxu0 %v7779_v21  ;;  %v7781_v28 = vld [vmem:[%s10330_s4 + $0x110] sm:$0xff]  }
 0x36b   :  { %v10402_v9 = vsel %vm9041_vm12, 4294967295, %v10401_v9  ;;  %v10404_v59 = vmov 0  ;;  %v2966_v14 = vshll.u32 %v8970_v15, 16  ;;  %v2847_v44 = vshrl.u32 %v8996_v61, 16  ;;  %v6872_v39 = vpop.f32.mrb[43].mxu0  ;;  %7052 = vmatprep.subr.bf16.mxu0 %v7780_v12  ;;  %v7785_v61 = vld [vmem:[%s10330_s4 + $0x158] sm:$0xff]  }
 0x36c   :  { %10403 = vst [vmem:[#allocation21_spill] sm:$0xff] %v10402_v9  ;;  %v10405_v59 = vsel %vm9045_vm5, 4294967295, %v10404_v59  ;;  %v2110_v38 = vmax.f32 %v2096_v22, 0.0  ;;  %v6870_v57 = vadd.f32 %v6869_v17, %v6868_v26  ;;  %v2297_v56 = vor.u32 %v10353_v4, %v2293_v24  ;;  %7113 = vmatpush3.bf16.msra.mxu1 %v7793_v29  ;;  %v7795_v12 = vld [vmem:[%s10330_s4 + $0x1a0] sm:$0xff]  }
 0x36d   :  { %10406 = vst [vmem:[#allocation22_spill] sm:$0xff] %v10405_v59  ;;  %v2444_v62 = vrot.slane %v8929_v23, 1  ;;  %v9060_v63 = vor.u32 %v2209_v20, %v2206_v36  ;;  %v2965_v40 = vrot.slane %v2963_v11, 4  ;;  %v2976_v21 = vshrl.u32 %v9019_v10, 16  ;;  %2611 = vmatmul.mubr.bf16.gmra.mrb[48].mxu0 %v2441_v0  ;;  %7114 = vmatprep.subr.bf16.mxu1 %v7794_v52  ;;  %v7787_v0 = vld [vmem:[%s10330_s4 + $0x118] sm:$0xff]  }
 0x36e   :  { %v2851_v22 = vrot.slane %v2849_v7, 1  ;;  %v2151_v24 = vsel %vm8957_vm14, %v2109_v51, 0.0  ;;  %v2152_v26 = vsel %vm9012_vm13, %v2110_v38, 0.0  ;;  %v2074_v17 = vadd.f32 %v8938_v46, %v6870_v57  ;;  %v7798_v51 = vld [vmem:[%s10330_s4 + $0x1e8] sm:$0xff]   ;;  %2804 = vmatmul.mubr.bf16.gmra.mrb[52].mxu1 %v8925_v27  ;;  %7053 = vmatpush3.bf16.msra.mxu0 %v7781_v28 }
 0x36f   :  { %v6873_v36 = vadd.f32 %v6872_v39, %v6871_v47  ;;  %v9077_v11 = vsel %vm10407_vm6, %v8873_v60, %v9060_v63  ;;  %v2160_v7 = vpack.c.bf16 %v2152_v26, %v2151_v24  ;;  %v2968_v20 = vrot.slane %v2966_v14, 5  ;;  %7054 = vmatprep.subr.bf16.mxu0 %v7785_v61  ;;  %v7799_v61 = vld [vmem:[%s10330_s4 + $0x1a8] sm:$0xff]  }
 0x370   :  { %v2979_v46 = vshll.u32 %v9019_v10, 16  ;;  %v2097_v29 = vadd.f32 %v8807_v43, %v2074_v17  ;;  %v10348_v57 = vshll.u32 %v9077_v11, 16  ;;  %v2385_v47 = vrot.slane %v9077_v11, 3  ;;  %7115 = vmatpush3.bf16.msra.mxu1 %v7795_v12  ;;  %v7792_v12 = vld [vmem:[%s10330_s4 + $0x120] sm:$0xff]  }
 0x371   :  { %v2077_v38 = vadd.f32 %v8961_v13, %v6873_v36  ;;  %v2213_v52 = vshrl.u32 %v2160_v7, 16  ;;  %v2216_v39 = vshll.u32 %v2160_v7, 16  ;;  %vm10408_vm6 = vcmask 1046528   ;;  %v7790_v13 = vld [vmem:[%s10330_s4 + $0x160] sm:$0xff]   ;;  %7116 = vmatprep.subr.bf16.mxu1 %v7798_v51 }
 0x372   :  { %v9095_v14 = vsel %vm10408_vm6, %v8983_v45, %v2444_v62  ;;  %v2852_v28 = vor.u32 %v2851_v22, %v2847_v44  ;;  %v2111_v24 = vmax.f32 %v2097_v29, 0.0  ;;  %v2301_v17 = vrot.slane %v10348_v57, 1  ;;  %7055 = vmatpush3.bf16.msra.mxu0 %v7787_v0 }
 0x373   :  { %v2098_v26 = vadd.f32 %v8807_v43, %v2077_v38  ;;  %vm10409_vm13 = vcmask 1044480   ;;  %v2215_v7 = vrot.slane %v2213_v52, 3  ;;  %v2218_v44 = vrot.slane %v2216_v39, 4  ;;  %v7800_v43 = vld [vmem:[%s10330_s4 + $0x1f0] sm:$0xff]   ;;  %7056 = vmatprep.subr.bf16.mxu0 %v7790_v13 }
 0x374   :  { %v9108_v36 = vsel %vm10409_vm13, %v2383_v55, %v2385_v47  ;;  %v9117_v29 = vrot.slane %v2976_v21, 4  ;;  %vm10410_vm6 = vsmask.f32 7424  ;;  %v9125_v52 = vrot.slane %v2979_v46, 5  ;;  %v7796_v46 = vld [vmem:[%s10330_s4 + $0x168] sm:$0xff]   ;;  %7117 = vmatpush3.bf16.msra.mxu1 %v7799_v61  ;;  %v7804_v61 = vld [vmem:[%s10330_s4 + $0x1f8] sm:$0xff]  }
 0x375   :  { %v2446_v22 = vrot.slane %v9108_v36, 1  ;;  %v2112_v38 = vmax.f32 %v2098_v26, 0.0  ;;  %v9120_v55 = vsel %vm10410_vm6, %v2297_v56, %v2301_v17  ;;  %v9127_v39 = vor.u32 %v2968_v20, %v2965_v40  ;;  %7118 = vmatprep.subr.bf16.mxu1 %v7800_v43 }
 0x376   :  { %v9129_v51 = vor.u32 %v2218_v44, %v2215_v7  ;;  %2811 = vmatprep.mubr.bf16.mxu1 %v9120_v55  ;;  %vm10411_vm13 = vcmask 1046528   ;;  %v10351_v21 = vshrl.u32 %v9077_v11, 16  ;;  %v2857_v40 = vsel %vm10410_vm6, %v2852_v28, %v8906_v49  ;;  %7057 = vmatpush3.bf16.msra.mxu0 %v7792_v12 }
 0x377   :  { %v2447_v56 = vsel %vm10411_vm13, %v2442_v35, %v2446_v22  ;;  %v2153_v20 = vsel %vm9041_vm12, %v2111_v24, 0.0  ;;  %v2154_v0 = vsel %vm9045_vm5, %v2112_v38, 0.0  ;;  %v2955_v35 = vshrl.u32 %v2857_v40, 16  ;;  %2812 = vmatmul.mubr.bf16.gmra.mrb[56].mxu1 %v8929_v23  ;;  %7058 = vmatprep.subr.bf16.mxu0 %v7796_v46 }
 0x378   :  { %2618 = vmatprep.mubr.bf16.mxu0 %v2447_v56  ;;  %v2958_v13 = vshll.u32 %v2857_v40, 16  ;;  %vm10412_vm13 = vsmask.f32 4352  ;;  %v2161_v49 = vpack.c.bf16 %v2154_v0, %v2153_v20  ;;  %v2305_v28 = vor.u32 %v10351_v21, %v2301_v17  ;;  %v7797_v17 = vld [vmem:[%s10330_s4 + $0x128] sm:$0xff]   ;;  %v7802_v40 = vld [vmem:[%s10330_s4 + $0x170] sm:$0xff]   ;;  %7119 = vmatpush3.bf16.msra.mxu1 %v7801_v58 }
 0x379   :  { %v9153_v26 = vsel %vm10412_vm13, %v9060_v63, %v9129_v51  ;;  %2619 = vmatmul.mubr.bf16.gmra.mrb[52].mxu0 %v9095_v14  ;;  %v2448_v24 = vrot.slane %v9077_v11, 1  ;;  %v2989_v38 = vshrl.u32 %v9120_v55, 16  ;;  %v2957_v20 = vrot.slane %v2955_v35, 4  ;;  %v7805_v35 = vld [vmem:[%s10330_s4 + $0x1b8] sm:$0xff]   ;;  %7120 = vmatprep.subr.bf16.mxu1 %v7804_v61 }
 0x37a   :  { %v10350_v7 = vshll.u32 %v9153_v26, 16  ;;  %v2387_v63 = vrot.slane %v9153_v26, 3  ;;  %v10354_v44 = vrot.slane %v9153_v26, 1  ;;  %v2222_v43 = vshrl.u32 %v2161_v49, 16  ;;  %7059 = vmatpush3.bf16.msra.mxu0 %v7797_v17 }
 0x37b   :  { %v2225_v56 = vshll.u32 %v2161_v49, 16  ;;  %v2960_v0 = vrot.slane %v2958_v13, 5  ;;  %vm10413_vm5 = vcmask 1044480   ;;  %v10357_v46 = vshrl.u32 %v9153_v26, 16  ;;  %7060 = vmatprep.subr.bf16.mxu0 %v7802_v40 }
 0x37c   :  { %v2309_v12 = vrot.slane %v10350_v7, 1  ;;  %v9180_v57 = vsel %vm10413_vm5, %v2385_v47, %v2387_v63  ;;  %vm10414_vm12 = vcmask 1046528   ;;  %v2224_v13 = vrot.slane %v2222_v43, 3  ;;  %v2250_v47 = vld [vmem:[#allocation4 + $0x38] sm:$0xf]  ;;  %vm10415_vm5 = vmmov %vm10410_vm6  ;;  %v7803_v43 = vld [vmem:[%s10330_s4 + $0x130] sm:$0xff]   ;;  %7121 = vmatpush3.bf16.msra.mxu1 %v7805_v35 }
 0x37d   :  { %v9186_v49 = vsel %vm10414_vm12, %v2448_v24, %v10354_v44  ;;  %v2227_v7 = vrot.slane %v2225_v56, 4  ;;  %v2450_v21 = vrot.slane %v9180_v57, 1  ;;  %v2961_v54 = vor.u32 %v2960_v0, %v2957_v20  ;;  %vm10416_vm6 = vmmov %vm10414_vm12  ;;  %v7808_v20 = vld [vmem:[%s10330_s4 + $0x240] sm:$0xff]  }
 0x37e   :  { %v9193_v4 = vsel %vm10415_vm5, %v2305_v28, %v2309_v12  ;;  %v9198_v44 = vsel %vm10416_vm6, %v2444_v62, %v2448_v24  ;;  %v2313_v58 = vor.u32 %v10357_v46, %v2309_v12  ;;  %v2951_v57 = vrot.slane %v2275_v34, 5  ;;  %vm10417_vm12 = vmmov %vm10416_vm6  ;;  %v7806_v62 = vld [vmem:[%s10330_s4 + $0x178] sm:$0xff]   ;;  %7061 = vmatpush3.bf16.msra.mxu0 %v7803_v43 }
 0x37f   :  { %v2228_v61 = vor.u32 %v2227_v7, %v2224_v13  ;;  %2819 = vmatprep.mubr.bf16.mxu1 %v9193_v4  ;;  %v2451_v28 = vsel %vm10417_vm12, %v2446_v22, %v2450_v21  ;;  %vm10418_vm6 = vsmask.f32 3328  ;;  %v2992_v17 = vshll.u32 %v9120_v55, 16  ;;  %vm10419_vm5 = vmmov %vm10412_vm13  ;;  %7062 = vmatprep.subr.bf16.mxu0 %v7806_v62 }
 0x380   :  { %v9216_v24 = vsel %vm10418_vm6, %v2961_v54, %v9127_v39  ;;  %2626 = vmatprep.mubr.bf16.mxu0 %v2451_v28  ;;  %v2991_v34 = vrot.slane %v2989_v38, 4  ;;  %v2982_v7 = vor.u32 %v9125_v52, %v9117_v29  ;;  %v2971_v36 = vrot.slane %v2287_v16, 4  ;;  %2820 = vmatmul.mubr.bf16.gmra.mrb[60].mxu1 %v9077_v11  ;;  %v7807_v52 = vld [vmem:[%s10330_s4 + $0x138] sm:$0xff]   ;;  %vm10420_vm12 = vmmov %vm10418_vm6 }
 0x381   :  { %v2972_v22 = vrot.slane %v2283_v25, 5  ;;  %v9227_v56 = vsel %vm10419_vm5, %v9129_v51, %v2228_v61  ;;  %v2251_v54 = vsel %vm8465_vm11, %v2228_v61, %v2250_v47  ;;  %2627 = vmatmul.mubr.bf16.gmra.mrb[56].mxu0 %v9198_v44  ;;  %v2994_v40 = vrot.slane %v2992_v17, 5 }
 0x382   :  { %v3002_v38 = vshrl.u32 %v9193_v4, 16  ;;  %2249 = vst [vmem:[#allocation4 + $0x30] sm:$0xff] %v9227_v56  ;;  %2252 = vst [vmem:[#allocation4 + $0x38] sm:$0xf] %v2251_v54  ;;  %v2315_v16 = vshll.u32 %v9227_v56, 16  ;;  %v2389_v25 = vrot.slane %v9227_v56, 3  ;;  %v9244_v51 = vor.u32 %v2951_v57, %v9037_v32  ;;  %7063 = vmatpush3.bf16.msra.mxu0 %v7807_v52 }
 0x383   :  { %v9238_v29 = vrot.slane %v9227_v56, 1  ;;  %v9251_v0 = vsel %vm10420_vm12, %v9127_v39, %v2982_v7  ;;  %v2973_v12 = vor.u32 %v2972_v22, %v2971_v36  ;;  %v3005_v13 = vshll.u32 %v9193_v4, 16  ;;  %7164 = vmatprep.subr.bf16.mxu0 %v7808_v20 }
 0x384   :  { %v3004_v35 = vrot.slane %v3002_v38, 4  ;;  %v2317_v47 = vrot.slane %v2315_v16, 1  ;;  %vm10421_vm6 = vcmask 1044480   ;;  %v10422_v32 = vrot.slane %v9153_v26, 1 }
 0x385   :  { %v2390_v43 = vsel %vm10421_vm6, %v2387_v63, %v2389_v25  ;;  %vm10423_vm5 = vcmask 1046528   ;;  %v2995_v61 = vor.u32 %v2994_v40, %v2991_v34  ;;  %v9265_v39 = vsel %vm10420_vm12, %v9244_v51, %v2973_v12  ;;  %vm10426_vm6 = vmmov %vm10420_vm12 }
 0x386   :  { %v9261_v57 = vsel %vm10423_vm5, %v10422_v32, %v9238_v29  ;;  %v2454_v28 = vrot.slane %v2390_v43, 1  ;;  %v3007_v62 = vrot.slane %v3005_v13, 5  ;;  %v10424_v17 = vshrl.u32 %v8929_v23, 16 }
 0x387   :  { %vm10425_vm13 = vsmask.f32 7424  ;;  %v2319_v63 = vshrl.u32 %v9227_v56, 16  ;;  %v9274_v54 = vsel %vm10426_vm6, %v2982_v7, %v2995_v61  ;;  %v10427_v34 = vshll.u32 %v8929_v23, 16 }
 0x388   :  { %v2984_v36 = vrot.slane %v10424_v17, 4  ;;  %v9270_v22 = vsel %vm10425_vm13, %v2313_v58, %v2317_v47  ;;  %vm10428_vm5 = vsmask.f32 7950  ;;  %vm10429_vm11 = vcmask 1047555  }
 0x389   :  { %v2985_v40 = vrot.slane %v10427_v34, 5  ;;  %vm9280_vm12 = vmand %vm10429_vm11, %vm10428_vm5  ;;  %v10430_v38 = vmov 0  ;;  %2827 = vmatprep.mubr.bf16.mxu1 %v9270_v22  ;;  %vm10433_vm14 = vcmask 1046528   ;;  %v3015_v13 = vshrl.u32 %v9270_v22, 16  ;;  %v2256_v3 = vld [vmem:[#allocation4 + $0x38] sm:$0xf8] }
 0x38a   :  { %v10431_v38 = vsel %vm9280_vm12, 4294967295, %v10430_v38  ;;  %v2455_v58 = vsel %vm10433_vm14, %v2450_v21, %v2454_v28  ;;  %v3018_v52 = vshll.u32 %v9270_v22, 16  ;;  %v3008_v7 = vor.u32 %v3007_v62, %v3004_v35  ;;  %v2369_v21 = vld [vmem:[#allocation4 + $0x38] sm:$0x7]  ;;  %vm10436_vm11 = vmmov %vm10426_vm6  ;;  %2828 = vmatmul.mubr.bf16.gmra.mrb[64].mxu1 %v9153_v26 }
 0x38b   :  { %10432 = vst [vmem:[#allocation23_spill] sm:$0xff] %v10431_v38  ;;  %2634 = vmatprep.mubr.bf16.mxu0 %v2455_v58  ;;  %v2986_v43 = vor.u32 %v2985_v40, %v2984_v36  ;;  %v10434_v32 = vshrl.u32 %v9077_v11, 16  ;;  %v10435_v34 = vshll.u32 %v9077_v11, 16  ;;  %v9293_v19 = vor.u32 %v2319_v63, %v2317_v47  ;;  %vm10438_vm14 = vmmov %vm10426_vm6 }
 0x38c   :  { %2635 = vmatmul.mubr.bf16.gmra.mrb[60].mxu0 %v9186_v49  ;;  %v9296_v20 = vsel %vm10436_vm11, %v2995_v61, %v3008_v7  ;;  %v10437_v50 = vshrl.u32 %v9153_v26, 16  ;;  %v2257_v62 = vsel %vm9280_vm12, 0, %v2256_v3  ;;  %v2391_v36 = vrot.slane %v2369_v21, 3  ;;  %vm10442_vm11 = vmmov %vm10426_vm6 }
 0x38d   :  { %v2997_v17 = vrot.slane %v10434_v32, 4  ;;  %v2998_v46 = vrot.slane %v10435_v34, 5  ;;  %v9304_v40 = vsel %vm10438_vm14, %v2973_v12, %v2986_v43  ;;  %v3017_v58 = vrot.slane %v3015_v13, 4  ;;  %2258 = vst [vmem:[#allocation4 + $0x38] sm:$0xf8] %v2257_v62  ;;  %2835 = vmatprep.mubr.bf16.mxu1 %v9293_v19  ;;  %vm10443_vm14 = vmmov %vm10426_vm6 }
 0x38e   :  { %v3010_v35 = vrot.slane %v10437_v50, 4  ;;  %v3020_v47 = vrot.slane %v3018_v52, 5  ;;  %v10439_v61 = vshll.u32 %v9153_v26, 16  ;;  %v3023_v59 = vrot.slane %v2319_v63, 4 }
 0x38f   :  { %v2999_v32 = vor.u32 %v2998_v46, %v2997_v17  ;;  %vm10440_vm13 = vcmask 1044480   ;;  %v3024_v38 = vrot.slane %v2315_v16, 5  ;;  %vm10441_vm5 = vcmask 1046528  }
 0x390   :  { %v3011_v34 = vrot.slane %v10439_v61, 5  ;;  %v2392_v50 = vsel %vm10440_vm13, %v2389_v25, %v2391_v36  ;;  %v3021_v21 = vor.u32 %v3020_v47, %v3017_v58  ;;  %vm10444_vm13 = vmmov %vm10426_vm6  ;;  %v2265_v25 = vld [vmem:[#allocation4 + $0x30] sm:$0x7f] }
 0x391   :  { %v2458_v3 = vrot.slane %v2392_v50, 1  ;;  %v9311_v9 = vsel %vm10426_vm6, %v2986_v43, %v2999_v32  ;;  %v9313_v5 = vor.u32 %v3024_v38, %v3023_v59  ;;  %v2943_v38 = vshrl.u32 %v8881_v30, 16  ;;  %vm10445_vm6 = vmmov %vm10441_vm5  ;;  %v7809_v50 = vld [vmem:[%s10330_s4 + $0x200] sm:$0xff]  }
 0x392   :  { %v3012_v12 = vor.u32 %v3011_v34, %v3010_v35  ;;  %v9317_v52 = vsel %vm10442_vm11, %v3008_v7, %v3021_v21  ;;  %2836 = vmatmul.mubr.bf16.gmra.mrb[68].mxu1 %v2265_v25  ;;  %v2946_v7 = vshll.u32 %v8881_v30, 16  ;;  %v7823_v25 = vld [vmem:[%s10330_s4 + $0x238] sm:$0xff]  }
 0x393   :  { %v2459_v13 = vsel %vm10441_vm5, %v2454_v28, %v2458_v3  ;;  %3440 = vmatprep.mubr.bf16.mxu1 %v8970_v15  ;;  %vm10446_vm5 = vsmask.f32 7424  ;;  %v2945_v62 = vrot.slane %v2943_v38, 4 }
 0x394   :  { %v9320_v46 = vsel %vm10443_vm14, %v2999_v32, %v3012_v12  ;;  %2642 = vmatprep.mubr.bf16.mxu0 %v2459_v13  ;;  %v9324_v16 = vsel %vm10444_vm13, %v3012_v12, %v9313_v5  ;;  %v9327_v59 = vld [vmem:[#allocation4 + $0x38] sm:$0xff]  ;;  %v2948_v36 = vrot.slane %v2946_v7, 5  ;;  %vm10447_vm14 = vmmov %vm10442_vm11 }
 0x395   :  { %2643 = vmatmul.mubr.bf16.gmra.mrb[64].mxu0 %v9261_v57  ;;  %v9329_v63 = vld [vmem:[#allocation4 + $0x38] sm:$0xf]  ;;  %v9336_v43 = vrot.slane %v9327_v59, 1  ;;  %vm10448_vm13 = vmmov %vm10446_vm5 }
 0x396   :  { %2650 = vmatprep.mubr.bf16.mxu0 %v2458_v3  ;;  %v2902_v28 = vshll.u32 %v9329_v63, 16  ;;  %v2949_v61 = vor.u32 %v2948_v36, %v2945_v62  ;;  %v3262_v36 = vld [vmem:[#allocation4 + $0x38] sm:$0x7f] }
 0x397   :  { %v9343_v35 = vsel %vm10445_vm6, %v9238_v29, %v9336_v43  ;;  %vm10449_vm6 = vmmov %vm10442_vm11 }
 0x398   :  { %v2904_v17 = vrot.slane %v2902_v28, 1  ;;  %v3037_v62 = vrot.slane %v2902_v28, 5  ;;  %v3820_v28 = vld [vmem:[#allocation5] sm:$0x1f] }
 0x39a   :  { %v2905_v15 = vsel %vm10446_vm5, %v9293_v19, %v2904_v17  ;;  %3441 = vmatmul.mubr.bf16.vlgmr.msra.gmra.mrb[72].mxu1 %v8879_v37  ;;  %v7810_v37 = vld [vmem:[%s10330_s4 + $0x248] sm:$0xff]   ;;  %vm10450_vm5 = vmmov %vm10449_vm6 }
 0x39b   :  { %v3028_v58 = vshrl.u32 %v2905_v15, 16  ;;  %v3031_v47 = vshll.u32 %v2905_v15, 16  ;;  %3448 = vmatprep.mubr.bf16.mxu1 %v9019_v10  ;;  %v7811_v10 = vld [vmem:[%s10330_s4 + $0x208] sm:$0xff]   ;;  %v3269_v15 = vshrl.u32 %v9327_v59, 16 }
 0x39d   :  { %2651 = vmatmul.mubr.bf16.gmra.mrb[68].mxu0 %v9238_v29  ;;  %v3030_v30 = vrot.slane %v3028_v58, 4  ;;  %v3033_v32 = vrot.slane %v3031_v47, 5  ;;  %v2953_v29 = vsel %vm10447_vm14, %v2949_v61, %v9244_v51  ;;  %v7814_v51 = vld [vmem:[%s10330_s4 + $0x258] sm:$0xff]  }
 0x39e   :  { %3191 = vmatprep.mubr.bf16.mxu0 %v9216_v24  ;;  %v7812_v24 = vld [vmem:[%s10330_s4 + $0x250] sm:$0xff]  }
 0x39f   :  { %v9351_v34 = vor.u32 %v3033_v32, %v3030_v30 }
 0x3a1   :  { %v3035_v3 = vsel %vm10442_vm11, %v3021_v21, %v9351_v34  ;;  %v7820_v21 = vld [vmem:[%s10330_s4 + $0x270] sm:$0xff]   ;;  %vm10451_vm11 = vcmask 1046528  }
 0x3a2   :  { %3449 = vmatmul.mubr.bf16.gmra.mrb[76].mxu1 %v8925_v27  ;;  %v7813_v27 = vld [vmem:[%s10330_s4 + $0x210] sm:$0xff]  }
 0x3a3   :  { %3456 = vmatprep.mubr.bf16.mxu1 %v9120_v55  ;;  %v7815_v55 = vld [vmem:[%s10330_s4 + $0x218] sm:$0xff]  }
 0x3a5   :  { %3192 = vmatmul.mubr.bf16.vlgmr.msra.gmra.mrb[72].mxu0 %v2953_v29 }
 0x3a6   :  { %7165 = vmatpush3.bf16.msra.mxu0 %v7809_v50  ;;  %3199 = vmatprep.mubr.bf16.mxu0 %v9251_v0  ;;  %v7816_v0 = vld [vmem:[%s10330_s4 + $0x260] sm:$0xff]  }
 0x3a7   :  { %7166 = vmatprep.subr.bf16.mxu0 %v7810_v37 }
 0x3aa   :  { %7167 = vmatpush3.bf16.msra.mxu0 %v7811_v10  ;;  %3457 = vmatmul.mubr.bf16.gmra.mrb[80].mxu1 %v8929_v23  ;;  %v7818_v23 = vld [vmem:[%s10330_s4 + $0x268] sm:$0xff]  }
 0x3ab   :  { %7168 = vmatprep.subr.bf16.mxu0 %v7812_v24  ;;  %3464 = vmatprep.mubr.bf16.mxu1 %v9193_v4  ;;  %v3265_v4 = vshll.u32 %v9327_v59, 16 }
 0x3ad   :  { %3200 = vmatmul.mubr.bf16.gmra.mrb[76].mxu0 %v9265_v39  ;;  %v7817_v39 = vld [vmem:[%s10330_s4 + $0x220] sm:$0xff]   ;;  %v3267_v12 = vrot.slane %v3265_v4, 1 }
 0x3ae   :  { %3207 = vmatprep.mubr.bf16.mxu0 %v9274_v54  ;;  %7169 = vmatpush3.bf16.msra.mxu0 %v7813_v27  ;;  %v7819_v54 = vld [vmem:[%s10330_s4 + $0x228] sm:$0xff]  }
 0x3af   :  { %7170 = vmatprep.subr.bf16.mxu0 %v7814_v51  ;;  %v3268_v13 = vsel %vm10448_vm13, %v9293_v19, %v3267_v12 }
 0x3b2   :  { %7171 = vmatpush3.bf16.msra.mxu0 %v7815_v55  ;;  %3465 = vmatmul.mubr.bf16.gmra.mrb[84].mxu1 %v9077_v11  ;;  %v2906_v11 = vshrl.u32 %v9329_v63, 16 }
 0x3b3   :  { %7172 = vmatprep.subr.bf16.mxu0 %v7816_v0  ;;  %3472 = vmatprep.mubr.bf16.mxu1 %v9270_v22  ;;  %v7822_v22 = vld [vmem:[%s10330_s4 + $0x278] sm:$0xff]  }
 0x3b5   :  { %3208 = vmatmul.mubr.bf16.gmra.mrb[80].mxu0 %v9304_v40  ;;  %v2908_v40 = vor.u32 %v2906_v11, %v2904_v17 }
 0x3b6   :  { %3215 = vmatprep.mubr.bf16.mxu0 %v9296_v20  ;;  %7173 = vmatpush3.bf16.msra.mxu0 %v7817_v39  ;;  %v7821_v20 = vld [vmem:[%s10330_s4 + $0x230] sm:$0xff]   ;;  %v7827_v39 = vld [vmem:[%s10331_s5 + $0x88] sm:$0xff]  }
 0x3b7   :  { %7174 = vmatprep.subr.bf16.mxu0 %v7818_v23  ;;  %v3041_v38 = vshrl.u32 %v2908_v40, 16  ;;  %v3044_v7 = vshll.u32 %v2908_v40, 16  ;;  %v7828_v23 = vld [vmem:[%s10331_s5 + $0xd0] sm:$0xff]  }
 0x3b9   :  { %v3046_v17 = vrot.slane %v3044_v7, 5 }
 0x3ba   :  { %7175 = vmatpush3.bf16.msra.mxu0 %v7819_v54  ;;  %3473 = vmatmul.mubr.bf16.gmra.mrb[88].mxu1 %v9153_v26  ;;  %v3043_v26 = vrot.slane %v3041_v38, 4 }
 0x3bb   :  { %7176 = vmatprep.subr.bf16.mxu0 %v7820_v21  ;;  %3480 = vmatprep.mubr.bf16.mxu1 %v3268_v13 }
 0x3bc   :  { %v3047_v19 = vor.u32 %v3046_v17, %v3043_v26  ;;  %v7829_v26 = vld [vmem:[%s10331_s5 + $0x90] sm:$0xff]   ;;  %v7830_v17 = vld [vmem:[%s10331_s5 + $0x40] sm:$0xff]  }
 0x3bd   :  { %3216 = vmatmul.mubr.bf16.gmra.mrb[84].mxu0 %v9311_v9  ;;  %v3271_v9 = vor.u32 %v3269_v15, %v3267_v12 }
 0x3be   :  { %3223 = vmatprep.mubr.bf16.mxu0 %v9317_v52  ;;  %7177 = vmatpush3.bf16.msra.mxu0 %v7821_v20  ;;  %v3036_v52 = vrot.slane %v2906_v11, 4  ;;  %v3048_v59 = vsel %vm10449_vm6, %v9351_v34, %v3047_v19  ;;  %v7831_v19 = vld [vmem:[%s10331_s5] sm:$0xff]  }
 0x3bf   :  { %7178 = vmatprep.subr.bf16.mxu0 %v7822_v22 }
 0x3c0   :  { %v3038_v58 = vor.u32 %v3037_v62, %v3036_v52  ;;  %v7832_v52 = vld [vmem:[%s10331_s5 + $0x48] sm:$0xff]   ;;  %v7833_v62 = vld [vmem:[%s10331_s5 + $0xd8] sm:$0xff]  }
 0x3c2   :  { %7179 = vmatpush3.bf16.msra.mxu0 %v7823_v25  ;;  %3481 = vmatmul.mubr.bf16.gmra.mrb[92].mxu1 %v9227_v56  ;;  %v3039_v56 = vsel %vm10450_vm5, %v9313_v5, %v3038_v58  ;;  %v7825_v5 = vld [vmem:[%s10331_s5 + $0x80] sm:$0xff]  }
 0x3c3   :  { %3488 = vmatprep.mubr.bf16.mxu1 %v3271_v9  ;;  %7280 = vmatprep.subr.bf16.mxu0 %v7830_v17 }
 0x3c5   :  { %3224 = vmatmul.mubr.bf16.gmra.mrb[88].mxu0 %v9320_v46  ;;  %v3511_v46 = vld [vmem:[#allocation4 + $0x8] sm:$0xfe] }
 0x3c6   :  { %3231 = vmatprep.mubr.bf16.mxu0 %v3035_v3  ;;  %v3547_v47 = vrot.slane %v3511_v46, 1 }
 0x3c8   :  { %v3549_v30 = vsel %vm10451_vm11, %v3547_v47, %v8983_v45  ;;  %v7824_v45 = vld [vmem:[%s10331_s5 + $0xc0] sm:$0xff]   ;;  %v7834_v47 = vld [vmem:[%s10331_s5 + $0x8] sm:$0xff]  }
 0x3c9   :  { %7222 = vmatprep.subr.bf16.mxu1 %v7824_v45 }
 0x3ca   :  { %3489 = vmatmul.mubr.bf16.gmra.mrb[96].mxu1 %v3262_v36 }
 0x3cb   :  { %7223 = vmatpush3.bf16.msra.mxu1 %v7825_v5 }
 0x3cc   :  { %7224 = vmatprep.subr.bf16.mxu1 %v7826_v48 }
 0x3cd   :  { %3232 = vmatmul.mubr.bf16.gmra.mrb[92].mxu0 %v9324_v16 }
 0x3ce   :  { %3239 = vmatprep.mubr.bf16.mxu0 %v3048_v59  ;;  %v7835_v59 = vld [vmem:[%s10331_s5 + $0x98] sm:$0xff]  }
 0x3cf   :  { %7225 = vmatpush3.bf16.msra.mxu1 %v7827_v39 }
 0x3d0   :  { %7226 = vmatprep.subr.bf16.mxu1 %v7828_v23 }
 0x3d3   :  { %7227 = vmatpush3.bf16.msra.mxu1 %v7829_v26 }
 0x3d4   :  { %7228 = vmatprep.subr.bf16.mxu1 %v7833_v62 }
 0x3d5   :  { %3240 = vmatmul.mubr.bf16.gmra.mrb[96].mxu0 %v3039_v56 }
 0x3d6   :  { %3695 = vmatprep.mubr.bf16.mxu0 %v3549_v30 }
 0x3d7   :  { %7229 = vmatpush3.bf16.msra.mxu1 %v7835_v59  ;;  %v7848_v59 = vld [vmem:[%s10331_s5 + $0x70] sm:$0xff]  }
 0x3dd   :  { %3696 = vmatmul.mubr.bf16.vlgmr.msra.gmra.mrb[100].mxu0 %v3549_v30 }
 0x3de   :  { %3703 = vmatprep.mubr.bf16.mxu0 %v9095_v14  ;;  %7281 = vmatpush3.bf16.msra.mxu0 %v7831_v19 }
 0x3df   :  { %7282 = vmatprep.subr.bf16.mxu0 %v7832_v52 }
 0x3e2   :  { %7283 = vmatpush3.bf16.msra.mxu0 %v7834_v47  ;;  %v7851_v47 = vld [vmem:[%s10331_s5 + $0xb0] sm:$0xff]  }
 0x3e5   :  { %3704 = vmatmul.mubr.bf16.gmra.mrb[104].mxu0 %v9095_v14 }
 0x3e6   :  { %3711 = vmatprep.mubr.bf16.mxu0 %v9198_v44 }
 0x3ed   :  { %3712 = vmatmul.mubr.bf16.gmra.mrb[108].mxu0 %v9198_v44 }
 0x3ee   :  { %3719 = vmatprep.mubr.bf16.mxu0 %v9186_v49 }
 0x3f5   :  { %3720 = vmatmul.mubr.bf16.gmra.mrb[112].mxu0 %v9186_v49 }
 0x3f6   :  { %3727 = vmatprep.mubr.bf16.mxu0 %v9261_v57 }
 0x3fd   :  { %3728 = vmatmul.mubr.bf16.gmra.mrb[116].mxu0 %v9261_v57 }
 0x3fe   :  { %3735 = vmatprep.mubr.bf16.mxu0 %v9343_v35 }
 0x405   :  { %3736 = vmatmul.mubr.bf16.gmra.mrb[120].mxu0 %v9343_v35 }
 0x406   :  { %3743 = vmatprep.mubr.bf16.mxu0 %v9336_v43 }
 0x40d   :  { %3744 = vmatmul.mubr.bf16.gmra.mrb[124].mxu0 %v9336_v43  ;;  %v3821_v43 = vsel %vm8713_vm15, 0, %v3820_v28  ;;  %v7837_v28 = vld [vmem:[%s10331_s5 + $0x10] sm:$0xff]   ;;  %vm10453_vm15 = vcmask 1044480  }
 0x40e   :  { %3822 = vst [vmem:[#allocation5] sm:$0x1f] %v3821_v43  ;;  %v7838_v43 = vld [vmem:[%s10331_s5 + $0xe0] sm:$0xff]  }
 0x40f   :  { %7230 = vmatprep.subr.bf16.mxu1 %v7838_v43 }
 0x431   :  { %v7006_v14 = vpop.f32.mrb[44].mxu1 }
 0x432   :  { %v7007_v44 = vpop.f32.mrb[45].mxu1 }
 0x433   :  { %v7008_v49 = vadd.f32 %v7007_v44, %v7006_v14  ;;  %v7009_v57 = vpop.f32.mrb[46].mxu1 }
 0x434   :  { %v7010_v16 = vpop.f32.mrb[47].mxu1 }
 0x435   :  { %v7011_v63 = vadd.f32 %v7010_v16, %v7009_v57 }
 0x438   :  { %v6948_v35 = vpop.f32.mrb[44].mxu0 }
 0x439   :  { %v7012_v32 = vpop.f32.mrb[48].mxu1  ;;  %v6949_v61 = vpop.f32.mrb[45].mxu0 }
 0x43a   :  { %v7013_v34 = vpop.f32.mrb[49].mxu1  ;;  %v6950_v50 = vadd.f32 %v6949_v61, %v6948_v35  ;;  %v6951_v3 = vpop.f32.mrb[46].mxu0  ;;  %v7839_v35 = vld [vmem:[%s10331_s5 + $0x58] sm:$0xff]  }
 0x43b   :  { %v7014_v29 = vadd.f32 %v7013_v34, %v7012_v32  ;;  %v7015_v37 = vpop.f32.mrb[50].mxu1  ;;  %v6952_v10 = vpop.f32.mrb[47].mxu0  ;;  %v7840_v32 = vld [vmem:[%s10331_s5 + $0xa0] sm:$0xff]   ;;  %v7844_v34 = vld [vmem:[%s10331_s5 + $0xe8] sm:$0xff]  }
 0x43c   :  { %v9452_v24 = vadd.f32 %v7008_v49, %v6950_v50  ;;  %v7016_v27 = vpop.f32.mrb[51].mxu1  ;;  %v6953_v51 = vadd.f32 %v6952_v10, %v6951_v3  ;;  %7231 = vmatpush3.bf16.msra.mxu1 %v7840_v32 }
 0x43d   :  { %v7017_v55 = vadd.f32 %v7016_v27, %v7015_v37  ;;  %v7845_v37 = vld [vmem:[%s10331_s5 + $0xa8] sm:$0xff]   ;;  %7232 = vmatprep.subr.bf16.mxu1 %v7844_v34 }
 0x43e   :  { %v9454_v0 = vadd.f32 %v7011_v63, %v6953_v51  ;;  %v7836_v63 = vld [vmem:[%s10331_s5 + $0x50] sm:$0xff]   ;;  %v7842_v51 = vld [vmem:[%s10331_s5 + $0x60] sm:$0xff]  }
 0x43f   :  { %7284 = vmatprep.subr.bf16.mxu0 %v7836_v63 }
 0x440   :  { %v6954_v4 = vpop.f32.mrb[48].mxu0  ;;  %7285 = vmatpush3.bf16.msra.mxu0 %v7837_v28  ;;  %7233 = vmatpush3.bf16.msra.mxu1 %v7845_v37  ;;  %v7855_v37 = vld [vmem:[%s10331_s5 + $0xb8] sm:$0xff]  }
 0x441   :  { %v7018_v54 = vpop.f32.mrb[52].mxu1  ;;  %v6955_v21 = vpop.f32.mrb[49].mxu0  ;;  %7286 = vmatprep.subr.bf16.mxu0 %v7839_v35 }
 0x442   :  { %v7019_v12 = vpop.f32.mrb[53].mxu1  ;;  %v6956_v11 = vadd.f32 %v6955_v21, %v6954_v4  ;;  %v6957_v20 = vpop.f32.mrb[50].mxu0  ;;  %v7846_v21 = vld [vmem:[%s10331_s5 + $0x68] sm:$0xff]  }
 0x443   :  { %v7020_v22 = vadd.f32 %v7019_v12, %v7018_v54  ;;  %v7021_v40 = vpop.f32.mrb[54].mxu1  ;;  %v6958_v13 = vpop.f32.mrb[51].mxu0  ;;  %v7843_v54 = vld [vmem:[%s10331_s5 + $0x20] sm:$0xff]  }
 0x444   :  { %v9465_v25 = vadd.f32 %v7014_v29, %v6956_v11  ;;  %v7022_v38 = vpop.f32.mrb[55].mxu1  ;;  %v6959_v7 = vadd.f32 %v6958_v13, %v6957_v20  ;;  %v7841_v29 = vld [vmem:[%s10331_s5 + $0x18] sm:$0xff]  }
 0x445   :  { %v7023_v15 = vadd.f32 %v7022_v38, %v7021_v40  ;;  %7287 = vmatpush3.bf16.msra.mxu0 %v7841_v29  ;;  %v7854_v29 = vld [vmem:[%s10331_s5 + $0xf8] sm:$0xff]  }
 0x446   :  { %v9467_v9 = vadd.f32 %v7017_v55, %v6959_v7  ;;  %7288 = vmatprep.subr.bf16.mxu0 %v7842_v51 }
 0x449   :  { %7289 = vmatpush3.bf16.msra.mxu0 %v7843_v54 }
 0x44a   :  { %v7024_v46 = vpop.f32.mrb[56].mxu1  ;;  %7290 = vmatprep.subr.bf16.mxu0 %v7846_v21 }
 0x44b   :  { %v7025_v56 = vpop.f32.mrb[57].mxu1  ;;  %v7849_v46 = vld [vmem:[%s10331_s5 + $0x30] sm:$0xff]  }
 0x44c   :  { %v6960_v36 = vpop.f32.mrb[52].mxu0  ;;  %v7027_v5 = vpop.f32.mrb[58].mxu1  ;;  %v7852_v56 = vld [vmem:[%s10331_s5 + $0x78] sm:$0xff]  }
 0x44d   :  { %v6961_v58 = vpop.f32.mrb[53].mxu0  ;;  %v7028_v49 = vpop.f32.mrb[59].mxu1 }
 0x44e   :  { %v6962_v30 = vadd.f32 %v6961_v58, %v6960_v36  ;;  %v6963_v45 = vpop.f32.mrb[54].mxu0  ;;  %v7850_v58 = vld [vmem:[%s10331_s5 + $0xf0] sm:$0xff]  }
 0x44f   :  { %v6964_v14 = vpop.f32.mrb[55].mxu0  ;;  %7234 = vmatprep.subr.bf16.mxu1 %v7850_v58 }
 0x450   :  { %v9490_v44 = vadd.f32 %v7020_v22, %v6962_v30  ;;  %v6965_v57 = vadd.f32 %v6964_v14, %v6963_v45  ;;  %v7847_v22 = vld [vmem:[%s10331_s5 + $0x28] sm:$0xff]   ;;  %7235 = vmatpush3.bf16.msra.mxu1 %v7851_v47  ;;  %v7853_v14 = vld [vmem:[%s10331_s5 + $0x38] sm:$0xff]  }
 0x451   :  { %7291 = vmatpush3.bf16.msra.mxu0 %v7847_v22  ;;  %7236 = vmatprep.subr.bf16.mxu1 %v7854_v29 }
 0x452   :  { %v9492_v16 = vadd.f32 %v7023_v15, %v6965_v57  ;;  %7292 = vmatprep.subr.bf16.mxu0 %v7848_v59 }
 0x453   :  { %v7030_v50 = vpop.f32.mrb[60].mxu1 }
 0x454   :  { %v6966_v61 = vpop.f32.mrb[56].mxu0  ;;  %v7031_v10 = vpop.f32.mrb[61].mxu1  ;;  %7237 = vmatpush3.bf16.msra.mxu1 %v7855_v37 }
 0x455   :  { %v6967_v3 = vpop.f32.mrb[57].mxu0  ;;  %v7032_v55 = vadd.f32 %v7031_v10, %v7030_v50  ;;  %v7033_v48 = vpop.f32.mrb[62].mxu1  ;;  %7293 = vmatpush3.bf16.msra.mxu0 %v7849_v46 }
 0x456   :  { %v6969_v27 = vpop.f32.mrb[58].mxu0  ;;  %v7034_v23 = vpop.f32.mrb[63].mxu1  ;;  %7294 = vmatprep.subr.bf16.mxu0 %v7852_v56 }
 0x457   :  { %v6970_v39 = vpop.f32.mrb[59].mxu0  ;;  %v7035_v4 = vadd.f32 %v7034_v23, %v7033_v48 }
 0x459   :  { %7295 = vmatpush3.bf16.msra.mxu0 %v7853_v14 }
 0x45d   :  { %v7036_v11 = vpop.f32.mrb[64].mxu1 }
 0x45e   :  { %v7037_v40 = vpop.f32.mrb[65].mxu1 }
 0x45f   :  { %v6972_v12 = vpop.f32.mrb[60].mxu0  ;;  %v7038_v7 = vadd.f32 %v7037_v40, %v7036_v11  ;;  %v7039_v15 = vpop.f32.mrb[66].mxu1 }
 0x460   :  { %v6973_v20 = vpop.f32.mrb[61].mxu0  ;;  %v7040_v19 = vpop.f32.mrb[67].mxu1 }
 0x461   :  { %v6974_v13 = vadd.f32 %v6973_v20, %v6972_v12  ;;  %v6975_v38 = vpop.f32.mrb[62].mxu0  ;;  %v7041_v62 = vadd.f32 %v7040_v19, %v7039_v15 }
 0x462   :  { %v6976_v26 = vpop.f32.mrb[63].mxu0 }
 0x463   :  { %v9530_v17 = vadd.f32 %v7032_v55, %v6974_v13  ;;  %v6977_v52 = vadd.f32 %v6976_v26, %v6975_v38 }
 0x465   :  { %v9532_v36 = vadd.f32 %v7035_v4, %v6977_v52  ;;  %v7042_v45 = vpop.f32.mrb[68].mxu1 }
 0x466   :  { %v7043_v49 = vpop.f32.mrb[69].mxu1 }
 0x467   :  { %v7044_v28 = vadd.f32 %v7043_v49, %v7042_v45  ;;  %v7045_v43 = vpop.f32.mrb[70].mxu1  ;;  %v7856_v45 = vld [vmem:[%s10331_s5 + $0x140] sm:$0xff]  }
 0x468   :  { %v6978_v30 = vpop.f32.mrb[64].mxu0  ;;  %v7046_v61 = vpop.f32.mrb[71].mxu1  ;;  %7338 = vmatprep.subr.bf16.mxu1 %v7856_v45 }
 0x469   :  { %v6979_v5 = vpop.f32.mrb[65].mxu0  ;;  %v7047_v50 = vadd.f32 %v7046_v61, %v7045_v43 }
 0x46a   :  { %v6980_v57 = vadd.f32 %v6979_v5, %v6978_v30  ;;  %v6981_v63 = vpop.f32.mrb[66].mxu0 }
 0x46b   :  { %v6982_v35 = vpop.f32.mrb[67].mxu0 }
 0x46c   :  { %v9552_v32 = vadd.f32 %v7038_v7, %v6980_v57  ;;  %v6983_v34 = vadd.f32 %v6982_v35, %v6981_v63 }
 0x46d   :  { %v7122_v27 = vpop.f32.mrb[72].mxu1 }
 0x46e   :  { %v9554_v3 = vadd.f32 %v7041_v62, %v6983_v34  ;;  %v7123_v55 = vpop.f32.mrb[73].mxu1 }
 0x46f   :  { %v7124_v23 = vadd.f32 %v7123_v55, %v7122_v27  ;;  %v7125_v4 = vpop.f32.mrb[74].mxu1 }
 0x470   :  { %v6984_v10 = vpop.f32.mrb[68].mxu0  ;;  %v7126_v12 = vpop.f32.mrb[75].mxu1 }
 0x471   :  { %v6985_v51 = vpop.f32.mrb[69].mxu0  ;;  %v7127_v20 = vadd.f32 %v7126_v12, %v7125_v4 }
 0x472   :  { %v6986_v48 = vadd.f32 %v6985_v51, %v6984_v10  ;;  %v6987_v39 = vpop.f32.mrb[70].mxu0 }
 0x473   :  { %v6988_v54 = vpop.f32.mrb[71].mxu0 }
 0x474   :  { %v9562_v21 = vadd.f32 %v7044_v28, %v6986_v48  ;;  %v6989_v11 = vadd.f32 %v6988_v54, %v6987_v39 }
 0x475   :  { %v7128_v13 = vpop.f32.mrb[76].mxu1 }
 0x476   :  { %v9564_v22 = vadd.f32 %v7047_v50, %v6989_v11  ;;  %v7129_v7 = vpop.f32.mrb[77].mxu1 }
 0x477   :  { %v7130_v19 = vadd.f32 %v7129_v7, %v7128_v13  ;;  %v7131_v52 = vpop.f32.mrb[78].mxu1 }
 0x478   :  { %v7064_v40 = vpop.f32.mrb[72].mxu0  ;;  %v7132_v46 = vpop.f32.mrb[79].mxu1 }
 0x479   :  { %v7065_v38 = vpop.f32.mrb[73].mxu0  ;;  %v7133_v47 = vadd.f32 %v7132_v46, %v7131_v52 }
 0x47a   :  { %v7066_v15 = vadd.f32 %v7065_v38, %v7064_v40  ;;  %v7067_v26 = vpop.f32.mrb[74].mxu0 }
 0x47b   :  { %v7068_v62 = vpop.f32.mrb[75].mxu0 }
 0x47c   :  { %v3248_v59 = vadd.f32 %v7066_v15, %v9452_v24  ;;  %v7069_v58 = vadd.f32 %v7068_v62, %v7067_v26  ;;  %v7862_v24 = vld [vmem:[%s10331_s5 + $0x1c0] sm:$0xff]  }
 0x47d   :  { %v7134_v49 = vpop.f32.mrb[80].mxu1  ;;  %7396 = vmatprep.subr.bf16.mxu0 %v7862_v24 }
 0x47e   :  { %v3249_v56 = vadd.f32 %v7069_v58, %v9454_v0  ;;  %v9568_v30 = vadd.f32 %v7124_v23, %v3248_v59  ;;  %v7135_v63 = vpop.f32.mrb[81].mxu1 }
 0x47f   :  { %v7136_v0 = vadd.f32 %v7135_v63, %v7134_v49  ;;  %v7137_v35 = vpop.f32.mrb[82].mxu1 }
 0x480   :  { %v7070_v5 = vpop.f32.mrb[76].mxu0  ;;  %v9573_v14 = vadd.f32 %v7127_v20, %v3249_v56  ;;  %v7138_v50 = vpop.f32.mrb[83].mxu1 }
 0x481   :  { %v7071_v57 = vpop.f32.mrb[77].mxu0  ;;  %v7139_v37 = vadd.f32 %v7138_v50, %v7137_v35 }
 0x482   :  { %v7072_v28 = vadd.f32 %v7071_v57, %v7070_v5  ;;  %v7073_v43 = vpop.f32.mrb[78].mxu0 }
 0x483   :  { %v7074_v61 = vpop.f32.mrb[79].mxu0 }
 0x484   :  { %v3250_v34 = vadd.f32 %v7072_v28, %v9465_v25  ;;  %v7075_v29 = vadd.f32 %v7074_v61, %v7073_v43 }
 0x485   :  { %v7140_v48 = vpop.f32.mrb[84].mxu1 }
 0x486   :  { %v3251_v10 = vadd.f32 %v7075_v29, %v9467_v9  ;;  %v9580_v27 = vadd.f32 %v7130_v19, %v3250_v34  ;;  %v7141_v23 = vpop.f32.mrb[85].mxu1 }
 0x487   :  { %v7143_v12 = vpop.f32.mrb[86].mxu1 }
 0x488   :  { %v7076_v51 = vpop.f32.mrb[80].mxu0  ;;  %v9582_v55 = vadd.f32 %v7133_v47, %v3251_v10  ;;  %v7144_v25 = vpop.f32.mrb[87].mxu1 }
 0x489   :  { %v7077_v39 = vpop.f32.mrb[81].mxu0 }
 0x48a   :  { %v7078_v4 = vadd.f32 %v7077_v39, %v7076_v51  ;;  %v7079_v54 = vpop.f32.mrb[82].mxu0 }
 0x48b   :  { %v7080_v11 = vpop.f32.mrb[83].mxu0 }
 0x48c   :  { %v3252_v20 = vadd.f32 %v7078_v4, %v9490_v44  ;;  %v7081_v40 = vadd.f32 %v7080_v11, %v7079_v54 }
 0x48d   :  { %v7146_v15 = vpop.f32.mrb[88].mxu1 }
 0x48e   :  { %v3253_v13 = vadd.f32 %v7081_v40, %v9492_v16  ;;  %v9586_v38 = vadd.f32 %v7136_v0, %v3252_v20  ;;  %v7147_v19 = vpop.f32.mrb[89].mxu1 }
 0x48f   :  { %v7148_v62 = vadd.f32 %v7147_v19, %v7146_v15  ;;  %v7149_v59 = vpop.f32.mrb[90].mxu1 }
 0x490   :  { %v7082_v9 = vpop.f32.mrb[84].mxu0  ;;  %v9588_v7 = vadd.f32 %v7139_v37, %v3253_v13  ;;  %v7150_v58 = vpop.f32.mrb[91].mxu1 }
 0x491   :  { %v7083_v26 = vpop.f32.mrb[85].mxu0  ;;  %v7151_v47 = vadd.f32 %v7150_v58, %v7149_v59 }
 0x492   :  { %v7085_v52 = vpop.f32.mrb[86].mxu0 }
 0x493   :  { %v7086_v46 = vpop.f32.mrb[87].mxu0 }
 0x495   :  { %v7152_v44 = vpop.f32.mrb[92].mxu1 }
 0x496   :  { %v7153_v5 = vpop.f32.mrb[93].mxu1 }
 0x497   :  { %v7154_v57 = vadd.f32 %v7153_v5, %v7152_v44  ;;  %v7155_v24 = vpop.f32.mrb[94].mxu1  ;;  %v9611_v44 = vld [vmem:[%s10335_s9 + $0x3] ss:$0 sm:$0xff] }
 0x498   :  { %v7088_v56 = vpop.f32.mrb[88].mxu0  ;;  %v7156_v43 = vpop.f32.mrb[95].mxu1 }
 0x499   :  { %v7089_v45 = vpop.f32.mrb[89].mxu0  ;;  %v7157_v35 = vadd.f32 %v7156_v43, %v7155_v24 }
 0x49a   :  { %v7090_v49 = vadd.f32 %v7089_v45, %v7088_v56  ;;  %v7091_v16 = vpop.f32.mrb[90].mxu0 }
 0x49b   :  { %v7092_v63 = vpop.f32.mrb[91].mxu0 }
 0x49c   :  { %v3256_v28 = vadd.f32 %v7090_v49, %v9530_v17  ;;  %v7093_v0 = vadd.f32 %v7092_v63, %v7091_v16 }
 0x49d   :  { %v7158_v37 = vpop.f32.mrb[96].mxu1 }
 0x49e   :  { %v3257_v61 = vadd.f32 %v7093_v0, %v9532_v36  ;;  %v9592_v34 = vadd.f32 %v7148_v62, %v3256_v28  ;;  %v7159_v51 = vpop.f32.mrb[97].mxu1 }
 0x49f   :  { %v7160_v23 = vadd.f32 %v7159_v51, %v7158_v37  ;;  %v7161_v4 = vpop.f32.mrb[98].mxu1 }
 0x4a0   :  { %v7094_v50 = vpop.f32.mrb[92].mxu0  ;;  %v9594_v29 = vadd.f32 %v7151_v47, %v3257_v61  ;;  %v7162_v12 = vpop.f32.mrb[99].mxu1 }
 0x4a1   :  { %v7095_v10 = vpop.f32.mrb[93].mxu0  ;;  %v7163_v20 = vadd.f32 %v7162_v12, %v7161_v4 }
 0x4a2   :  { %v7096_v48 = vadd.f32 %v7095_v10, %v7094_v50  ;;  %v7097_v39 = vpop.f32.mrb[94].mxu0 }
 0x4a3   :  { %v7098_v54 = vpop.f32.mrb[95].mxu0 }
 0x4a4   :  { %v3258_v17 = vadd.f32 %v7096_v48, %v9552_v32  ;;  %v7099_v11 = vadd.f32 %v7098_v54, %v7097_v39 }
 0x4a6   :  { %v3259_v36 = vadd.f32 %v7099_v11, %v9554_v3  ;;  %v9598_v25 = vadd.f32 %v7154_v57, %v3258_v17  ;;  %v3893_v11 = vld [vmem:[#allocation5] sm:$0xf0] }
 0x4a8   :  { %v7100_v40 = vpop.f32.mrb[96].mxu0  ;;  %v9600_v13 = vadd.f32 %v7157_v35, %v3259_v36 }
 0x4a9   :  { %v7101_v9 = vpop.f32.mrb[97].mxu0 }
 0x4aa   :  { %v7102_v15 = vadd.f32 %v7101_v9, %v7100_v40  ;;  %v7103_v26 = vpop.f32.mrb[98].mxu0 }
 0x4ab   :  { %v7104_v19 = vpop.f32.mrb[99].mxu0 }
 0x4ac   :  { %v3260_v52 = vadd.f32 %v7102_v15, %v9562_v21  ;;  %v7105_v62 = vadd.f32 %v7104_v19, %v7103_v26 }
 0x4ae   :  { %v3261_v59 = vadd.f32 %v7105_v62, %v9564_v22  ;;  %v9604_v32 = vadd.f32 %v7160_v23, %v3260_v52 }
 0x4b0   :  { %v7180_v46 = vpop.f32.mrb[100].mxu0  ;;  %v9606_v58 = vadd.f32 %v7163_v20, %v3261_v59 }
 0x4b1   :  { %v7181_v3 = vpop.f32.mrb[101].mxu0 }
 0x4b2   :  { %v7182_v47 = vadd.f32 %v7181_v3, %v7180_v46  ;;  %v7183_v56 = vpop.f32.mrb[102].mxu0 }
 0x4b3   :  { %v7184_v45 = vpop.f32.mrb[103].mxu0 }
 0x4b4   :  { %v3752_v5 = vadd.f32 %v7182_v47, %v9568_v30  ;;  %v7185_v21 = vadd.f32 %v7184_v45, %v7183_v56 }
 0x4b6   :  { %v3771_v49 = vadd.f32 %v9611_v44, %v3752_v5  ;;  %v3753_v22 = vadd.f32 %v7185_v21, %v9573_v14 }
 0x4b8   :  { %v3785_v16 = vmax.f32 %v3771_v49, 0.0  ;;  %v3772_v57 = vadd.f32 %v9611_v44, %v3753_v22  ;;  %v7186_v24 = vpop.f32.mrb[104].mxu0 }
 0x4b9   :  { %v7187_v63 = vpop.f32.mrb[105].mxu0 }
 0x4ba   :  { %v3786_v28 = vmax.f32 %v3772_v57, 0.0  ;;  %v7188_v43 = vadd.f32 %v7187_v63, %v7186_v24  ;;  %v7189_v0 = vpop.f32.mrb[106].mxu0  ;;  %v3799_v61 = vsel %vm8811_vm1, %v3785_v16, 0.0  ;;  %vm10454_vm1 = vmmov %vm10448_vm13 }
 0x4bb   :  { %v7190_v35 = vpop.f32.mrb[107].mxu0  ;;  %vm10460_vm14 = vmmov %vm10454_vm1 }
 0x4bc   :  { %v3800_v30 = vsel %vm8816_vm2, %v3786_v28, 0.0  ;;  %v3754_v50 = vadd.f32 %v7188_v43, %v9580_v27  ;;  %v7191_v37 = vadd.f32 %v7190_v35, %v7189_v0 }
 0x4bd   :  { %v3813_v10 = vpack.c.bf16 %v3800_v30, %v3799_v61 }
 0x4be   :  { %v3773_v14 = vadd.f32 %v9611_v44, %v3754_v50  ;;  %v3755_v51 = vadd.f32 %v7191_v37, %v9582_v55 }
 0x4bf   :  { %v3824_v48 = vshrl.u32 %v3813_v10, 16  ;;  %v3827_v39 = vshll.u32 %v3813_v10, 16 }
 0x4c0   :  { %v3787_v23 = vmax.f32 %v3773_v14, 0.0  ;;  %v3774_v4 = vadd.f32 %v9611_v44, %v3755_v51  ;;  %v7192_v54 = vpop.f32.mrb[108].mxu0 }
 0x4c1   :  { %v3826_v17 = vrot.slane %v3824_v48, 3  ;;  %v3829_v42 = vrot.slane %v3827_v39, 4  ;;  %v7193_v12 = vpop.f32.mrb[109].mxu0 }
 0x4c2   :  { %v3788_v53 = vmax.f32 %v3774_v4, 0.0  ;;  %v7194_v20 = vadd.f32 %v7193_v12, %v7192_v54  ;;  %v7195_v36 = vpop.f32.mrb[110].mxu0  ;;  %v3801_v9 = vsel %vm8830_vm9, %v3787_v23, 0.0 }
 0x4c3   :  { %v3830_v27 = vor.u32 %v3829_v42, %v3826_v17  ;;  %v7196_v40 = vpop.f32.mrb[111].mxu0 }
 0x4c4   :  { %v3802_v55 = vsel %vm8834_vm10, %v3788_v53, 0.0  ;;  %v3756_v15 = vadd.f32 %v7194_v20, %v9586_v38  ;;  %v7197_v26 = vadd.f32 %v7196_v40, %v7195_v36  ;;  %v7863_v53 = vld [vmem:[%s10331_s5 + $0x180] sm:$0xff]   ;;  %vm10457_vm10 = vmmov %vm10453_vm15 }
 0x4c5   :  { %v3894_v19 = vsel %vm8839_vm0, %v3830_v27, %v3893_v11  ;;  %v3814_v52 = vpack.c.bf16 %v3802_v55, %v3801_v9  ;;  %vm10452_vm0 = vsmask.f32 4352  ;;  %v7864_v9 = vld [vmem:[%s10331_s5 + $0x1c8] sm:$0xff]  }
 0x4c6   :  { %3895 = vst [vmem:[#allocation5] sm:$0xf0] %v3894_v19  ;;  %v3775_v62 = vadd.f32 %v9611_v44, %v3756_v15  ;;  %v3757_v59 = vadd.f32 %v7197_v26, %v9588_v7  ;;  %vm10455_vm2 = vmmov %vm10452_vm0 }
 0x4c7   :  { %v3832_v46 = vshrl.u32 %v3814_v52, 16  ;;  %v3835_v3 = vshll.u32 %v3814_v52, 16  ;;  %vm10456_vm9 = vmmov %vm10452_vm0 }
 0x4c8   :  { %v3789_v47 = vmax.f32 %v3775_v62, 0.0  ;;  %v3776_v2 = vadd.f32 %v9611_v44, %v3757_v59  ;;  %v7198_v56 = vpop.f32.mrb[112].mxu0 }
 0x4c9   :  { %v3834_v31 = vrot.slane %v3832_v46, 3  ;;  %v3837_v45 = vrot.slane %v3835_v3, 4  ;;  %v7199_v5 = vpop.f32.mrb[113].mxu0  ;;  %v7866_v56 = vld [vmem:[%s10331_s5 + $0x188] sm:$0xff]  }
 0x4ca   :  { %v3790_v38 = vmax.f32 %v3776_v2, 0.0  ;;  %v7201_v21 = vpop.f32.mrb[114].mxu0  ;;  %v3803_v22 = vsel %vm8849_vm4, %v3789_v47, 0.0  ;;  %vm10458_vm4 = vmmov %vm10457_vm10 }
 0x4cb   :  { %v3838_v49 = vor.u32 %v3837_v45, %v3834_v31  ;;  %v7202_v33 = vpop.f32.mrb[115].mxu0 }
 0x4cc   :  { %v3804_v16 = vsel %vm8854_vm7, %v3790_v38, 0.0  ;;  %vm10459_vm7 = vmmov %vm10451_vm11  ;;  %vm10466_vm11 = vnez %v10397_v8  ;;  %v7878_v8 = vld [vmem:[%s10331_s5 + $0x1e8] sm:$0xff]  }
 0x4cd   :  { %v9640_v7 = vsel %vm10452_vm0, %v3830_v27, %v3838_v49  ;;  %v3815_v57 = vpack.c.bf16 %v3804_v16, %v3803_v22  ;;  %v3908_v24 = vld [vmem:[#allocation5] sm:$0xff]  ;;  %vm10461_vm13 = vmmov %vm10459_vm7 }
 0x4ce   :  { %v9642_v63 = vld [vmem:[#allocation5] sm:$0xf0]  ;;  %3896 = vst [vmem:[#allocation5 + $0x8] sm:$0xff] %v9640_v7  ;;  %v3919_v28 = vshll.u32 %v3908_v24, 16  ;;  %v3924_v43 = vshll.u32 %v9640_v7, 16  ;;  %v4028_v61 = vrot.slane %v9640_v7, 3  ;;  %vm10462_vm6 = vmmov %vm10459_vm7 }
 0x4cf   :  { %v3841_v0 = vshrl.u32 %v3815_v57, 16  ;;  %v3844_v35 = vshll.u32 %v3815_v57, 16  ;;  %v4027_v18 = vrot.slane %v9642_v63, 3  ;;  %v3917_v30 = vshrl.u32 %v3908_v24, 16  ;;  %v4010_v37 = vld [vmem:[#allocation5] sm:$0xfe] }
 0x4d0   :  { %v7204_v1 = vpop.f32.mrb[116].mxu0  ;;  %v3921_v50 = vrot.slane %v3919_v28, 1  ;;  %v9650_v48 = vrot.slane %v3924_v43, 1  ;;  %v3928_v12 = vshrl.u32 %v9640_v7, 16  ;;  %v4082_v11 = vrot.slane %v4010_v37, 1 }
 0x4d1   :  { %v3843_v10 = vrot.slane %v3841_v0, 3  ;;  %v3846_v14 = vrot.slane %v3844_v35, 4  ;;  %v7205_v51 = vpop.f32.mrb[117].mxu0  ;;  %v4029_v54 = vsel %vm10453_vm15, %v4027_v18, %v4028_v61  ;;  %v4083_v40 = vrot.slane %v9640_v7, 1  ;;  %v9664_v55 = vld [vmem:[#allocation5] sm:$0xe0]  ;;  %vm10469_vm15 = vmmov %vm10455_vm2 }
 0x4d2   :  { %v7206_v39 = vadd.f32 %v7205_v51, %v7204_v1  ;;  %v7207_v23 = vpop.f32.mrb[118].mxu0  ;;  %v3922_v4 = vor.u32 %v3921_v50, %v3917_v30  ;;  %v4085_v19 = vrot.slane %v4029_v54, 1  ;;  %v4497_v31 = vshll.u32 %v9664_v55, 16  ;;  %v7857_v1 = vld [vmem:[%s10331_s5 + $0x100] sm:$0xff]   ;;  %v7858_v54 = vld [vmem:[%s10331_s5 + $0x148] sm:$0xff]  }
 0x4d3   :  { %v3847_v17 = vor.u32 %v3846_v14, %v3843_v10  ;;  %v7208_v42 = vpop.f32.mrb[119].mxu0 }
 0x4d4   :  { %v3760_v20 = vadd.f32 %v7206_v39, %v9592_v34  ;;  %v7209_v36 = vadd.f32 %v7208_v42, %v7207_v23  ;;  %v3927_v27 = vsel %vm10454_vm1, %v3922_v4, %v9650_v48  ;;  %v3930_v34 = vor.u32 %v3928_v12, %v9650_v48 }
 0x4d5   :  { %v9667_v15 = vsel %vm10455_vm2, %v3838_v49, %v3847_v17  ;;  %v9671_v26 = vsel %vm10456_vm9, %v3847_v17, %v8873_v60  ;;  %4435 = vmatprep.mubr.bf16.mxu0 %v3927_v27  ;;  %v7868_v49 = vld [vmem:[%s10331_s5 + $0x1d0] sm:$0xff]   ;;  %v7859_v27 = vld [vmem:[%s10331_s5 + $0x108] sm:$0xff]   ;;  %vm10470_vm2 = vmmov %vm10458_vm4 }
 0x4d6   :  { %v3779_v52 = vadd.f32 %v9611_v44, %v3760_v20  ;;  %v3761_v62 = vadd.f32 %v7209_v36, %v9594_v29  ;;  %4436 = vmatmul.mubr.bf16.vlgmr.msra.gmra.mrb[128].mxu0 %v3908_v24  ;;  %v3932_v59 = vshll.u32 %v9667_v15, 16  ;;  %v4030_v46 = vrot.slane %v9667_v15, 3  ;;  %v7869_v17 = vld [vmem:[%s10331_s5 + $0x190] sm:$0xff]   ;;  %vm10471_vm9 = vmmov %vm10454_vm1 }
 0x4d7   :  { %v3940_v3 = vshll.u32 %v9671_v26, 16  ;;  %v4032_v47 = vrot.slane %v9671_v26, 3  ;;  %v9681_v2 = vrot.slane %v9667_v15, 1  ;;  %7397 = vmatpush3.bf16.msra.mxu0 %v7863_v53  ;;  %v3936_v16 = vshrl.u32 %v9667_v15, 16 }
 0x4d8   :  { %v3793_v29 = vmax.f32 %v3779_v52, 0.0  ;;  %v3780_v45 = vadd.f32 %v9611_v44, %v3761_v62  ;;  %v7210_v5 = vpop.f32.mrb[120].mxu0  ;;  %v3934_v38 = vrot.slane %v3932_v59, 1  ;;  %v4031_v21 = vsel %vm10457_vm10, %v4028_v61, %v4030_v46  ;;  %7398 = vmatprep.subr.bf16.mxu0 %v7864_v9 }
 0x4d9   :  { %v7211_v33 = vpop.f32.mrb[121].mxu0  ;;  %v4086_v22 = vrot.slane %v4031_v21, 1  ;;  %v9698_v57 = vsel %vm10458_vm4, %v4030_v46, %v4032_v47  ;;  %v9702_v24 = vsel %vm10459_vm7, %v4083_v40, %v9681_v2  ;;  %v4084_v61 = vsel %vm10461_vm13, %v4082_v11, %v4083_v40  ;;  %v7874_v21 = vld [vmem:[%s10331_s5 + $0x1e0] sm:$0xff]   ;;  %vm10478_vm13 = vmmov %vm10469_vm15 }
 0x4da   :  { %v3794_v28 = vmax.f32 %v3780_v45, 0.0  ;;  %v7212_v0 = vadd.f32 %v7211_v33, %v7210_v5  ;;  %v7213_v35 = vpop.f32.mrb[122].mxu0  ;;  %v9705_v18 = vsel %vm10460_vm14, %v3930_v34, %v3934_v38  ;;  %v3938_v37 = vor.u32 %v3936_v16, %v3934_v38 }
 0x4db   :  { %v7214_v30 = vpop.f32.mrb[123].mxu0  ;;  %4443 = vmatprep.mubr.bf16.mxu0 %v9705_v18  ;;  %v4087_v50 = vsel %vm10462_vm6, %v4085_v19, %v4086_v22  ;;  %v3942_v10 = vrot.slane %v3940_v3, 1  ;;  %v4090_v14 = vrot.slane %v9698_v57, 1  ;;  %7399 = vmatpush3.bf16.msra.mxu0 %v7866_v56  ;;  %v3807_v51 = vsel %vm8894_vm3, %v3793_v29, 0.0  ;;  %vm10463_vm3 = vmmov %vm10462_vm6 }
 0x4dc   :  { %v3808_v39 = vsel %vm8898_vm8, %v3794_v28, 0.0  ;;  %v3762_v23 = vadd.f32 %v7212_v0, %v9598_v25  ;;  %v7215_v4 = vadd.f32 %v7214_v30, %v7213_v35  ;;  %4250 = vmatprep.mubr.bf16.mxu1 %v4087_v50  ;;  %7400 = vmatprep.subr.bf16.mxu0 %v7868_v49  ;;  %v9735_v25 = vrot.slane %v3928_v12, 4  ;;  %vm10464_vm8 = vmmov %vm10454_vm1  ;;  %v7865_v50 = vld [vmem:[%s10331_s5 + $0x158] sm:$0xff]  }
 0x4dd   :  { %v3817_v42 = vpack.c.bf16 %v3808_v39, %v3807_v51  ;;  %4251 = vmatmul.mubr.bf16.vlgmr.msra.gmra.mrb[100].mxu1 %v4084_v61  ;;  %v4091_v41 = vsel %vm10463_vm3, %v4086_v22, %v4090_v14  ;;  %v4499_v11 = vrot.slane %v4497_v31, 1  ;;  %v9741_v36 = vsel %vm10464_vm8, %v3938_v37, %v3942_v10  ;;  %v7873_v31 = vld [vmem:[%s10331_s5 + $0x198] sm:$0xff]   ;;  %vm10465_vm5 = vmmov %vm10463_vm3 }
 0x4de   :  { %v3781_v53 = vadd.f32 %v9611_v44, %v3762_v23  ;;  %v3763_v20 = vadd.f32 %v7215_v4, %v9600_v13  ;;  %4444 = vmatmul.mubr.bf16.gmra.mrb[132].mxu0 %v9640_v7  ;;  %7339 = vmatpush3.bf16.msra.mxu1 %v7857_v1  ;;  %v4092_v40 = vrot.slane %v9671_v26, 1  ;;  %v7860_v13 = vld [vmem:[%s10331_s5 + $0x150] sm:$0xff]   ;;  %v4611_v34 = vshrl.u32 %v9705_v18, 16  ;;  %v10467_v23 = vld [vmem:[#allocation20_spill] sm:$0xff]  ;;  %vm10472_vm10 = vmmov %vm10463_vm3 }
 0x4df   :  { %v3859_v9 = vshrl.u32 %v3817_v42, 16  ;;  %v3862_v12 = vshll.u32 %v3817_v42, 16  ;;  %4451 = vmatprep.mubr.bf16.mxu0 %v9741_v36  ;;  %4258 = vmatprep.mubr.bf16.mxu1 %v4091_v41  ;;  %v4614_v19 = vshll.u32 %v9705_v18, 16  ;;  %v3944_v56 = vshrl.u32 %v9671_v26, 16  ;;  %v7875_v42 = vld [vmem:[%s10331_s5 + $0x1a0] sm:$0xff]   ;;  %vm10477_vm14 = vmmov %vm10463_vm3 }
 0x4e0   :  { %v3795_v52 = vmax.f32 %v3781_v53, 0.0  ;;  %v3782_v62 = vadd.f32 %v9611_v44, %v3763_v20  ;;  %v7216_v46 = vpop.f32.mrb[124].mxu0  ;;  %7340 = vmatprep.subr.bf16.mxu1 %v7858_v54  ;;  %7401 = vmatpush3.bf16.msra.mxu0 %v7869_v17  ;;  %v4495_v29 = vshrl.u32 %v9664_v55, 16  ;;  %v4624_v49 = vshrl.u32 %v9741_v36, 16  ;;  %v7861_v55 = vld [vmem:[%s10331_s5 + $0x110] sm:$0xff]   ;;  %vm10479_vm6 = vmmov %vm10470_vm2 }
 0x4e1   :  { %v3861_v45 = vrot.slane %v3859_v9, 3  ;;  %v3864_v5 = vrot.slane %v3862_v12, 4  ;;  %v7217_v38 = vpop.f32.mrb[125].mxu0  ;;  %7402 = vmatprep.subr.bf16.mxu0 %v7871_v6  ;;  %v4627_v33 = vshll.u32 %v9741_v36, 16  ;;  %v3946_v35 = vor.u32 %v3944_v56, %v3942_v10 }
 0x4e2   :  { %v3796_v22 = vmax.f32 %v3782_v62, 0.0  ;;  %v7218_v28 = vadd.f32 %v7217_v38, %v7216_v46  ;;  %v7219_v0 = vpop.f32.mrb[126].mxu0  ;;  %7341 = vmatpush3.bf16.msra.mxu1 %v7859_v27  ;;  %v9773_v61 = vsel %vm10465_vm5, %v9681_v2, %v4092_v40  ;;  %v4613_v37 = vrot.slane %v4611_v34, 4  ;;  %v7867_v27 = vld [vmem:[%s10331_s5 + $0x118] sm:$0xff]   ;;  %vm10481_vm5 = vmmov %vm10454_vm1 }
 0x4e3   :  { %v9775_v1 = vor.u32 %v3864_v5, %v3861_v45  ;;  %v7220_v30 = vpop.f32.mrb[127].mxu0  ;;  %7342 = vmatprep.subr.bf16.mxu1 %v7860_v13  ;;  %v4616_v10 = vrot.slane %v4614_v19, 5  ;;  %v4500_v51 = vor.u32 %v4499_v11, %v4495_v29  ;;  %v3809_v39 = vsel %vm10466_vm11, %v3795_v52, 0.0  ;;  %vm10482_vm11 = vmmov %vm10463_vm3 }
 0x4e4   :  { %vm10468_vm0 = vnez %v10467_v23  ;;  %v3764_v54 = vadd.f32 %v7218_v28, %v9604_v32  ;;  %v7221_v17 = vadd.f32 %v7220_v30, %v7219_v0  ;;  %7403 = vmatpush3.bf16.msra.mxu0 %v7873_v31  ;;  %v9797_v32 = vrot.slane %v4624_v49, 4  ;;  %v7879_v31 = vld [vmem:[%s10331_s5 + $0x1a8] sm:$0xff]   ;;  %v7872_v49 = vld [vmem:[%s10331_s5 + $0x120] sm:$0xff]   ;;  %v7884_v23 = vld [vmem:[%s10331_s5 + $0x1f8] sm:$0xff]  }
 0x4e5   :  { %v3810_v4 = vsel %vm10468_vm0, %v3796_v22, 0.0  ;;  %v9791_v41 = vsel %vm10469_vm15, %v8873_v60, %v9775_v1  ;;  %4259 = vmatmul.mubr.bf16.gmra.mrb[104].mxu1 %v9702_v24  ;;  %7404 = vmatprep.subr.bf16.mxu0 %v7874_v21  ;;  %v9799_v11 = vrot.slane %v4627_v33, 5  ;;  %v4505_v34 = vsel %vm10454_vm1, %v4500_v51, %v9650_v48  ;;  %v7876_v0 = vld [vmem:[%s10331_s5 + $0x168] sm:$0xff]   ;;  %vm10484_vm15 = vmmov %vm10478_vm13 }
 0x4e6   :  { %v3818_v6 = vpack.c.bf16 %v3810_v4, %v3809_v39  ;;  %v3783_v53 = vadd.f32 %v9611_v44, %v3764_v54  ;;  %v3765_v20 = vadd.f32 %v7221_v17, %v9606_v58  ;;  %4452 = vmatmul.mubr.bf16.gmra.mrb[136].mxu0 %v9667_v15  ;;  %v3948_v60 = vshll.u32 %v9791_v41, 16  ;;  %7343 = vmatpush3.bf16.msra.mxu1 %v7861_v55  ;;  %v7870_v58 = vld [vmem:[%s10331_s5 + $0x160] sm:$0xff]  }
 0x4e7   :  { %v4034_v24 = vrot.slane %v9791_v41, 3  ;;  %7344 = vmatprep.subr.bf16.mxu1 %v7865_v50  ;;  %v4096_v13 = vrot.slane %v9791_v41, 1  ;;  %v9830_v5 = vor.u32 %v4616_v10, %v4613_v37  ;;  %v3952_v21 = vshrl.u32 %v9791_v41, 16  ;;  %v10473_v30 = vld [vmem:[#allocation21_spill] sm:$0xff]  ;;  %v10475_v50 = vld [vmem:[#allocation22_spill] sm:$0xff] }
 0x4e8   :  { %v3868_v9 = vshrl.u32 %v3818_v6, 16  ;;  %v3871_v12 = vshll.u32 %v3818_v6, 16  ;;  %v3797_v19 = vmax.f32 %v3783_v53, 0.0  ;;  %v3784_v52 = vadd.f32 %v9611_v44, %v3765_v20  ;;  %7405 = vmatpush3.bf16.msra.mxu0 %v7875_v42  ;;  %v7880_v44 = vld [vmem:[%s10331_s5 + $0x1f0] sm:$0xff]   ;;  %v7877_v42 = vld [vmem:[%s10331_s5 + $0x128] sm:$0xff]  }
 0x4e9   :  { %v3950_v62 = vrot.slane %v3948_v60, 1  ;;  %v9821_v46 = vsel %vm10470_vm2, %v4032_v47, %v4034_v24  ;;  %7406 = vmatprep.subr.bf16.mxu0 %v7878_v8  ;;  %v4599_v33 = vrot.slane %v3924_v43, 5  ;;  %v4606_v55 = vshll.u32 %v4505_v34, 16  ;;  %v7882_v20 = vld [vmem:[%s10331_s5 + $0x170] sm:$0xff]  }
 0x4ea   :  { %v3870_v29 = vrot.slane %v3868_v9, 3  ;;  %v3873_v45 = vrot.slane %v3871_v12, 4  ;;  %v4094_v48 = vrot.slane %v9821_v46, 1  ;;  %v3798_v38 = vmax.f32 %v3784_v52, 0.0  ;;  %7345 = vmatpush3.bf16.msra.mxu1 %v7867_v27 }
 0x4eb   :  { %v9833_v47 = vsel %vm10471_vm9, %v3946_v35, %v3950_v62  ;;  %7346 = vmatprep.subr.bf16.mxu1 %v7870_v58  ;;  %v4603_v35 = vshrl.u32 %v4505_v34, 16  ;;  %vm10474_vm4 = vnez %v10473_v30  ;;  %vm10476_vm7 = vnez %v10475_v50  ;;  %vm10488_vm9 = vmmov %vm10479_vm6 }
 0x4ec   :  { %v9841_v22 = vor.u32 %v3873_v45, %v3870_v29  ;;  %4459 = vmatprep.mubr.bf16.mxu0 %v9833_v47  ;;  %v4095_v28 = vsel %vm10472_vm10, %v4090_v14, %v4094_v48  ;;  %v3811_v43 = vsel %vm10474_vm4, %v3797_v19, 0.0  ;;  %v3812_v37 = vsel %vm10476_vm7, %v3798_v38, 0.0  ;;  %7407 = vmatpush3.bf16.msra.mxu0 %v7879_v31  ;;  %v7881_v14 = vld [vmem:[%s10331_s5 + $0x1b0] sm:$0xff]   ;;  %v3902_v29 = vld [vmem:[#allocation5 + $0x38] sm:$0xf]  ;;  %vm10489_vm10 = vmmov %vm10463_vm3 }
 0x4ed   :  { %4266 = vmatprep.mubr.bf16.mxu1 %v4095_v28  ;;  %v3954_v10 = vor.u32 %v3952_v21, %v3950_v62  ;;  %v9861_v57 = vsel %vm10477_vm14, %v4092_v40, %v4096_v13  ;;  %v3819_v39 = vpack.c.bf16 %v3812_v37, %v3811_v43  ;;  %7408 = vmatprep.subr.bf16.mxu0 %v7880_v44  ;;  %v4605_v40 = vrot.slane %v4603_v35, 4  ;;  %v10485_v43 = vld [vmem:[#allocation19_spill] sm:$0xff]  ;;  %vm10491_vm7 = vmmov %vm10481_vm5 }
 0x4ee   :  { %v9869_v51 = vsel %vm10478_vm13, %v9775_v1, %v9841_v22  ;;  %4267 = vmatmul.mubr.bf16.gmra.mrb[108].mxu1 %v9773_v61  ;;  %v4608_v4 = vrot.slane %v4606_v55, 5  ;;  %4460 = vmatmul.mubr.bf16.gmra.mrb[140].mxu0 %v9671_v26  ;;  %v4637_v6 = vshrl.u32 %v9833_v47, 16  ;;  %v9887_v9 = vor.u32 %v4599_v33, %v9735_v25  ;;  %v7885_v25 = vld [vmem:[%s10331_s5 + $0x1b8] sm:$0xff]   ;;  %vm10492_vm14 = vmmov %vm10463_vm3 }
 0x4ef   :  { %v3956_v54 = vshll.u32 %v9869_v51, 16  ;;  %v4036_v17 = vrot.slane %v9869_v51, 3  ;;  %7347 = vmatpush3.bf16.msra.mxu1 %v7872_v49  ;;  %v4100_v1 = vrot.slane %v9869_v51, 1  ;;  %v3877_v8 = vshrl.u32 %v3819_v39, 16 }
 0x4f0   :  { %v3880_v53 = vshll.u32 %v3819_v39, 16  ;;  %7348 = vmatprep.subr.bf16.mxu1 %v7876_v0  ;;  %v4609_v27 = vor.u32 %v4608_v4, %v4605_v40  ;;  %v3960_v34 = vshrl.u32 %v9869_v51, 16  ;;  %7409 = vmatpush3.bf16.msra.mxu0 %v7881_v14  ;;  %vm10480_vm8 = vsmask.f32 3328  ;;  %v7886_v0 = vld [vmem:[%s10331_s5 + $0x178] sm:$0xff]   ;;  %v7888_v39 = vld [vmem:[%s10331_s5 + $0x240] sm:$0xff]  }
 0x4f1   :  { %v3958_v12 = vrot.slane %v3956_v54, 1  ;;  %v9894_v58 = vsel %vm10479_vm6, %v4034_v24, %v4036_v17  ;;  %v9900_v19 = vsel %vm10463_vm3, %v4096_v13, %v4100_v1  ;;  %v3879_v52 = vrot.slane %v3877_v8, 3  ;;  %7410 = vmatprep.subr.bf16.mxu0 %v7884_v23  ;;  %v7883_v13 = vld [vmem:[%s10331_s5 + $0x130] sm:$0xff]   ;;  %vm10483_vm0 = vmmov %vm10480_vm8 }
 0x4f2   :  { %v3882_v62 = vrot.slane %v3880_v53, 4  ;;  %v4098_v31 = vrot.slane %v9894_v58, 1  ;;  %v9908_v24 = vsel %vm10480_vm8, %v4609_v27, %v9830_v5  ;;  %v4639_v44 = vrot.slane %v4637_v6, 4  ;;  %vm10487_vm2 = vmmov %vm10483_vm0 }
 0x4f3   :  { %v9911_v45 = vsel %vm10481_vm5, %v3954_v10, %v3958_v12  ;;  %7349 = vmatpush3.bf16.msra.mxu1 %v7877_v42  ;;  %v4640_v38 = vshll.u32 %v9833_v47, 16  ;;  %v4630_v49 = vor.u32 %v9799_v11, %v9797_v32  ;;  %v4619_v35 = vrot.slane %v3936_v16, 4  ;;  %v7887_v10 = vld [vmem:[%s10331_s5 + $0x138] sm:$0xff]   ;;  %vm10490_vm4 = vmmov %vm10483_vm0 }
 0x4f4   :  { %v3883_v33 = vor.u32 %v3882_v62, %v3879_v52  ;;  %4467 = vmatprep.mubr.bf16.mxu0 %v9911_v45  ;;  %v4099_v28 = vsel %vm10482_vm11, %v4094_v48, %v4098_v31  ;;  %7350 = vmatprep.subr.bf16.mxu1 %v7882_v20  ;;  %v4620_v55 = vrot.slane %v3932_v59, 5  ;;  %v4650_v46 = vshrl.u32 %v9911_v45, 16  ;;  %vm10493_vm13 = vmmov %vm10483_vm0 }
 0x4f5   :  { %4274 = vmatprep.mubr.bf16.mxu1 %v4099_v28  ;;  %7411 = vmatpush3.bf16.msra.mxu0 %v7885_v25  ;;  %v4642_v32 = vrot.slane %v4640_v38, 5  ;;  %v9932_v11 = vsel %vm10483_vm0, %v9830_v5, %v4630_v49  ;;  %v4653_v48 = vshll.u32 %v9911_v45, 16  ;;  %vm10486_vm1 = vnez %v10485_v43  ;;  %vm10494_vm6 = vmmov %vm10483_vm0  ;;  %v7903_v28 = vld [vmem:[%s10331_s5 + $0x238] sm:$0xff]  }
 0x4f6   :  { %v9938_v30 = vsel %vm10484_vm15, %v9841_v22, %v3883_v33  ;;  %v3903_v16 = vsel %vm10486_vm1, %v3883_v33, %v3902_v29  ;;  %4275 = vmatmul.mubr.bf16.gmra.mrb[112].mxu1 %v9861_v57  ;;  %v3962_v59 = vor.u32 %v3960_v34, %v3958_v12  ;;  %v4621_v50 = vor.u32 %v4620_v55, %v4619_v35  ;;  %vm10496_vm3 = vmmov %vm10483_vm0 }
 0x4f7   :  { %3901 = vst [vmem:[#allocation5 + $0x30] sm:$0xff] %v9938_v30  ;;  %3904 = vst [vmem:[#allocation5 + $0x38] sm:$0xf] %v3903_v16  ;;  %4468 = vmatmul.mubr.bf16.gmra.mrb[144].mxu0 %v9791_v41  ;;  %v3964_v5 = vshll.u32 %v9938_v30, 16  ;;  %v4038_v37 = vrot.slane %v9938_v30, 3  ;;  %v9950_v22 = vrot.slane %v9938_v30, 1  ;;  %7351 = vmatpush3.bf16.msra.mxu1 %v7883_v13  ;;  %v4643_v42 = vor.u32 %v4642_v32, %v4639_v44 }
 0x4f8   :  { %v4632_v14 = vrot.slane %v3944_v56, 4  ;;  %7352 = vmatprep.subr.bf16.mxu1 %v7886_v0  ;;  %v9962_v23 = vsel %vm10487_vm2, %v9887_v9, %v4621_v50  ;;  %v4652_v40 = vrot.slane %v4650_v46, 4  ;;  %v4655_v4 = vrot.slane %v4653_v48, 5  ;;  %vm10497_vm8 = vmmov %vm10488_vm9 }
 0x4f9   :  { %v3966_v6 = vrot.slane %v3964_v5, 1  ;;  %v4039_v8 = vsel %vm10488_vm9, %v4036_v17, %v4038_v37  ;;  %v9971_v56 = vsel %vm10489_vm10, %v4100_v1, %v9950_v22  ;;  %v4633_v53 = vrot.slane %v3940_v3, 5  ;;  %vm10498_vm5 = vmmov %vm10483_vm0 }
 0x4fa   :  { %v4102_v20 = vrot.slane %v4039_v8, 1  ;;  %v9976_v27 = vsel %vm10490_vm4, %v4630_v49, %v4643_v42  ;;  %v4656_v12 = vor.u32 %v4655_v4, %v4652_v40  ;;  %v4645_v58 = vrot.slane %v3952_v21, 4  ;;  %vm10500_vm11 = vmmov %vm10489_vm10 }
 0x4fb   :  { %v9981_v25 = vsel %vm10491_vm7, %v3962_v59, %v3966_v6  ;;  %v3968_v17 = vshrl.u32 %v9938_v30, 16  ;;  %7353 = vmatpush3.bf16.msra.mxu1 %v7887_v10  ;;  %v4634_v52 = vor.u32 %v4633_v53, %v4632_v14  ;;  %v4646_v1 = vrot.slane %v3948_v60, 5  ;;  %vm10501_vm15 = vmmov %vm10489_vm10 }
 0x4fc   :  { %4475 = vmatprep.mubr.bf16.mxu0 %v9981_v25  ;;  %v4103_v3 = vsel %vm10492_vm14, %v4098_v31, %v4102_v20  ;;  %7454 = vmatprep.subr.bf16.mxu1 %v7888_v39  ;;  %v4663_v62 = vshrl.u32 %v9981_v25, 16  ;;  %v4666_v29 = vshll.u32 %v9981_v25, 16  ;;  %v9991_v21 = vsel %vm10493_vm13, %v4643_v42, %v4656_v12  ;;  %vm10502_vm1 = vmmov %vm10491_vm7 }
 0x4fd   :  { %4282 = vmatprep.mubr.bf16.mxu1 %v4103_v3  ;;  %v9994_v13 = vsel %vm10494_vm6, %v4621_v50, %v4634_v52  ;;  %v4647_v44 = vor.u32 %v4646_v1, %v4645_v58  ;;  %v4658_v60 = vrot.slane %v3960_v34, 4  ;;  %v4659_v38 = vrot.slane %v3956_v54, 5  ;;  %vm10503_vm2 = vmmov %vm10483_vm0 }
 0x4fe   :  { %v3905_v31 = vld [vmem:[#allocation5 + $0x38] sm:$0xf8]  ;;  %4283 = vmatmul.mubr.bf16.gmra.mrb[116].mxu1 %v9900_v19  ;;  %v10001_v49 = vor.u32 %v3968_v17, %v3966_v6  ;;  %v4018_v33 = vld [vmem:[#allocation5 + $0x38] sm:$0x7]  ;;  %v4665_v55 = vrot.slane %v4663_v62, 4  ;;  %v4668_v32 = vrot.slane %v4666_v29, 5  ;;  %vm10504_vm9 = vmmov %vm10483_vm0 }
 0x4ff   :  { %v3906_v0 = vsel %vm9280_vm12, 0, %v3905_v31  ;;  %4476 = vmatmul.mubr.bf16.gmra.mrb[148].mxu0 %v9869_v51  ;;  %v4040_v35 = vrot.slane %v4018_v33, 3  ;;  %v10008_v34 = vsel %vm10496_vm3, %v4634_v52, %v4647_v44  ;;  %v4660_v54 = vor.u32 %v4659_v38, %v4658_v60  ;;  %vm10499_vm12 = vmmov %vm10483_vm0  ;;  %v7900_v38 = vld [vmem:[%s10331_s5 + $0x270] sm:$0xff]  }
 0x500   :  { %3907 = vst [vmem:[#allocation5 + $0x38] sm:$0xf8] %v3906_v0  ;;  %4483 = vmatprep.mubr.bf16.mxu0 %v10001_v49  ;;  %v4671_v46 = vrot.slane %v3968_v17, 4  ;;  %v4672_v48 = vrot.slane %v3964_v5, 5  ;;  %v4669_v16 = vor.u32 %v4668_v32, %v4665_v55  ;;  %v3914_v5 = vld [vmem:[#allocation5 + $0x30] sm:$0x7f]  ;;  %vm10505_vm10 = vmmov %vm10502_vm1 }
 0x501   :  { %v4041_v43 = vsel %vm10497_vm8, %v4038_v37, %v4040_v35  ;;  %v10012_v50 = vsel %vm10498_vm5, %v4647_v44, %v4660_v54  ;;  %v4591_v6 = vshrl.u32 %v9642_v63, 16  ;;  %v4594_v8 = vshll.u32 %v9642_v63, 16  ;;  %v7889_v44 = vld [vmem:[%s10331_s5 + $0x200] sm:$0xff]   ;;  %vm10506_vm4 = vmmov %vm10483_vm0 }
 0x502   :  { %v4106_v59 = vrot.slane %v4041_v43, 1  ;;  %v10014_v10 = vor.u32 %v4672_v48, %v4671_v46  ;;  %v10017_v14 = vsel %vm10499_vm12, %v4656_v12, %v4669_v16  ;;  %vm10507_vm7 = vmmov %vm10483_vm0  ;;  %vm5523_vm13 = vcmask 1041409  }
 0x503   :  { %v4593_v58 = vrot.slane %v4591_v6, 4  ;;  %v4596_v17 = vrot.slane %v4594_v8, 5  ;;  %vm10508_vm14 = vmmov %vm10500_vm11  ;;  %vm10509_vm6 = vsmask.f32 1280  ;;  %vm5526_vm8 = vcmask 1042434  }
 0x504   :  { %v4107_v39 = vsel %vm10500_vm11, %v4102_v20, %v4106_v59  ;;  %v10022_v40 = vsel %vm10483_vm0, %v4660_v54, %v10014_v10  ;;  %vm10241_vm3 = vmand %vm5523_vm13, %vm10509_vm6  ;;  %vm10515_vm11 = vsmask.f32 2304 }
 0x505   :  { %4290 = vmatprep.mubr.bf16.mxu1 %v4107_v39  ;;  %v4597_v62 = vor.u32 %v4596_v17, %v4593_v58  ;;  %vm5527_vm0 = vmand %vm5526_vm8, %vm10515_vm11 }
 0x506   :  { %4291 = vmatmul.mubr.bf16.gmra.mrb[120].mxu1 %v9971_v56 }
 0x507   :  { %4484 = vmatmul.mubr.bf16.gmra.mrb[152].mxu0 %v3914_v5  ;;  %4298 = vmatprep.mubr.bf16.mxu1 %v4106_v59  ;;  %v10025_v37 = vld [vmem:[#allocation5 + $0x38] sm:$0xff] }
 0x508   :  { %v10027_v4 = vld [vmem:[#allocation5 + $0x38] sm:$0xf]  ;;  %5088 = vmatprep.mubr.bf16.mxu0 %v9705_v18  ;;  %v10034_v53 = vrot.slane %v10025_v37, 1  ;;  %v4917_v55 = vshrl.u32 %v10025_v37, 16 }
 0x509   :  { %v4550_v42 = vshll.u32 %v10027_v4, 16  ;;  %v4910_v48 = vld [vmem:[#allocation5 + $0x38] sm:$0x7f] }
 0x50a   :  { %v10041_v12 = vsel %vm10501_vm15, %v9950_v22, %v10034_v53  ;;  %vm5529_vm15 = vcmask 1043459  }
 0x50b   :  { %v4552_v20 = vrot.slane %v4550_v42, 1  ;;  %v4685_v46 = vrot.slane %v4550_v42, 5 }
 0x50d   :  { %v4553_v18 = vsel %vm10502_vm1, %v10001_v49, %v4552_v20 }
 0x50e   :  { %v4676_v52 = vshrl.u32 %v4553_v18, 16  ;;  %v4679_v1 = vshll.u32 %v4553_v18, 16  ;;  %4299 = vmatmul.mubr.bf16.gmra.mrb[124].mxu1 %v9950_v22  ;;  %v4601_v22 = vsel %vm10504_vm9, %v4597_v62, %v9887_v9  ;;  %v7892_v9 = vld [vmem:[%s10331_s5 + $0x250] sm:$0xff]   ;;  %vm10265_vm9 = vmand %vm5529_vm15, %vm10503_vm2 }
 0x50f   :  { %5089 = vmatmul.mubr.bf16.vlgmr.msra.gmra.mrb[156].mxu0 %v9640_v7  ;;  %4839 = vmatprep.mubr.bf16.mxu1 %v9908_v24  ;;  %v7890_v7 = vld [vmem:[%s10331_s5 + $0x248] sm:$0xff]   ;;  %v7894_v24 = vld [vmem:[%s10331_s5 + $0x258] sm:$0xff]  }
 0x510   :  { %v4678_v63 = vrot.slane %v4676_v52, 4  ;;  %v4681_v3 = vrot.slane %v4679_v1, 5  ;;  %5096 = vmatprep.mubr.bf16.mxu0 %v9741_v36  ;;  %v7891_v36 = vld [vmem:[%s10331_s5 + $0x208] sm:$0xff]  }
 0x512   :  { %v10049_v29 = vor.u32 %v4681_v3, %v4678_v63 }
 0x514   :  { %v4683_v60 = vsel %vm10503_vm2, %v4669_v16, %v10049_v29  ;;  %v5159_v16 = vld [vmem:[#allocation5 + $0x8] sm:$0xfe] }
 0x516   :  { %4840 = vmatmul.mubr.bf16.vlgmr.msra.gmra.mrb[128].mxu1 %v4601_v22 }
 0x517   :  { %5097 = vmatmul.mubr.bf16.gmra.mrb[160].mxu0 %v9667_v15  ;;  %7455 = vmatpush3.bf16.msra.mxu1 %v7889_v44  ;;  %v7893_v15 = vld [vmem:[%s10331_s5 + $0x210] sm:$0xff]  }
 0x518   :  { %5104 = vmatprep.mubr.bf16.mxu0 %v9833_v47  ;;  %4847 = vmatprep.mubr.bf16.mxu1 %v9932_v11  ;;  %v7895_v47 = vld [vmem:[%s10331_s5 + $0x218] sm:$0xff]   ;;  %v7896_v11 = vld [vmem:[%s10331_s5 + $0x260] sm:$0xff]  }
 0x519   :  { %7456 = vmatprep.subr.bf16.mxu1 %v7890_v7 }
 0x51b   :  { %7457 = vmatpush3.bf16.msra.mxu1 %v7891_v36 }
 0x51c   :  { %7458 = vmatprep.subr.bf16.mxu1 %v7892_v9 }
 0x51e   :  { %4848 = vmatmul.mubr.bf16.gmra.mrb[132].mxu1 %v9962_v23  ;;  %v7897_v23 = vld [vmem:[%s10331_s5 + $0x220] sm:$0xff]  }
 0x51f   :  { %5105 = vmatmul.mubr.bf16.gmra.mrb[164].mxu0 %v9671_v26  ;;  %4855 = vmatprep.mubr.bf16.mxu1 %v9976_v27  ;;  %v7898_v26 = vld [vmem:[%s10331_s5 + $0x268] sm:$0xff]  }
 0x520   :  { %5112 = vmatprep.mubr.bf16.mxu0 %v9911_v45  ;;  %7459 = vmatpush3.bf16.msra.mxu1 %v7893_v15  ;;  %v4913_v45 = vshll.u32 %v10025_v37, 16  ;;  %v7899_v27 = vld [vmem:[%s10331_s5 + $0x228] sm:$0xff]  }
 0x521   :  { %7460 = vmatprep.subr.bf16.mxu1 %v7894_v24 }
 0x522   :  { %v4915_v31 = vrot.slane %v4913_v45, 1 }
 0x524   :  { %7461 = vmatpush3.bf16.msra.mxu1 %v7895_v47  ;;  %v4916_v33 = vsel %vm10505_vm10, %v10001_v49, %v4915_v31 }
 0x525   :  { %7462 = vmatprep.subr.bf16.mxu1 %v7896_v11 }
 0x526   :  { %4856 = vmatmul.mubr.bf16.gmra.mrb[136].mxu1 %v9994_v13 }
 0x527   :  { %5113 = vmatmul.mubr.bf16.gmra.mrb[168].mxu0 %v9791_v41  ;;  %4863 = vmatprep.mubr.bf16.mxu1 %v9991_v21  ;;  %v4554_v41 = vshrl.u32 %v10027_v4, 16  ;;  %v7901_v21 = vld [vmem:[%s10331_s5 + $0x230] sm:$0xff]  }
 0x528   :  { %5120 = vmatprep.mubr.bf16.mxu0 %v9981_v25  ;;  %7463 = vmatpush3.bf16.msra.mxu1 %v7897_v23  ;;  %v7902_v25 = vld [vmem:[%s10331_s5 + $0x278] sm:$0xff]  }
 0x529   :  { %7464 = vmatprep.subr.bf16.mxu1 %v7898_v26  ;;  %v4556_v13 = vor.u32 %v4554_v41, %v4552_v20  ;;  %v4684_v54 = vrot.slane %v4554_v41, 4 }
 0x52b   :  { %v4689_v0 = vshrl.u32 %v4556_v13, 16  ;;  %v4692_v35 = vshll.u32 %v4556_v13, 16  ;;  %v4686_v59 = vor.u32 %v4685_v46, %v4684_v54 }
 0x52c   :  { %7465 = vmatpush3.bf16.msra.mxu1 %v7899_v27 }
 0x52d   :  { %7466 = vmatprep.subr.bf16.mxu1 %v7900_v38  ;;  %v4691_v32 = vrot.slane %v4689_v0, 4 }
 0x52e   :  { %4864 = vmatmul.mubr.bf16.gmra.mrb[140].mxu1 %v10008_v34  ;;  %v4694_v34 = vrot.slane %v4692_v35, 5 }
 0x52f   :  { %5121 = vmatmul.mubr.bf16.gmra.mrb[172].mxu0 %v9869_v51  ;;  %4871 = vmatprep.mubr.bf16.mxu1 %v10017_v14  ;;  %v4919_v51 = vor.u32 %v4917_v55, %v4915_v31 }
 0x530   :  { %5128 = vmatprep.mubr.bf16.mxu0 %v4916_v33  ;;  %7467 = vmatpush3.bf16.msra.mxu1 %v7901_v21  ;;  %v4695_v49 = vor.u32 %v4694_v34, %v4691_v32 }
 0x531   :  { %7468 = vmatprep.subr.bf16.mxu1 %v7902_v25 }
 0x532   :  { %v4696_v43 = vsel %vm10506_vm4, %v10049_v29, %v4695_v49  ;;  %vm5600_vm4 = vsmask.f32 7938 }
 0x534   :  { %7469 = vmatpush3.bf16.msra.mxu1 %v7903_v28 }
 0x536   :  { %4872 = vmatmul.mubr.bf16.gmra.mrb[144].mxu1 %v10012_v50  ;;  %v5195_v50 = vrot.slane %v5159_v16, 1 }
 0x537   :  { %5129 = vmatmul.mubr.bf16.gmra.mrb[176].mxu0 %v9938_v30  ;;  %4879 = vmatprep.mubr.bf16.mxu1 %v4683_v60  ;;  %v4687_v30 = vsel %vm10507_vm7, %v10014_v10, %v4686_v59  ;;  %vm5602_vm7 = vsmask.f32 7942 }
 0x538   :  { %5136 = vmatprep.mubr.bf16.mxu0 %v4919_v51  ;;  %v5197_v14 = vsel %vm10508_vm14, %v5195_v50, %v9681_v2  ;;  %vm10520_vm14 = vcmask 1040384  }
 0x539   :  { %vm5601_vm6 = vmand %vm10520_vm14, %vm5600_vm4 }
 0x53e   :  { %4880 = vmatmul.mubr.bf16.gmra.mrb[148].mxu1 %v10022_v40 }
 0x53f   :  { %5137 = vmatmul.mubr.bf16.gmra.mrb[180].mxu0 %v4910_v48  ;;  %4887 = vmatprep.mubr.bf16.mxu1 %v4696_v43 }
 0x546   :  { %4888 = vmatmul.mubr.bf16.gmra.mrb[152].mxu1 %v4687_v30 }
 0x547   :  { %5343 = vmatprep.mubr.bf16.mxu1 %v5197_v14 }
 0x54e   :  { %5344 = vmatmul.mubr.bf16.vlgmr.msra.gmra.mrb[156].mxu1 %v5197_v14 }
 0x54f   :  { %5351 = vmatprep.mubr.bf16.mxu1 %v9773_v61 }
 0x556   :  { %5352 = vmatmul.mubr.bf16.gmra.mrb[160].mxu1 %v9773_v61 }
 0x557   :  { %5359 = vmatprep.mubr.bf16.mxu1 %v9861_v57 }
 0x55e   :  { %5360 = vmatmul.mubr.bf16.gmra.mrb[164].mxu1 %v9861_v57 }
 0x55f   :  { %5367 = vmatprep.mubr.bf16.mxu1 %v9900_v19 }
 0x566   :  { %5368 = vmatmul.mubr.bf16.gmra.mrb[168].mxu1 %v9900_v19 }
 0x567   :  { %5375 = vmatprep.mubr.bf16.mxu1 %v9971_v56 }
 0x56e   :  { %5376 = vmatmul.mubr.bf16.gmra.mrb[172].mxu1 %v9971_v56 }
 0x56f   :  { %5383 = vmatprep.mubr.bf16.mxu1 %v10041_v12 }
 0x576   :  { %5384 = vmatmul.mubr.bf16.gmra.mrb[176].mxu1 %v10041_v12 }
 0x577   :  { %5391 = vmatprep.mubr.bf16.mxu1 %v10034_v53 }
 0x57e   :  { %5392 = vmatmul.mubr.bf16.gmra.mrb[180].mxu1 %v10034_v53 }
 0x5a9   :  { %v7296_v2 = vpop.f32.mrb[128].mxu0 }
 0x5aa   :  { %v7297_v61 = vpop.f32.mrb[129].mxu0 }
 0x5ab   :  { %v7298_v10 = vadd.f32 %v7297_v61, %v7296_v2  ;;  %v7299_v57 = vpop.f32.mrb[130].mxu0 }
 0x5ac   :  { %v7300_v39 = vpop.f32.mrb[131].mxu0 }
 0x5ad   :  { %v7301_v40 = vadd.f32 %v7300_v39, %v7299_v57 }
 0x5b0   :  { %v7238_v5 = vpop.f32.mrb[100].mxu1 }
 0x5b1   :  { %v7302_v19 = vpop.f32.mrb[132].mxu0  ;;  %v7239_v37 = vpop.f32.mrb[101].mxu1 }
 0x5b2   :  { %v7303_v4 = vpop.f32.mrb[133].mxu0  ;;  %v7240_v42 = vadd.f32 %v7239_v37, %v7238_v5  ;;  %v7241_v56 = vpop.f32.mrb[102].mxu1 }
 0x5b3   :  { %v7304_v6 = vadd.f32 %v7303_v4, %v7302_v19  ;;  %v7305_v8 = vpop.f32.mrb[134].mxu0  ;;  %v7242_v20 = vpop.f32.mrb[103].mxu1 }
 0x5b4   :  { %v10142_v12 = vadd.f32 %v7298_v10, %v7240_v42  ;;  %v7306_v18 = vpop.f32.mrb[135].mxu0  ;;  %v7243_v58 = vadd.f32 %v7242_v20, %v7241_v56 }
 0x5b5   :  { %v7307_v53 = vadd.f32 %v7306_v18, %v7305_v8 }
 0x5b6   :  { %v10144_v17 = vadd.f32 %v7301_v40, %v7243_v58 }
 0x5b8   :  { %v7244_v52 = vpop.f32.mrb[104].mxu1 }
 0x5b9   :  { %v7308_v1 = vpop.f32.mrb[136].mxu0  ;;  %v7245_v63 = vpop.f32.mrb[105].mxu1 }
 0x5ba   :  { %v7309_v3 = vpop.f32.mrb[137].mxu0  ;;  %v7246_v62 = vadd.f32 %v7245_v63, %v7244_v52  ;;  %v7247_v29 = vpop.f32.mrb[106].mxu1 }
 0x5bb   :  { %v7310_v44 = vadd.f32 %v7309_v3, %v7308_v1  ;;  %v7311_v60 = vpop.f32.mrb[138].mxu0  ;;  %v7248_v22 = vpop.f32.mrb[107].mxu1 }
 0x5bc   :  { %v10146_v7 = vadd.f32 %v7304_v6, %v7246_v62  ;;  %v7312_v36 = vpop.f32.mrb[139].mxu0  ;;  %v7249_v9 = vadd.f32 %v7248_v22, %v7247_v29 }
 0x5bd   :  { %v7313_v15 = vadd.f32 %v7312_v36, %v7311_v60  ;;  %v7904_v36 = vld [vmem:[#allocation7 + $0x40] sm:$0xff]  }
 0x5be   :  { %v10148_v24 = vadd.f32 %v7307_v53, %v7249_v9  ;;  %v7905_v9 = vld [vmem:[#allocation7] sm:$0xff]   ;;  %7512 = vmatprep.subr.bf16.mxu0 %v7904_v36 }
 0x5bf   :  { %7513 = vmatpush3.bf16.msra.mxu0 %v7905_v9 }
 0x5c1   :  { %v7250_v47 = vpop.f32.mrb[108].mxu1  ;;  %v7314_v11 = vpop.f32.mrb[140].mxu0 }
 0x5c2   :  { %v7251_v23 = vpop.f32.mrb[109].mxu1  ;;  %v7315_v26 = vpop.f32.mrb[141].mxu0 }
 0x5c3   :  { %v7252_v45 = vadd.f32 %v7251_v23, %v7250_v47  ;;  %v7253_v27 = vpop.f32.mrb[110].mxu1  ;;  %v7316_v38 = vadd.f32 %v7315_v26, %v7314_v11  ;;  %v7317_v31 = vpop.f32.mrb[142].mxu0  ;;  %v7907_v23 = vld [vmem:[#allocation7 + $0x80] sm:$0xff]  }
 0x5c4   :  { %v7254_v41 = vpop.f32.mrb[111].mxu1  ;;  %v7318_v25 = vpop.f32.mrb[143].mxu0 }
 0x5c5   :  { %v10150_v21 = vadd.f32 %v7310_v44, %v7252_v45  ;;  %v7255_v13 = vadd.f32 %v7254_v41, %v7253_v27  ;;  %v7319_v33 = vadd.f32 %v7318_v25, %v7317_v31 }
 0x5c7   :  { %v10152_v28 = vadd.f32 %v7313_v15, %v7255_v13  ;;  %v7906_v15 = vld [vmem:[#allocation7 + $0xc0] sm:$0xff]  }
 0x5c8   :  { %7534 = vmatprep.subr.bf16.mxu1 %v7906_v15  ;;  %v7926_v15 = vld [vmem:[#allocation7 + $0xe8] sm:$0xff]  }
 0x5c9   :  { %v7256_v0 = vpop.f32.mrb[112].mxu1  ;;  %7535 = vmatpush3.bf16.msra.mxu1 %v7907_v23 }
 0x5ca   :  { %v7320_v35 = vpop.f32.mrb[144].mxu0  ;;  %v7257_v55 = vpop.f32.mrb[113].mxu1 }
 0x5cb   :  { %v7321_v51 = vpop.f32.mrb[145].mxu0  ;;  %v7258_v32 = vadd.f32 %v7257_v55, %v7256_v0  ;;  %v7259_v34 = vpop.f32.mrb[114].mxu1  ;;  %v7908_v55 = vld [vmem:[#allocation7 + $0x48] sm:$0xff]  }
 0x5cc   :  { %v7322_v49 = vadd.f32 %v7321_v51, %v7320_v35  ;;  %v7323_v54 = vpop.f32.mrb[146].mxu0  ;;  %v7260_v46 = vpop.f32.mrb[115].mxu1  ;;  %v7909_v51 = vld [vmem:[#allocation7 + $0x8] sm:$0xff]   ;;  %7514 = vmatprep.subr.bf16.mxu0 %v7908_v55  ;;  %v7930_v55 = vld [vmem:[#allocation7 + $0xf0] sm:$0xff]  }
 0x5cd   :  { %v10154_v48 = vadd.f32 %v7316_v38, %v7258_v32  ;;  %v7324_v43 = vpop.f32.mrb[147].mxu0  ;;  %v7261_v16 = vadd.f32 %v7260_v46, %v7259_v34  ;;  %v7910_v32 = vld [vmem:[#allocation7 + $0xc8] sm:$0xff]   ;;  %v7914_v46 = vld [vmem:[#allocation7 + $0xd0] sm:$0xff]   ;;  %7515 = vmatpush3.bf16.msra.mxu0 %v7909_v51 }
 0x5ce   :  { %v7325_v59 = vadd.f32 %v7324_v43, %v7323_v54  ;;  %v7911_v34 = vld [vmem:[#allocation7 + $0x88] sm:$0xff]   ;;  %7536 = vmatprep.subr.bf16.mxu1 %v7910_v32 }
 0x5cf   :  { %v10156_v50 = vadd.f32 %v7319_v33, %v7261_v16  ;;  %7537 = vmatpush3.bf16.msra.mxu1 %v7911_v34 }
 0x5d0   :  { %7538 = vmatprep.subr.bf16.mxu1 %v7914_v46 }
 0x5d1   :  { %v7262_v30 = vpop.f32.mrb[116].mxu1 }
 0x5d2   :  { %v7326_v14 = vpop.f32.mrb[148].mxu0  ;;  %v7263_v2 = vpop.f32.mrb[117].mxu1 }
 0x5d3   :  { %v7327_v61 = vpop.f32.mrb[149].mxu0  ;;  %v7264_v10 = vadd.f32 %v7263_v2, %v7262_v30  ;;  %v7265_v57 = vpop.f32.mrb[118].mxu1  ;;  %v7915_v30 = vld [vmem:[#allocation7 + $0x90] sm:$0xff]  }
 0x5d4   :  { %v7328_v39 = vadd.f32 %v7327_v61, %v7326_v14  ;;  %v7329_v40 = vpop.f32.mrb[150].mxu0  ;;  %v7266_v5 = vpop.f32.mrb[119].mxu1  ;;  %7539 = vmatpush3.bf16.msra.mxu1 %v7915_v30 }
 0x5d5   :  { %v10158_v19 = vadd.f32 %v7322_v49, %v7264_v10  ;;  %v7330_v37 = vpop.f32.mrb[151].mxu0  ;;  %v7267_v4 = vadd.f32 %v7266_v5, %v7265_v57  ;;  %v7912_v49 = vld [vmem:[#allocation7 + $0x50] sm:$0xff]   ;;  %v7916_v10 = vld [vmem:[#allocation7 + $0x58] sm:$0xff]  }
 0x5d6   :  { %v7331_v42 = vadd.f32 %v7330_v37, %v7329_v40  ;;  %7516 = vmatprep.subr.bf16.mxu0 %v7912_v49  ;;  %v7918_v57 = vld [vmem:[#allocation7 + $0xd8] sm:$0xff]   ;;  %v7929_v49 = vld [vmem:[#allocation7 + $0x30] sm:$0xff]  }
 0x5d7   :  { %v10160_v56 = vadd.f32 %v7325_v59, %v7267_v4  ;;  %v7913_v59 = vld [vmem:[#allocation7 + $0x10] sm:$0xff]   ;;  %7540 = vmatprep.subr.bf16.mxu1 %v7918_v57 }
 0x5d8   :  { %7517 = vmatpush3.bf16.msra.mxu0 %v7913_v59  ;;  %v7934_v59 = vld [vmem:[#allocation7 + $0xf8] sm:$0xff]  }
 0x5d9   :  { %v7268_v6 = vpop.f32.mrb[120].mxu1  ;;  %7518 = vmatprep.subr.bf16.mxu0 %v7916_v10 }
 0x5da   :  { %v7332_v8 = vpop.f32.mrb[152].mxu0  ;;  %v7269_v20 = vpop.f32.mrb[121].mxu1 }
 0x5db   :  { %v7333_v18 = vpop.f32.mrb[153].mxu0  ;;  %v7270_v58 = vadd.f32 %v7269_v20, %v7268_v6  ;;  %v7271_v53 = vpop.f32.mrb[122].mxu1  ;;  %v7919_v20 = vld [vmem:[#allocation7 + $0x98] sm:$0xff]  }
 0x5dc   :  { %v7334_v52 = vadd.f32 %v7333_v18, %v7332_v8  ;;  %v7335_v1 = vpop.f32.mrb[154].mxu0  ;;  %v7272_v63 = vpop.f32.mrb[123].mxu1  ;;  %v7917_v8 = vld [vmem:[#allocation7 + $0x18] sm:$0xff]   ;;  %7541 = vmatpush3.bf16.msra.mxu1 %v7919_v20 }
 0x5dd   :  { %v10162_v3 = vadd.f32 %v7328_v39, %v7270_v58  ;;  %v7336_v62 = vpop.f32.mrb[155].mxu0  ;;  %v7273_v29 = vadd.f32 %v7272_v63, %v7271_v53  ;;  %v7920_v53 = vld [vmem:[#allocation7 + $0x60] sm:$0xff]   ;;  %7519 = vmatpush3.bf16.msra.mxu0 %v7917_v8 }
 0x5de   :  { %v7337_v44 = vadd.f32 %v7336_v62, %v7335_v1  ;;  %7520 = vmatprep.subr.bf16.mxu0 %v7920_v53 }
 0x5df   :  { %v10164_v60 = vadd.f32 %v7331_v42, %v7273_v29  ;;  %v7921_v29 = vld [vmem:[#allocation7 + $0x20] sm:$0xff]  }
 0x5e1   :  { %v7274_v22 = vpop.f32.mrb[124].mxu1  ;;  %7521 = vmatpush3.bf16.msra.mxu0 %v7921_v29 }
 0x5e2   :  { %v7412_v47 = vpop.f32.mrb[156].mxu0  ;;  %v7275_v11 = vpop.f32.mrb[125].mxu1 }
 0x5e3   :  { %v7413_v26 = vpop.f32.mrb[157].mxu0  ;;  %v7276_v45 = vadd.f32 %v7275_v11, %v7274_v22  ;;  %v7277_v27 = vpop.f32.mrb[126].mxu1 }
 0x5e4   :  { %v7414_v38 = vadd.f32 %v7413_v26, %v7412_v47  ;;  %v7415_v31 = vpop.f32.mrb[158].mxu0  ;;  %v7278_v41 = vpop.f32.mrb[127].mxu1 }
 0x5e5   :  { %v10166_v25 = vadd.f32 %v7334_v52, %v7276_v45  ;;  %v7416_v13 = vpop.f32.mrb[159].mxu0  ;;  %v7279_v33 = vadd.f32 %v7278_v41, %v7277_v27  ;;  %v7922_v52 = vld [vmem:[#allocation7 + $0xe0] sm:$0xff]   ;;  %v7927_v41 = vld [vmem:[#allocation7 + $0xa8] sm:$0xff]  }
 0x5e6   :  { %v7417_v0 = vadd.f32 %v7416_v13, %v7415_v31  ;;  %7542 = vmatprep.subr.bf16.mxu1 %v7922_v52  ;;  %v7925_v31 = vld [vmem:[#allocation7 + $0x28] sm:$0xff]  }
 0x5e7   :  { %v10168_v35 = vadd.f32 %v7337_v44, %v7279_v33  ;;  %v7923_v44 = vld [vmem:[#allocation7 + $0xa0] sm:$0xff]  }
 0x5e8   :  { %7543 = vmatpush3.bf16.msra.mxu1 %v7923_v44 }
 0x5e9   :  { %v7354_v54 = vpop.f32.mrb[128].mxu1  ;;  %7544 = vmatprep.subr.bf16.mxu1 %v7926_v15 }
 0x5ea   :  { %v7418_v43 = vpop.f32.mrb[160].mxu0  ;;  %v7355_v16 = vpop.f32.mrb[129].mxu1 }
 0x5eb   :  { %v7419_v14 = vpop.f32.mrb[161].mxu0  ;;  %v7356_v2 = vadd.f32 %v7355_v16, %v7354_v54  ;;  %v7357_v61 = vpop.f32.mrb[130].mxu1  ;;  %v7931_v54 = vld [vmem:[#allocation7 + $0xb0] sm:$0xff]  }
 0x5ec   :  { %v7420_v39 = vadd.f32 %v7419_v14, %v7418_v43  ;;  %v7421_v40 = vpop.f32.mrb[162].mxu0  ;;  %v7358_v5 = vpop.f32.mrb[131].mxu1  ;;  %7545 = vmatpush3.bf16.msra.mxu1 %v7927_v41 }
 0x5ed   :  { %v4896_v37 = vadd.f32 %v7356_v2, %v10142_v12  ;;  %v7422_v4 = vpop.f32.mrb[163].mxu0  ;;  %v7359_v42 = vadd.f32 %v7358_v5, %v7357_v61  ;;  %7546 = vmatprep.subr.bf16.mxu1 %v7930_v55  ;;  %v7935_v5 = vld [vmem:[#allocation7 + $0xb8] sm:$0xff]  }
 0x5ee   :  { %v7423_v6 = vadd.f32 %v7422_v4, %v7421_v40  ;;  %v7933_v40 = vld [vmem:[#allocation7 + $0x38] sm:$0xff]  }
 0x5ef   :  { %v4897_v18 = vadd.f32 %v7359_v42, %v10144_v17  ;;  %v10172_v58 = vadd.f32 %v7414_v38, %v4896_v37  ;;  %v7924_v17 = vld [vmem:[#allocation7 + $0x68] sm:$0xff]  }
 0x5f0   :  { %7522 = vmatprep.subr.bf16.mxu0 %v7924_v17  ;;  %7547 = vmatpush3.bf16.msra.mxu1 %v7931_v54 }
 0x5f1   :  { %v7360_v1 = vpop.f32.mrb[132].mxu1  ;;  %v10174_v63 = vadd.f32 %v7417_v0, %v4897_v18  ;;  %v7928_v0 = vld [vmem:[#allocation7 + $0x70] sm:$0xff]   ;;  %7523 = vmatpush3.bf16.msra.mxu0 %v7925_v31  ;;  %7548 = vmatprep.subr.bf16.mxu1 %v7934_v59  ;;  %v8053_v31 = vmov 0.0  }
 0x5f2   :  { %v7424_v62 = vpop.f32.mrb[164].mxu0  ;;  %v7361_v12 = vpop.f32.mrb[133].mxu1  ;;  %7524 = vmatprep.subr.bf16.mxu0 %v7928_v0 }
 0x5f3   :  { %v7425_v22 = vpop.f32.mrb[165].mxu0  ;;  %v7362_v36 = vadd.f32 %v7361_v12, %v7360_v1  ;;  %v7363_v9 = vpop.f32.mrb[134].mxu1 }
 0x5f4   :  { %v7426_v47 = vadd.f32 %v7425_v22, %v7424_v62  ;;  %v7427_v11 = vpop.f32.mrb[166].mxu0  ;;  %v7364_v23 = vpop.f32.mrb[135].mxu1  ;;  %7549 = vmatpush3.bf16.msra.mxu1 %v7935_v5 }
 0x5f5   :  { %v4898_v26 = vadd.f32 %v7362_v36, %v10146_v7  ;;  %v7428_v45 = vpop.f32.mrb[167].mxu0  ;;  %v7365_v27 = vadd.f32 %v7364_v23, %v7363_v9  ;;  %7525 = vmatpush3.bf16.msra.mxu0 %v7929_v49  ;;  %7658 = vmatprep.subr.bf16.mxu1 %v8053_v31 }
 0x5f6   :  { %v7429_v38 = vadd.f32 %v7428_v45, %v7427_v11 }
 0x5f7   :  { %v4899_v13 = vadd.f32 %v7365_v27, %v10148_v24  ;;  %v10178_v33 = vadd.f32 %v7420_v39, %v4898_v26  ;;  %v7932_v24 = vld [vmem:[#allocation7 + $0x78] sm:$0xff]  }
 0x5f8   :  { %7526 = vmatprep.subr.bf16.mxu0 %v7932_v24 }
 0x5f9   :  { %v7366_v51 = vpop.f32.mrb[136].mxu1  ;;  %v10180_v32 = vadd.f32 %v7423_v6, %v4899_v13  ;;  %7527 = vmatpush3.bf16.msra.mxu0 %v7933_v40 }
 0x5fa   :  { %v7430_v34 = vpop.f32.mrb[168].mxu0  ;;  %v7367_v7 = vpop.f32.mrb[137].mxu1  ;;  %7638 = vmatprep.subr.bf16.mxu0 %v8053_v31 }
 0x5fb   :  { %v7431_v46 = vpop.f32.mrb[169].mxu0  ;;  %v7368_v43 = vadd.f32 %v7367_v7, %v7366_v51  ;;  %v7369_v16 = vpop.f32.mrb[138].mxu1 }
 0x5fc   :  { %v7432_v30 = vadd.f32 %v7431_v46, %v7430_v34  ;;  %v7433_v14 = vpop.f32.mrb[170].mxu0  ;;  %v7370_v2 = vpop.f32.mrb[139].mxu1 }
 0x5fd   :  { %v4900_v61 = vadd.f32 %v7368_v43, %v10150_v21  ;;  %v7434_v10 = vpop.f32.mrb[171].mxu0  ;;  %v7371_v57 = vadd.f32 %v7370_v2, %v7369_v16 }
 0x5fe   :  { %v7435_v39 = vadd.f32 %v7434_v10, %v7433_v14 }
 0x5ff   :  { %v4901_v37 = vadd.f32 %v7371_v57, %v10152_v28  ;;  %v10184_v4 = vadd.f32 %v7426_v47, %v4900_v61 }
 0x601   :  { %v7372_v42 = vpop.f32.mrb[140].mxu1  ;;  %v10186_v6 = vadd.f32 %v7429_v38, %v4901_v37 }
 0x602   :  { %v7436_v8 = vpop.f32.mrb[172].mxu0  ;;  %v7373_v20 = vpop.f32.mrb[141].mxu1 }
 0x603   :  { %v7437_v21 = vpop.f32.mrb[173].mxu0  ;;  %v7374_v18 = vadd.f32 %v7373_v20, %v7372_v42  ;;  %v7375_v53 = vpop.f32.mrb[142].mxu1 }
 0x604   :  { %v7438_v52 = vadd.f32 %v7437_v21, %v7436_v8  ;;  %v7439_v1 = vpop.f32.mrb[174].mxu0  ;;  %v7376_v62 = vpop.f32.mrb[143].mxu1 }
 0x605   :  { %v4902_v12 = vadd.f32 %v7374_v18, %v10154_v48  ;;  %v7440_v28 = vpop.f32.mrb[175].mxu0  ;;  %v7377_v29 = vadd.f32 %v7376_v62, %v7375_v53 }
 0x606   :  { %v7441_v44 = vadd.f32 %v7440_v28, %v7439_v1  ;;  %v10217_v1 = vld [vmem:[%s10335_s9 + $0x4] ss:$0 sm:$0xff] }
 0x607   :  { %v4903_v22 = vadd.f32 %v7377_v29, %v10156_v50  ;;  %v10190_v36 = vadd.f32 %v7432_v30, %v4902_v12 }
 0x609   :  { %v7378_v9 = vpop.f32.mrb[144].mxu1  ;;  %v10192_v17 = vadd.f32 %v7435_v39, %v4903_v22 }
 0x60a   :  { %v7442_v15 = vpop.f32.mrb[176].mxu0  ;;  %v7379_v47 = vpop.f32.mrb[145].mxu1 }
 0x60b   :  { %v7443_v11 = vpop.f32.mrb[177].mxu0  ;;  %v7380_v23 = vadd.f32 %v7379_v47, %v7378_v9  ;;  %v7381_v26 = vpop.f32.mrb[146].mxu1 }
 0x60c   :  { %v7444_v45 = vadd.f32 %v7443_v11, %v7442_v15  ;;  %v7445_v27 = vpop.f32.mrb[178].mxu0  ;;  %v7382_v38 = vpop.f32.mrb[147].mxu1 }
 0x60d   :  { %v4904_v48 = vadd.f32 %v7380_v23, %v10158_v19  ;;  %v7446_v50 = vpop.f32.mrb[179].mxu0  ;;  %v7383_v41 = vadd.f32 %v7382_v38, %v7381_v26 }
 0x60e   :  { %v7447_v13 = vadd.f32 %v7446_v50, %v7445_v27 }
 0x60f   :  { %v4905_v0 = vadd.f32 %v7383_v41, %v10160_v56  ;;  %v10198_v55 = vadd.f32 %v7438_v52, %v4904_v48 }
 0x611   :  { %v7384_v51 = vpop.f32.mrb[148].mxu1  ;;  %v10200_v34 = vadd.f32 %v7441_v44, %v4905_v0 }
 0x612   :  { %v7448_v7 = vpop.f32.mrb[180].mxu0  ;;  %v7385_v49 = vpop.f32.mrb[149].mxu1 }
 0x613   :  { %v7449_v54 = vpop.f32.mrb[181].mxu0  ;;  %v7386_v46 = vadd.f32 %v7385_v49, %v7384_v51  ;;  %v7387_v43 = vpop.f32.mrb[150].mxu1 }
 0x614   :  { %v7450_v16 = vadd.f32 %v7449_v54, %v7448_v7  ;;  %v7451_v24 = vpop.f32.mrb[182].mxu0  ;;  %v7388_v59 = vpop.f32.mrb[151].mxu1 }
 0x615   :  { %v4906_v19 = vadd.f32 %v7386_v46, %v10162_v3  ;;  %v7452_v30 = vpop.f32.mrb[183].mxu0  ;;  %v7389_v14 = vadd.f32 %v7388_v59, %v7387_v43 }
 0x616   :  { %v7453_v2 = vadd.f32 %v7452_v30, %v7451_v24 }
 0x617   :  { %v4907_v56 = vadd.f32 %v7389_v14, %v10164_v60  ;;  %v10204_v61 = vadd.f32 %v7444_v45, %v4906_v19 }
 0x619   :  { %v7390_v10 = vpop.f32.mrb[152].mxu1  ;;  %v10206_v57 = vadd.f32 %v7447_v13, %v4907_v56 }
 0x61a   :  { %v7391_v39 = vpop.f32.mrb[153].mxu1 }
 0x61b   :  { %v7392_v40 = vadd.f32 %v7391_v39, %v7390_v10  ;;  %v7393_v5 = vpop.f32.mrb[154].mxu1 }
 0x61c   :  { %v7394_v37 = vpop.f32.mrb[155].mxu1 }
 0x61d   :  { %v4908_v42 = vadd.f32 %v7392_v40, %v10166_v25  ;;  %v7395_v8 = vadd.f32 %v7394_v37, %v7393_v5 }
 0x61f   :  { %v4909_v20 = vadd.f32 %v7395_v8, %v10168_v35  ;;  %v10210_v3 = vadd.f32 %v7450_v16, %v4908_v42 }
 0x621   :  { %v7470_v21 = vpop.f32.mrb[156].mxu1  ;;  %v10212_v18 = vadd.f32 %v7453_v2, %v4909_v20 }
 0x622   :  { %v7471_v60 = vpop.f32.mrb[157].mxu1 }
 0x623   :  { %v7472_v53 = vadd.f32 %v7471_v60, %v7470_v21  ;;  %v7473_v52 = vpop.f32.mrb[158].mxu1 }
 0x624   :  { %v7474_v62 = vpop.f32.mrb[159].mxu1 }
 0x625   :  { %v5400_v12 = vadd.f32 %v7472_v53, %v10172_v58  ;;  %v7475_v25 = vadd.f32 %v7474_v62, %v7473_v52 }
 0x627   :  { %v5419_v28 = vadd.f32 %v10217_v1, %v5400_v12  ;;  %v5401_v35 = vadd.f32 %v7475_v25, %v10174_v63 }
 0x629   :  { %v5420_v29 = vadd.f32 %v10217_v1, %v5401_v35  ;;  %v7476_v44 = vpop.f32.mrb[160].mxu1  ;;  %v5433_v9 = vmax.f32 %v5419_v28, 0.0 }
 0x62a   :  { %v7477_v22 = vpop.f32.mrb[161].mxu1 }
 0x62b   :  { %v5434_v15 = vmax.f32 %v5420_v29, 0.0  ;;  %v7478_v47 = vadd.f32 %v7477_v22, %v7476_v44  ;;  %v7479_v11 = vpop.f32.mrb[162].mxu1 }
 0x62c   :  { %v7480_v23 = vpop.f32.mrb[163].mxu1 }
 0x62d   :  { %v5447_v26 = vpack.c.bf16 %v5434_v15, %v5433_v9  ;;  %v5402_v45 = vadd.f32 %v7478_v47, %v10178_v33  ;;  %v7481_v27 = vadd.f32 %v7480_v23, %v7479_v11 }
 0x62f   :  { %5454 = vst [vmem:[#allocation2] sm:$0xff] %v5447_v26  ;;  %v5421_v58 = vadd.f32 %v10217_v1, %v5402_v45  ;;  %v5403_v38 = vadd.f32 %v7481_v27, %v10180_v32  ;;  %v8054_v26 = vmov 1966171168  }
 0x630   :  { %v5501_v45 = vunpack.c.l.s4 %v8054_v26 }
 0x631   :  { %v5422_v63 = vadd.f32 %v10217_v1, %v5403_v38  ;;  %v7482_v48 = vpop.f32.mrb[164].mxu1  ;;  %v5435_v41 = vmax.f32 %v5421_v58, 0.0 }
 0x632   :  { %v7483_v50 = vpop.f32.mrb[165].mxu1 }
 0x633   :  { %v5436_v13 = vmax.f32 %v5422_v63, 0.0  ;;  %v7484_v0 = vadd.f32 %v7483_v50, %v7482_v48  ;;  %v7485_v51 = vpop.f32.mrb[166].mxu1 }
 0x634   :  { %v7486_v7 = vpop.f32.mrb[167].mxu1 }
 0x635   :  { %v5448_v49 = vpack.c.bf16 %v5436_v13, %v5435_v41  ;;  %v5404_v54 = vadd.f32 %v7484_v0, %v10184_v4  ;;  %v7487_v46 = vadd.f32 %v7486_v7, %v7485_v51 }
 0x636   :  { %v5462_v33 = vld [vmem:[#allocation2] sm:$0xf0]  ;;  %v5461_v10 = vld [vmem:[#allocation2] sm:$0xf] }
 0x637   :  { %5455 = vst [vmem:[#allocation2 + $0x8] sm:$0xff] %v5448_v49  ;;  %v5423_v43 = vadd.f32 %v10217_v1, %v5404_v54  ;;  %v5405_v16 = vadd.f32 %v7487_v46, %v10186_v6  ;;  %v5464_v32 = vrot.slane %v5462_v33, 4 }
 0x639   :  { %v5424_v24 = vadd.f32 %v10217_v1, %v5405_v16  ;;  %v7488_v59 = vpop.f32.mrb[168].mxu1  ;;  %v5437_v30 = vmax.f32 %v5423_v43, 0.0  ;;  %v5466_v40 = vmax.bf16 %v5464_v32, %v5461_v10 }
 0x63a   :  { %v7489_v19 = vpop.f32.mrb[169].mxu1 }
 0x63b   :  { %v5438_v14 = vmax.f32 %v5424_v24, 0.0  ;;  %v7490_v2 = vadd.f32 %v7489_v19, %v7488_v59  ;;  %v7491_v56 = vpop.f32.mrb[170].mxu1  ;;  %v10512_v59 = vld [vmem:[#allocation18_spill] sm:$0xff] }
 0x63c   :  { %v7492_v39 = vpop.f32.mrb[171].mxu1  ;;  %vm10513_vm5 = vnez %v10512_v59 }
 0x63d   :  { %v5449_v4 = vpack.c.bf16 %v5438_v14, %v5437_v30  ;;  %v5406_v5 = vadd.f32 %v7490_v2, %v10190_v36  ;;  %v7493_v37 = vadd.f32 %v7492_v39, %v7491_v56  ;;  %vm5525_vm12 = vmor %vm10241_vm3, %vm10513_vm5  ;;  %v10514_v30 = vld [vmem:[#allocation17_spill] sm:$0xff]  ;;  %vm5605_vm5 = vsmask.f32 7946 }
 0x63e   :  { %v5467_v42 = vld [vmem:[#allocation2 + $0x8] sm:$0xf]  ;;  %v5478_v8 = vld [vmem:[#allocation2 + $0x8] sm:$0xf0]  ;;  %vm10258_vm1 = vmor %vm5527_vm0, %vm5525_vm12 }
 0x63f   :  { %v5468_v20 = vmax.bf16 %v5467_v42, %v5466_v40  ;;  %5456 = vst [vmem:[#allocation2 + $0x10] sm:$0xff] %v5449_v4  ;;  %v5425_v6 = vadd.f32 %v10217_v1, %v5406_v5  ;;  %v5407_v21 = vadd.f32 %v7493_v37, %v10192_v17  ;;  %v5480_v53 = vrot.slane %v5478_v8, 4  ;;  %vm5531_vm10 = vmor %vm10265_vm9, %vm10258_vm1  ;;  %v7939_v4 = vld [vmem:[#allocation10 + $0x18] sm:$0xff]  }
 0x640   :  { %vm5603_vm3 = vmand %vm5523_vm13, %vm5602_vm7  ;;  %vm10521_vm1 = vsmask.f32 7950 }
 0x641   :  { %v5470_v60 = vshrl.u32 %v5468_v20, 16  ;;  %v5426_v52 = vadd.f32 %v10217_v1, %v5407_v21  ;;  %v7494_v62 = vpop.f32.mrb[172].mxu1  ;;  %v5439_v25 = vmax.f32 %v5425_v6, 0.0  ;;  %v5475_v22 = vrot.slane %v5468_v20, 1  ;;  %vm5604_vm12 = vmor %vm5603_vm3, %vm5601_vm6 }
 0x642   :  { %v7495_v12 = vpop.f32.mrb[173].mxu1  ;;  %v5482_v9 = vmax.bf16 %v5480_v53, %v5467_v42  ;;  %vm5606_vm11 = vmand %vm5526_vm8, %vm5605_vm5  ;;  %vm8055_vm8 = vmmov 0   ;;  %v7943_v42 = vld [vmem:[#allocation10 + $0x38] sm:$0xff]  }
 0x643   :  { %v5440_v28 = vmax.f32 %v5426_v52, 0.0  ;;  %v7496_v35 = vadd.f32 %v7495_v12, %v7494_v62  ;;  %v7497_v29 = vpop.f32.mrb[174].mxu1  ;;  %v5473_v36 = vmax.bf16 %v5470_v60, %v5468_v20  ;;  %vm5607_vm0 = vmor %vm5606_vm11, %vm5604_vm12 }
 0x644   :  { %v7498_v44 = vpop.f32.mrb[175].mxu1  ;;  %vm5608_vm2 = vmand %vm5529_vm15, %vm10521_vm1 }
 0x645   :  { %v5450_v15 = vpack.c.bf16 %v5440_v28, %v5439_v25  ;;  %v5408_v47 = vadd.f32 %v7496_v35, %v10198_v55  ;;  %v7499_v11 = vadd.f32 %v7498_v44, %v7497_v29  ;;  %v5477_v17 = vmax.bf16 %v5475_v22, %v5473_v36  ;;  %v5532_v28 = vld [vmem:[#allocation6] sm:$0xf]  ;;  %vm5609_vm13 = vmor %vm5608_vm2, %vm5607_vm0 }
 0x646   :  { %v5483_v23 = vld [vmem:[#allocation2 + $0x10] sm:$0xf]  ;;  %v5502_v55 = vunpack.c.0.s8 %v5501_v45 }
 0x647   :  { %v5484_v27 = vmax.bf16 %v5483_v23, %v5482_v9  ;;  %5457 = vst [vmem:[#allocation2 + $0x18] sm:$0xff] %v5450_v15  ;;  %v5427_v58 = vadd.f32 %v10217_v1, %v5408_v47  ;;  %v5409_v38 = vadd.f32 %v7499_v11, %v10200_v34  ;;  %v5495_v0 = vrot.slane %v5477_v17, 1 }
 0x648   :  { %v10251_v14 = vsub.s32 %v5502_v55, %v10514_v30 }
 0x649   :  { %v5486_v63 = vshrl.u32 %v5484_v27, 16  ;;  %v5428_v48 = vadd.f32 %v10217_v1, %v5409_v38  ;;  %v7500_v50 = vpop.f32.mrb[176].mxu1  ;;  %v5441_v41 = vmax.f32 %v5427_v58, 0.0  ;;  %v5491_v34 = vrot.slane %v5484_v27, 1 }
 0x64a   :  { %v7501_v13 = vpop.f32.mrb[177].mxu1  ;;  %v5498_v19 = vcombine.low %v5477_v17, %v5495_v0 }
 0x64b   :  { %v5442_v7 = vmax.f32 %v5428_v48, 0.0  ;;  %v7502_v49 = vadd.f32 %v7501_v13, %v7500_v50  ;;  %v7503_v54 = vpop.f32.mrb[178].mxu1  ;;  %v5489_v46 = vmax.bf16 %v5486_v63, %v5484_v27 }
 0x64c   :  { %v7504_v33 = vpop.f32.mrb[179].mxu1  ;;  %v5506_v37 = vrot.slane %v5498_v19, %v10251_v14 }
 0x64d   :  { %v5451_v43 = vpack.c.bf16 %v5442_v7, %v5441_v41  ;;  %v5410_v16 = vadd.f32 %v7502_v49, %v10204_v61  ;;  %v7505_v32 = vadd.f32 %v7504_v33, %v7503_v54  ;;  %v5493_v24 = vmax.bf16 %v5491_v34, %v5489_v46 }
 0x64f   :  { %5458 = vst [vmem:[#allocation2 + $0x20] sm:$0xff] %v5451_v43  ;;  %v5429_v2 = vadd.f32 %v10217_v1, %v5410_v16  ;;  %v5411_v56 = vadd.f32 %v7505_v32, %v10206_v57  ;;  %v5497_v61 = vrot.slane %v5493_v24, 1 }
 0x651   :  { %v5430_v10 = vadd.f32 %v10217_v1, %v5411_v56  ;;  %v7506_v39 = vpop.f32.mrb[180].mxu1  ;;  %v5499_v40 = vcombine.low %v5493_v24, %v5497_v61  ;;  %v5443_v57 = vmax.f32 %v5429_v2, 0.0  ;;  %v7936_v56 = vld [vmem:[#allocation10] sm:$0xff]  }
 0x652   :  { %v7507_v5 = vpop.f32.mrb[181].mxu1 }
 0x653   :  { %v5444_v8 = vmax.f32 %v5430_v10, 0.0  ;;  %v7508_v20 = vadd.f32 %v7507_v5, %v7506_v39  ;;  %v7509_v6 = vpop.f32.mrb[182].mxu1  ;;  %v5513_v21 = vrot.slane %v5499_v40, %v10251_v14  ;;  %v7937_v39 = vld [vmem:[#allocation10 + $0x8] sm:$0xff]   ;;  %v7938_v40 = vld [vmem:[#allocation10 + $0x10] sm:$0xff]  }
 0x654   :  { %v7510_v60 = vpop.f32.mrb[183].mxu1  ;;  %v7941_v5 = vld [vmem:[#allocation10 + $0x28] sm:$0xff]  }
 0x655   :  { %v5452_v53 = vpack.c.bf16 %v5444_v8, %v5443_v57  ;;  %v5412_v52 = vadd.f32 %v7508_v20, %v10210_v3  ;;  %v7511_v62 = vadd.f32 %v7510_v60, %v7509_v6  ;;  %v5514_v12 = vcombine.low %v5506_v37, %v5513_v21  ;;  %v7942_v37 = vld [vmem:[#allocation10 + $0x30] sm:$0xff]   ;;  %v7944_v57 = vld [vmem:[#allocation12] sm:$0xff]   ;;  %v7945_v8 = vld [vmem:[#allocation12 + $0x8] sm:$0xff]  }
 0x656   :  { %v5536_v25 = vld [vmem:[#allocation2 + $0x20] sm:$0xf0]  ;;  %v5535_v47 = vld [vmem:[#allocation2 + $0x20] sm:$0xf]  ;;  %v7946_v20 = vld [vmem:[#allocation12 + $0x10] sm:$0xff]  }
 0x657   :  { %5459 = vst [vmem:[#allocation2 + $0x28] sm:$0xff] %v5452_v53  ;;  %v5431_v35 = vadd.f32 %v10217_v1, %v5412_v52  ;;  %v5413_v29 = vadd.f32 %v7511_v62, %v10212_v18  ;;  %v5521_v36 = vrot.slane %v5514_v12, %v10251_v14  ;;  %v5538_v44 = vrot.slane %v5536_v25, 4  ;;  %v7947_v6 = vld [vmem:[#allocation12 + $0x18] sm:$0xff]   ;;  %v7948_v21 = vld [vmem:[#allocation12 + $0x20] sm:$0xff]   ;;  %v7949_v60 = vld [vmem:[#allocation12 + $0x28] sm:$0xff]  }
 0x658   :  { %v6732_v52 = vld [vmem:[%s10335_s9 + $0x5] ss:$0 sm:$0xff] }
 0x659   :  { %v5432_v22 = vadd.f32 %v10217_v1, %v5413_v29  ;;  %v5533_v3 = vsel %vm5531_vm10, %v5521_v36, %v5532_v28  ;;  %v5445_v9 = vmax.f32 %v5431_v35, 0.0  ;;  %v5540_v11 = vmax.bf16 %v5538_v44, %v5535_v47 }
 0x65a   :  { %5534 = vst [vmem:[#allocation6] sm:$0xf] %v5533_v3 }
 0x65b   :  { %v5446_v15 = vmax.f32 %v5432_v22, 0.0 }
 0x65d   :  { %v5453_v23 = vpack.c.bf16 %v5446_v15, %v5445_v9 }
 0x65e   :  { %v5541_v17 = vld [vmem:[#allocation2 + $0x28] sm:$0xf]  ;;  %v5552_v26 = vld [vmem:[#allocation2 + $0x28] sm:$0xf0] }
 0x65f   :  { %v5542_v45 = vmax.bf16 %v5541_v17, %v5540_v11  ;;  %5460 = vst [vmem:[#allocation2 + $0x30] sm:$0x7f] %v5453_v23  ;;  %v5554_v27 = vrot.slane %v5552_v26, 4  ;;  %v7950_v11 = vld [vmem:[#allocation12 + $0x30] sm:$0xff]   ;;  %v7951_v23 = vld [vmem:[#allocation12 + $0x38] sm:$0xff]  }
 0x661   :  { %v5544_v58 = vshrl.u32 %v5542_v45, 16  ;;  %v5556_v18 = vmax.bf16 %v5554_v27, %v5541_v17  ;;  %v5549_v63 = vrot.slane %v5542_v45, 1  ;;  %v5610_v32 = vld [vmem:[#allocation6] sm:$0xf]  ;;  %v6766_v17 = vld [vmem:[%s10335_s9 + $0x6] ss:$0 sm:$0xff] }
 0x663   :  { %v5547_v38 = vmax.bf16 %v5544_v58, %v5542_v45 }
 0x665   :  { %v5551_v41 = vmax.bf16 %v5549_v63, %v5547_v38 }
 0x666   :  { %v5557_v48 = vld [vmem:[#allocation2 + $0x30] sm:$0xf] }
 0x667   :  { %v5558_v50 = vmax.bf16 %v5557_v48, %v5556_v18  ;;  %v5569_v55 = vrot.slane %v5551_v41, 1  ;;  %v6775_v48 = vld [vmem:[%s10335_s9 + $0x7] ss:$0 sm:$0xff] }
 0x669   :  { %v5560_v1 = vshrl.u32 %v5558_v50, 16  ;;  %v5565_v0 = vrot.slane %v5558_v50, 1  ;;  %v5572_v49 = vcombine.low %v5551_v41, %v5569_v55 }
 0x66b   :  { %v5563_v13 = vmax.bf16 %v5560_v1, %v5558_v50  ;;  %v5580_v46 = vrot.slane %v5572_v49, %v10251_v14 }
 0x66d   :  { %v5567_v51 = vmax.bf16 %v5565_v0, %v5563_v13 }
 0x66f   :  { %v5571_v7 = vrot.slane %v5567_v51, 1 }
 0x671   :  { %v5573_v54 = vcombine.low %v5567_v51, %v5571_v7 }
 0x673   :  { %v5587_v34 = vrot.slane %v5573_v54, %v10251_v14 }
 0x675   :  { %v5588_v33 = vcombine.low %v5580_v46, %v5587_v34 }
 0x677   :  { %v5595_v43 = vrot.slane %v5588_v33, %v10251_v14 }
 0x679   :  { %v5597_v16 = vshll.u32 %v5595_v43, 16 }
 0x67b   :  { %v5611_v24 = vsel %vm5609_vm13, %v5597_v16, %v5610_v32 }
 0x67c   :  { %5612 = vst [vmem:[#allocation6] sm:$0xf] %v5611_v24 }
 0x683   :  { %v6733_v59 = vld.sshfl [vmem:[#allocation6] sm:$0x33 pattern:$0x75316420] }
 0x684   :  { %v5691_v19 = vcombine.high %v6733_v59, %v6733_v59  ;;  %v5698_v30 = vrot.slane %v6733_v59, %v10251_v14 }
 0x686   :  { %v5705_v2 = vrot.slane %v5691_v19, %v10251_v14  ;;  %v5706_v10 = vcombine.high %v5698_v30, %v5698_v30  ;;  %v7940_v14 = vld [vmem:[#allocation10 + $0x20] sm:$0xff]  }
 0x688   :  { %5936 = vmatprep.mubr.bf16.mxu0 %v5705_v2  ;;  %v5707_v61 = vcombine.high %v5705_v2, %v5705_v2 }
 0x689   :  { %5937 = vmatmul.mubr.bf16.vlgmr.msra.gmra.mrb[184].mxu0 %v5698_v30 }
 0x68a   :  { %5976 = vmatprep.mubr.bf16.mxu1 %v5707_v61  ;;  %7639 = vmatpush3.bf16.msra.mxu0 %v7936_v56 }
 0x68b   :  { %5977 = vmatmul.mubr.bf16.vlgmr.msra.gmra.mrb[184].mxu1 %v5706_v10  ;;  %7640 = vmatprep.subr.bf16.mxu0 %v8053_v31 }
 0x68c   :  { %7654 = vmatprep.mubr.msk.bf16.mxu0 %vm8055_vm8, %v8053_v31  ;;  %7674 = vmatprep.mubr.msk.bf16.mxu1 %vm8055_vm8, %v8053_v31 }
 0x68d   :  { %7659 = vmatpush3.bf16.msra.mxu1 %v7944_v57 }
 0x68e   :  { %7641 = vmatpush3.bf16.msra.mxu0 %v7937_v39  ;;  %7660 = vmatprep.subr.bf16.mxu1 %v8053_v31 }
 0x68f   :  { %7642 = vmatprep.subr.bf16.mxu0 %v8053_v31 }
 0x691   :  { %7661 = vmatpush3.bf16.msra.mxu1 %v7945_v8 }
 0x692   :  { %7643 = vmatpush3.bf16.msra.mxu0 %v7938_v40  ;;  %7662 = vmatprep.subr.bf16.mxu1 %v8053_v31 }
 0x693   :  { %7644 = vmatprep.subr.bf16.mxu0 %v8053_v31 }
 0x695   :  { %7663 = vmatpush3.bf16.msra.mxu1 %v7946_v20 }
 0x696   :  { %7645 = vmatpush3.bf16.msra.mxu0 %v7939_v4  ;;  %7664 = vmatprep.subr.bf16.mxu1 %v8053_v31 }
 0x697   :  { %7646 = vmatprep.subr.bf16.mxu0 %v8053_v31 }
 0x699   :  { %7665 = vmatpush3.bf16.msra.mxu1 %v7947_v6 }
 0x69a   :  { %7647 = vmatpush3.bf16.msra.mxu0 %v7940_v14  ;;  %7666 = vmatprep.subr.bf16.mxu1 %v8053_v31 }
 0x69b   :  { %7648 = vmatprep.subr.bf16.mxu0 %v8053_v31 }
 0x69d   :  { %7667 = vmatpush3.bf16.msra.mxu1 %v7948_v21 }
 0x69e   :  { %7649 = vmatpush3.bf16.msra.mxu0 %v7941_v5  ;;  %7668 = vmatprep.subr.bf16.mxu1 %v8053_v31 }
 0x69f   :  { %7650 = vmatprep.subr.bf16.mxu0 %v8053_v31 }
 0x6a1   :  { %7669 = vmatpush3.bf16.msra.mxu1 %v7949_v60 }
 0x6a2   :  { %7651 = vmatpush3.bf16.msra.mxu0 %v7942_v37  ;;  %7670 = vmatprep.subr.bf16.mxu1 %v8053_v31 }
 0x6a3   :  { %7652 = vmatprep.subr.bf16.mxu0 %v8053_v31 }
 0x6a5   :  { %7671 = vmatpush3.bf16.msra.mxu1 %v7950_v11 }
 0x6a6   :  { %7653 = vmatpush3.bf16.msra.mxu0 %v7943_v42  ;;  %7672 = vmatprep.subr.bf16.mxu1 %v8053_v31 }
 0x6a9   :  { %7673 = vmatpush3.bf16.msra.mxu1 %v7951_v23 }
 0x75c   :  { %v7528_v53 = vpop.f32.mrb[184].mxu0 }
 0x75d   :  { %v7529_v62 = vpop.f32.mrb[185].mxu0 }
 0x75e   :  { %v7530_v12 = vadd.f32 %v7529_v62, %v7528_v53  ;;  %v7531_v25 = vpop.f32.mrb[186].mxu0  ;;  %v7550_v28 = vpop.f32.mrb[184].mxu1 }
 0x75f   :  { %v7532_v35 = vpop.f32.mrb[187].mxu0  ;;  %v7551_v29 = vpop.f32.mrb[185].mxu1 }
 0x760   :  { %v5939_v36 = vadd.f32 %v7530_v12, %v6732_v52  ;;  %v7552_v44 = vadd.f32 %v7551_v29, %v7550_v28  ;;  %v7553_v22 = vpop.f32.mrb[186].mxu1 }
 0x761   :  { %v7554_v3 = vpop.f32.mrb[187].mxu1 }
 0x762   :  { %v5979_v9 = vadd.f32 %v7552_v44, %v5939_v36 }
 0x764   :  { %v5984_v15 = vmax.f32 %v5979_v9, 0.0 }
 0x766   :  { %v5985_v47 = vpack.c.bf16 %v5984_v15, %v5984_v15 }
 0x768   :  { %7655 = vmatmul.mubr.bf16.vlgmr.msra.gmra.mrb[188].mxu0 %v5985_v47 }
 0x83b   :  { %v6089_v26 = vpop.f32.mrb[188].mxu0 }
 0x83c   :  { %v6090_v45 = vadd.f32 %v6766_v17, %v6089_v26  ;;  %v7656_v27 = vpop.f32.mrb[189].mxu0 }
 0x83d   :  { %v6092_v58 = vpop.f32.mrb[190].mxu0 }
 0x83e   :  { %v6095_v38 = vmax.f32 %v6090_v45, 0.0  ;;  %v7657_v18 = vpop.f32.mrb[191].mxu0 }
 0x840   :  { %v6096_v63 = vpack.c.bf16 %v6095_v38, %v6095_v38 }
 0x842   :  { %7675 = vmatmul.mubr.bf16.vlgmr.msra.gmra.mrb[188].mxu1 %v6096_v63 }
 0x915   :  { %v6200_v31 = vpop.f32.mrb[188].mxu1 }
 0x916   :  { %v6201_v50 = vadd.f32 %v6775_v48, %v6200_v31  ;;  %v7676_v41 = vpop.f32.mrb[189].mxu1 }
 0x917   :  { %v6203_v1 = vpop.f32.mrb[190].mxu1 }
 0x918   :  { %6206 = vst [vmem:[#allocation13] sm:$0x3] %v6201_v50  ;;  %v7677_v13 = vpop.f32.mrb[191].mxu1 }
 0x919   :  { %8030 = shalt.err (!%p8027_p0)
}
 0x91a   :  { %s8031_s9 = scalar_lea.hbm %s10336_s10, 32 }
 0x91b   :  { %p8032_p1 = scmp.ne.s32.totalorder %s10336_s10, %s8031_s9  ;;  %p8035_p2 = scmp.lt.u32.totalorder %s8031_s9, %s10336_s10 }
 0x91d   :  { %p8037_p3 = pnand %p8035_p2, %p8032_p1 }
 0x91f   :  { %8040 = shalt.err (!%p8037_p3)
}
 0x920   :  { %6216 = dma.vmem_to_hbm [thread:$0]  %s6214_s24, 32, %s10336_s10, [#allocation9]  }
 0x921   :  { %8045 = dma.done.wait [#allocation9], 32  }
 0x922   :  { %8046 = vsyncadd [#allocation9], 4294967264 }
 0x923   :  { %6220 = vsyncpa [#allocation8], 1 }
 0x924   :  { %6221 = vsyncpa [#allocation11], 1 }
 0x925   :  { %6222 = vsyncpa [#allocation9], 1 }

</bundles_post_ra>
